<compile_context>
chip_gen: v5e
topology: v5e:2x2
jax: 0.10.0
libtpu: 0.0.40
codegen_flags: <defaults>
</compile_context>

<pallas_src>
import functools

import jax
import jax.numpy as jnp
from jax.experimental import pallas as pl
from jax.experimental.pallas import tpu as pltpu

LANE = 128
TILE_B = 8                                   # samples per grid step (sublane-stacked)
CONV_CHANNELS = [16, 32, 64, 32, 16]
KSIZE = 3
POOL_FLAGS = (True, True, False, False, False)  # pool after conv1, conv2 only


def _valid_rows_mask(r, length, tile_b, offset):
    """True where (r % length) != offset, built from compares only (no div/mod)."""
    bad = None
    for s in range(tile_b):
        cond = r == (s * length + offset)
        bad = cond if bad is None else (bad | cond)
    return jnp.logical_not(bad)


# --------------------------------------------------------------------------
# Fused kernel: conv stack + pools + ReLUs + flatten + FC head for TILE_B
# samples per grid step.  Everything lives in vregs; weights sit in VMEM.
# --------------------------------------------------------------------------
def _net_kernel(x_ref, cw_ref, cb_ref, f1w_ref, frw_ref, fb_ref, o_ref, *,
                pool_flags, tile_b, input_length):
    f32 = jnp.float32
    x = x_ref[...]                               # (TILE_B*L0, 128) channels-last
    L = input_length

    for layer, pool in enumerate(pool_flags):
        rows = tile_b * L
        r = jax.lax.broadcasted_iota(jnp.int32, (rows, rows), 0)
        c = jax.lax.broadcasted_iota(jnp.int32, (rows, rows), 1)
        # Block-diagonal +-1 shift selection matrices: row r <- x[r-1] / x[r+1]
        # within the same sample; boundary rows stay zero (= "same" padding).
        ok_m = _valid_rows_mask(r, L, tile_b, 0)
        ok_p = _valid_rows_mask(r, L, tile_b, L - 1)
        shift_m = jnp.where((c == r - 1) & ok_m, 1.0, 0.0).astype(f32)
        shift_p = jnp.where((c == r + 1) & ok_p, 1.0, 0.0).astype(f32)
        x_m = jnp.dot(shift_m, x, preferred_element_type=f32)
        x_p = jnp.dot(shift_p, x, preferred_element_type=f32)

        # Conv as three accumulated MXU matmuls (tap k=0 pairs with x[l-1]).
        base = 3 * layer
        y = (jnp.dot(x_m, cw_ref[base + 0], preferred_element_type=f32) +
             jnp.dot(x,   cw_ref[base + 1], preferred_element_type=f32) +
             jnp.dot(x_p, cw_ref[base + 2], preferred_element_type=f32))

        if pool:  # MaxPool1d(kernel=2, stride=2): even/odd row selection.
            L //= 2
            hrows = tile_b * L
            pr = jax.lax.broadcasted_iota(jnp.int32, (hrows, rows), 0)
            pc = jax.lax.broadcasted_iota(jnp.int32, (hrows, rows), 1)
            sel_e = jnp.where(pc == 2 * pr, 1.0, 0.0).astype(f32)
            sel_o = jnp.where(pc == 2 * pr + 1, 1.0, 0.0).astype(f32)
            y = jnp.maximum(jnp.dot(sel_e, y, preferred_element_type=f32),
                            jnp.dot(sel_o, y, preferred_element_type=f32))

        # Bias once after the max (max commutes with a per-channel constant),
        # then ReLU — matches relu(pool(conv(x) + b)).
        x = jnp.maximum(y + cb_ref[layer], 0.0)

    # Channel-major flatten (torch x.view(-1, fc_input_dim)) fused with fc1:
    # h1[s] = sum_l  x[s*L5 + l, :] @ W1_block[l]   (host restacks fc1 weight
    # so block l, row c corresponds to torch's flat index c*L5 + l).
    L5 = L
    rows = tile_b * L5
    fr = jax.lax.broadcasted_iota(jnp.int32, (tile_b, rows), 0)
    fcl = jax.lax.broadcasted_iota(jnp.int32, (tile_b, rows), 1)
    h = jnp.zeros((tile_b, LANE), f32)
    for l in range(L5):
        sel = jnp.where(fcl == fr * L5 + l, 1.0, 0.0).astype(f32)   # (TILE_B, rows)
        x_l = jnp.dot(sel, x, preferred_element_type=f32)           # (TILE_B, 128)
        h = h + jnp.dot(x_l, f1w_ref[l], preferred_element_type=f32)
    h = jnp.maximum(h + fb_ref[0], 0.0)

    n_rest = frw_ref.shape[0]
    for i in range(n_rest):
        h = jnp.dot(h, frw_ref[i], preferred_element_type=f32) + fb_ref[i + 1]
        if i < n_rest - 1:
            h = jnp.maximum(h, 0.0)

    # Dropout(p=0.5) after fc_final is identity in eval mode.
    o_ref[...] = h                              # lane-dense (TILE_B, 128) store


# --------------------------------------------------------------------------
# Parameter init (PyTorch-style uniform(-1/sqrt(fan_in), 1/sqrt(fan_in)));
# eval-mode NoisyConv1d only needs weight_mu / bias_mu.
# --------------------------------------------------------------------------
def init_params(key, n_states, n_hiddens, n_actions, input_length):
    convs = []
    cin = n_states
    for cout in CONV_CHANNELS:
        key, kw, kb = jax.random.split(key, 3)
        bound = 1.0 / float((cin * KSIZE) ** 0.5)
        w = jax.random.uniform(kw, (cout, cin, KSIZE), jnp.float32, -bound, bound)
        b = jax.random.uniform(kb, (cout,), jnp.float32, -bound, bound)
        convs.append((w, b))
        cin = cout

    L = input_length
    for pool in POOL_FLAGS:
        if pool:
            L //= 2
    # TODO(synk): the reference __init__ sizes fc1 assuming padding=0 convs,
    # but NoisyConv1d.forward pads with K//2; we size fc1 for what the forward
    # pass actually produces (16 * input_length // 4).
    fc_in = CONV_CHANNELS[-1] * L

    dims = [fc_in] + list(n_hiddens) + [n_actions]
    fcs = []
    for d_in, d_out in zip(dims[:-1], dims[1:]):
        key, kw, kb = jax.random.split(key, 3)
        bound = 1.0 / float(d_in ** 0.5)
        w = jax.random.uniform(kw, (d_in, d_out), jnp.float32, -bound, bound)
        b = jax.random.uniform(kb, (d_out,), jnp.float32, -bound, bound)
        fcs.append((w, b))
    return convs, fcs


# --------------------------------------------------------------------------
# One-time host-side packing into lane-dense kernel operands.
# --------------------------------------------------------------------------
def pack_params(params, n_states, input_length):
    convs, fcs = params
    cws, cbs = [], []
    cin = n_states
    for (w, b), cout in zip(convs, CONV_CHANNELS):
        wk = jnp.transpose(w, (2, 1, 0))                               # (K, Cin, Cout)
        wk = jnp.pad(wk, ((0, 0), (0, LANE - cin), (0, LANE - cout)))
        cws.append(wk)                                                 # (3, 128, 128)
        cbs.append(jnp.pad(b, (0, LANE - cout)).reshape(1, LANE))
        cin = cout
    cw = jnp.concatenate(cws, axis=0)                                  # (15, 128, 128)
    cb = jnp.stack(cbs)                                                # (5, 1, 128)

    L5 = input_length
    for pool in POOL_FLAGS:
        if pool:
            L5 //= 2
    c5 = CONV_CHANNELS[-1]

    (w1, b1), rest = fcs[0], fcs[1:]
    h0 = w1.shape[1]
    # torch flat index = c*L5 + l  ->  kernel block l, row c
    w1r = w1.reshape(c5, L5, h0).transpose(1, 0, 2)                    # (L5, C5, H0)
    f1w = jnp.pad(w1r, ((0, 0), (0, LANE - c5), (0, LANE - h0)))       # (L5, 128, 128)

    fbs = [jnp.pad(b1, (0, LANE - h0)).reshape(1, LANE)]
    frs = []
    for w, b in rest:
        d_in, d_out = w.shape
        frs.append(jnp.pad(w, ((0, LANE - d_in), (0, LANE - d_out))))
        fbs.append(jnp.pad(b, (0, LANE - d_out)).reshape(1, LANE))
    frw = jnp.stack(frs)                                               # (R, 128, 128)
    fb = jnp.stack(fbs)                                                # (R+1, 1, 128)
    return cw, cb, f1w, frw, fb


# --------------------------------------------------------------------------
# Fused forward: one pallas_call, grid = batch tiles of TILE_B samples
# ("parallel" -> megacore sharding on v7x for larger batches).
# --------------------------------------------------------------------------
def net_forward(x_batch, packed, *, n_actions, tile_b=TILE_B):
    """x_batch: (B, n_states, input_length) float32.  Each sample follows the
    PyTorch forward's implicit batch-of-1 (x.unsqueeze(0)) semantics."""
    cw, cb, f1w, frw, fb = packed
    B, n_states, L0 = x_batch.shape
    assert L0 % 4 == 0, "input_length must be divisible by 4 (two 2x pools)"
    assert tile_b % 8 == 0, "tile_b must be a multiple of 8 (sublane tiling)"

    b_pad = ((B + tile_b - 1) // tile_b) * tile_b
    # Single cheap layout prep: channels-last, pad channels to 128 lanes, pad
    # batch to a multiple of TILE_B, stack samples along sublanes.
    x_lc = jnp.transpose(x_batch, (0, 2, 1)).astype(jnp.float32)       # (B, L, C)
    x_lc = jnp.pad(x_lc, ((0, b_pad - B), (0, 0), (0, LANE - n_states)))
    x_rows = x_lc.reshape(b_pad * L0, LANE)                            # (B_pad*L, 128)

    kern = functools.partial(_net_kernel, pool_flags=POOL_FLAGS,
                             tile_b=tile_b, input_length=L0)
    out = pl.pallas_call(
        kern,
        grid=(b_pad // tile_b,),
        out_shape=jax.ShapeDtypeStruct((b_pad, LANE), jnp.float32),
        in_specs=[
            pl.BlockSpec((tile_b * L0, LANE), lambda b: (b, 0)),  # per-tile input
            pl.BlockSpec(cw.shape, lambda b: (0, 0, 0)),          # conv tap weights
            pl.BlockSpec(cb.shape, lambda b: (0, 0, 0)),          # conv biases
            pl.BlockSpec(f1w.shape, lambda b: (0, 0, 0)),         # fc1 weight blocks
            pl.BlockSpec(frw.shape, lambda b: (0, 0, 0)),         # remaining fc weights
            pl.BlockSpec(fb.shape, lambda b: (0, 0, 0)),          # fc biases
        ],
        out_specs=pl.BlockSpec((tile_b, LANE), lambda b: (b, 0)),
        compiler_params=pltpu.CompilerParams(
            dimension_semantics=("parallel",)),
    )(x_rows, cw, cb, f1w, frw, fb)
    return out[:B, :n_actions]


# --------------------------------------------------------------------------
# Pure-JAX reference (same eval-mode math as the PyTorch forward).
# --------------------------------------------------------------------------
def _reference_forward(x_cl, params):
    convs, fcs = params
    hp = jax.lax.Precision.HIGHEST
    h = x_cl[None].astype(jnp.float32)                                 # (1, C, L)
    for (w, b), pool in zip(convs, POOL_FLAGS):
        h = jax.lax.conv_general_dilated(
            h, w, window_strides=(1,), padding=((KSIZE // 2, KSIZE // 2),),
            dimension_numbers=("NCH", "OIH", "NCH"),
            precision=hp) + b[None, :, None]
        if pool:
            h = jax.lax.reduce_window(h, -jnp.inf, jax.lax.max,
                                      (1, 1, 2), (1, 1, 2), "VALID")
        h = jax.nn.relu(h)
    h = h.reshape(1, -1)                                               # channel-major
    for i, (w, b) in enumerate(fcs):
        h = jnp.dot(h, w, precision=hp) + b
        if i < len(fcs) - 1:
            h = jax.nn.relu(h)
    return h  # Dropout(p=0.5) eval-mode identity


if __name__ == "__main__":
    n_states = 4
    input_length = 16
    n_hiddens = [32, 32]
    n_actions = 8
    batch = 2

    key = jax.random.PRNGKey(0)
    key, kx = jax.random.split(key)
    x = jax.random.normal(kx, (batch, n_states, input_length), jnp.float32)

    params = init_params(key, n_states, n_hiddens, n_actions, input_length)
    packed = pack_params(params, n_states, input_length)

    fwd = jax.jit(functools.partial(net_forward, n_actions=n_actions))
    out = jax.block_until_ready(fwd(x, packed))
    assert out.shape == (batch, n_actions)

    ref = jnp.concatenate(
        [_reference_forward(x[i], params) for i in range(batch)], axis=0)
    assert jnp.allclose(out, ref, atol=2e-3, rtol=2e-3), (out, ref)

    print("KERNEL_OK")
</pallas_src>

<mosaic_0001>
module attributes {stable_mosaic.version = 11 : i64} {
  func.func @_net_kernel(%arg0: i32, %arg1: memref<128x128xf32, #tpu.memory_space<vmem>>, %arg2: memref<15x128x128xf32, #tpu.memory_space<vmem>>, %arg3: memref<5x1x128xf32, #tpu.memory_space<vmem>>, %arg4: memref<4x128x128xf32, #tpu.memory_space<vmem>>, %arg5: memref<2x128x128xf32, #tpu.memory_space<vmem>>, %arg6: memref<3x1x128xf32, #tpu.memory_space<vmem>>, %arg7: memref<8x128xf32, #tpu.memory_space<vmem>>) attributes {dimension_semantics = [#tpu.dimension_semantics<parallel>], iteration_bounds = array<i64: 1>, scalar_prefetch = 0 : i64, scratch_operands = 0 : i64, tpu.core_type = #tpu.core_type<tc>, window_params = [{transform_indices = @transform_0, window_bounds = array<i64: 128, 128>}, {pipeline_mode = #tpu.pipeline_mode<synchronous>, transform_indices = @transform_1, window_bounds = array<i64: 15, 128, 128>}, {pipeline_mode = #tpu.pipeline_mode<synchronous>, transform_indices = @transform_2, window_bounds = array<i64: 5, 1, 128>}, {pipeline_mode = #tpu.pipeline_mode<synchronous>, transform_indices = @transform_3, window_bounds = array<i64: 4, 128, 128>}, {pipeline_mode = #tpu.pipeline_mode<synchronous>, transform_indices = @transform_4, window_bounds = array<i64: 2, 128, 128>}, {pipeline_mode = #tpu.pipeline_mode<synchronous>, transform_indices = @transform_5, window_bounds = array<i64: 3, 1, 128>}, {transform_indices = @transform_6, window_bounds = array<i64: 8, 128>}]} {
    %c0 = arith.constant 0 : index
    %c0_0 = arith.constant 0 : index
    %0 = vector.load %arg1[%c0, %c0_0] : memref<128x128xf32, #tpu.memory_space<vmem>>, vector<128x128xf32>
    %1 = tpu.iota {dimensions = array<i32: 0>} : vector<128x128xi32>
    %2 = tpu.iota {dimensions = array<i32: 1>} : vector<128x128xi32>
    %c0_i32 = arith.constant 0 : i32
    %3 = vector.broadcast %c0_i32 : i32 to vector<128x128xi32>
    %4 = arith.cmpi eq, %1, %3 : vector<128x128xi32>
    %c16_i32 = arith.constant 16 : i32
    %5 = vector.broadcast %c16_i32 : i32 to vector<128x128xi32>
    %6 = arith.cmpi eq, %1, %5 : vector<128x128xi32>
    %7 = arith.ori %4, %6 : vector<128x128xi1>
    %c32_i32 = arith.constant 32 : i32
    %8 = vector.broadcast %c32_i32 : i32 to vector<128x128xi32>
    %9 = arith.cmpi eq, %1, %8 : vector<128x128xi32>
    %10 = arith.ori %7, %9 : vector<128x128xi1>
    %c48_i32 = arith.constant 48 : i32
    %11 = vector.broadcast %c48_i32 : i32 to vector<128x128xi32>
    %12 = arith.cmpi eq, %1, %11 : vector<128x128xi32>
    %13 = arith.ori %10, %12 : vector<128x128xi1>
    %c64_i32 = arith.constant 64 : i32
    %14 = vector.broadcast %c64_i32 : i32 to vector<128x128xi32>
    %15 = arith.cmpi eq, %1, %14 : vector<128x128xi32>
    %16 = arith.ori %13, %15 : vector<128x128xi1>
    %c80_i32 = arith.constant 80 : i32
    %17 = vector.broadcast %c80_i32 : i32 to vector<128x128xi32>
    %18 = arith.cmpi eq, %1, %17 : vector<128x128xi32>
    %19 = arith.ori %16, %18 : vector<128x128xi1>
    %c96_i32 = arith.constant 96 : i32
    %20 = vector.broadcast %c96_i32 : i32 to vector<128x128xi32>
    %21 = arith.cmpi eq, %1, %20 : vector<128x128xi32>
    %22 = arith.ori %19, %21 : vector<128x128xi1>
    %c112_i32 = arith.constant 112 : i32
    %23 = vector.broadcast %c112_i32 : i32 to vector<128x128xi32>
    %24 = arith.cmpi eq, %1, %23 : vector<128x128xi32>
    %25 = arith.ori %22, %24 : vector<128x128xi1>
    %cst = arith.constant dense<true> : vector<128x128xi1>
    %26 = arith.xori %25, %cst : vector<128x128xi1>
    %c15_i32 = arith.constant 15 : i32
    %27 = vector.broadcast %c15_i32 : i32 to vector<128x128xi32>
    %28 = arith.cmpi eq, %1, %27 : vector<128x128xi32>
    %c31_i32 = arith.constant 31 : i32
    %29 = vector.broadcast %c31_i32 : i32 to vector<128x128xi32>
    %30 = arith.cmpi eq, %1, %29 : vector<128x128xi32>
    %31 = arith.ori %28, %30 : vector<128x128xi1>
    %c47_i32 = arith.constant 47 : i32
    %32 = vector.broadcast %c47_i32 : i32 to vector<128x128xi32>
    %33 = arith.cmpi eq, %1, %32 : vector<128x128xi32>
    %34 = arith.ori %31, %33 : vector<128x128xi1>
    %c63_i32 = arith.constant 63 : i32
    %35 = vector.broadcast %c63_i32 : i32 to vector<128x128xi32>
    %36 = arith.cmpi eq, %1, %35 : vector<128x128xi32>
    %37 = arith.ori %34, %36 : vector<128x128xi1>
    %c79_i32 = arith.constant 79 : i32
    %38 = vector.broadcast %c79_i32 : i32 to vector<128x128xi32>
    %39 = arith.cmpi eq, %1, %38 : vector<128x128xi32>
    %40 = arith.ori %37, %39 : vector<128x128xi1>
    %c95_i32 = arith.constant 95 : i32
    %41 = vector.broadcast %c95_i32 : i32 to vector<128x128xi32>
    %42 = arith.cmpi eq, %1, %41 : vector<128x128xi32>
    %43 = arith.ori %40, %42 : vector<128x128xi1>
    %c111_i32 = arith.constant 111 : i32
    %44 = vector.broadcast %c111_i32 : i32 to vector<128x128xi32>
    %45 = arith.cmpi eq, %1, %44 : vector<128x128xi32>
    %46 = arith.ori %43, %45 : vector<128x128xi1>
    %c127_i32 = arith.constant 127 : i32
    %47 = vector.broadcast %c127_i32 : i32 to vector<128x128xi32>
    %48 = arith.cmpi eq, %1, %47 : vector<128x128xi32>
    %49 = arith.ori %46, %48 : vector<128x128xi1>
    %cst_1 = arith.constant dense<true> : vector<128x128xi1>
    %50 = arith.xori %49, %cst_1 : vector<128x128xi1>
    %c1_i32 = arith.constant 1 : i32
    %51 = vector.broadcast %c1_i32 : i32 to vector<128x128xi32>
    %52 = arith.subi %1, %51 : vector<128x128xi32>
    %53 = arith.cmpi eq, %2, %52 : vector<128x128xi32>
    %54 = arith.andi %53, %26 : vector<128x128xi1>
    %cst_2 = arith.constant 1.000000e+00 : f32
    %cst_3 = arith.constant 0.000000e+00 : f32
    %55 = vector.broadcast %cst_2 : f32 to vector<128x128xf32>
    %56 = vector.broadcast %cst_3 : f32 to vector<128x128xf32>
    %57 = arith.select %54, %55, %56 : vector<128x128xi1>, vector<128x128xf32>
    %c1_i32_4 = arith.constant 1 : i32
    %58 = vector.broadcast %c1_i32_4 : i32 to vector<128x128xi32>
    %59 = arith.addi %1, %58 : vector<128x128xi32>
    %60 = arith.cmpi eq, %2, %59 : vector<128x128xi32>
    %61 = arith.andi %60, %50 : vector<128x128xi1>
    %cst_5 = arith.constant 1.000000e+00 : f32
    %cst_6 = arith.constant 0.000000e+00 : f32
    %62 = vector.broadcast %cst_5 : f32 to vector<128x128xf32>
    %63 = vector.broadcast %cst_6 : f32 to vector<128x128xf32>
    %64 = arith.select %61, %62, %63 : vector<128x128xi1>, vector<128x128xf32>
    %cst_7 = arith.constant dense<0.000000e+00> : vector<128x128xf32>
    %65 = tpu.matmul %57, %0, %cst_7 {dimension_numbers = #tpu.dot_dimension_numbers<[1], [0], [0], [1], [0, 0, 1, 1], [], []>} : vector<128x128xf32>, vector<128x128xf32>, vector<128x128xf32> -> vector<128x128xf32>
    %cst_8 = arith.constant dense<0.000000e+00> : vector<128x128xf32>
    %66 = tpu.matmul %64, %0, %cst_8 {dimension_numbers = #tpu.dot_dimension_numbers<[1], [0], [0], [1], [0, 0, 1, 1], [], []>} : vector<128x128xf32>, vector<128x128xf32>, vector<128x128xf32> -> vector<128x128xf32>
    %c0_9 = arith.constant 0 : index
    %c0_10 = arith.constant 0 : index
    %c0_11 = arith.constant 0 : index
    %67 = vector.load %arg2[%c0_9, %c0_10, %c0_11] : memref<15x128x128xf32, #tpu.memory_space<vmem>>, vector<1x128x128xf32>
    %68 = vector.shape_cast %67 : vector<1x128x128xf32> to vector<128x128xf32>
    %cst_12 = arith.constant dense<0.000000e+00> : vector<128x128xf32>
    %69 = tpu.matmul %65, %68, %cst_12 {dimension_numbers = #tpu.dot_dimension_numbers<[1], [0], [0], [1], [0, 0, 1, 1], [], []>} : vector<128x128xf32>, vector<128x128xf32>, vector<128x128xf32> -> vector<128x128xf32>
    %c1 = arith.constant 1 : index
    %c0_13 = arith.constant 0 : index
    %c0_14 = arith.constant 0 : index
    %70 = vector.load %arg2[%c1, %c0_13, %c0_14] : memref<15x128x128xf32, #tpu.memory_space<vmem>>, vector<1x128x128xf32>
    %71 = vector.shape_cast %70 : vector<1x128x128xf32> to vector<128x128xf32>
    %cst_15 = arith.constant dense<0.000000e+00> : vector<128x128xf32>
    %72 = tpu.matmul %0, %71, %cst_15 {dimension_numbers = #tpu.dot_dimension_numbers<[1], [0], [0], [1], [0, 0, 1, 1], [], []>} : vector<128x128xf32>, vector<128x128xf32>, vector<128x128xf32> -> vector<128x128xf32>
    %73 = arith.addf %69, %72 : vector<128x128xf32>
    %c2 = arith.constant 2 : index
    %c0_16 = arith.constant 0 : index
    %c0_17 = arith.constant 0 : index
    %74 = vector.load %arg2[%c2, %c0_16, %c0_17] : memref<15x128x128xf32, #tpu.memory_space<vmem>>, vector<1x128x128xf32>
    %75 = vector.shape_cast %74 : vector<1x128x128xf32> to vector<128x128xf32>
    %cst_18 = arith.constant dense<0.000000e+00> : vector<128x128xf32>
    %76 = tpu.matmul %66, %75, %cst_18 {dimension_numbers = #tpu.dot_dimension_numbers<[1], [0], [0], [1], [0, 0, 1, 1], [], []>} : vector<128x128xf32>, vector<128x128xf32>, vector<128x128xf32> -> vector<128x128xf32>
    %77 = arith.addf %73, %76 : vector<128x128xf32>
    %78 = tpu.iota {dimensions = array<i32: 0>} : vector<64x128xi32>
    %79 = tpu.iota {dimensions = array<i32: 1>} : vector<64x128xi32>
    %c2_i32 = arith.constant 2 : i32
    %80 = vector.broadcast %c2_i32 : i32 to vector<64x128xi32>
    %81 = arith.muli %80, %78 : vector<64x128xi32>
    %82 = arith.cmpi eq, %79, %81 : vector<64x128xi32>
    %cst_19 = arith.constant 1.000000e+00 : f32
    %cst_20 = arith.constant 0.000000e+00 : f32
    %83 = vector.broadcast %cst_19 : f32 to vector<64x128xf32>
    %84 = vector.broadcast %cst_20 : f32 to vector<64x128xf32>
    %85 = arith.select %82, %83, %84 : vector<64x128xi1>, vector<64x128xf32>
    %c2_i32_21 = arith.constant 2 : i32
    %86 = vector.broadcast %c2_i32_21 : i32 to vector<64x128xi32>
    %87 = arith.muli %86, %78 : vector<64x128xi32>
    %c1_i32_22 = arith.constant 1 : i32
    %88 = vector.broadcast %c1_i32_22 : i32 to vector<64x128xi32>
    %89 = arith.addi %87, %88 : vector<64x128xi32>
    %90 = arith.cmpi eq, %79, %89 : vector<64x128xi32>
    %cst_23 = arith.constant 1.000000e+00 : f32
    %cst_24 = arith.constant 0.000000e+00 : f32
    %91 = vector.broadcast %cst_23 : f32 to vector<64x128xf32>
    %92 = vector.broadcast %cst_24 : f32 to vector<64x128xf32>
    %93 = arith.select %90, %91, %92 : vector<64x128xi1>, vector<64x128xf32>
    %cst_25 = arith.constant dense<0.000000e+00> : vector<64x128xf32>
    %94 = tpu.matmul %85, %77, %cst_25 {dimension_numbers = #tpu.dot_dimension_numbers<[1], [0], [0], [1], [0, 0, 1, 1], [], []>} : vector<64x128xf32>, vector<128x128xf32>, vector<64x128xf32> -> vector<64x128xf32>
    %cst_26 = arith.constant dense<0.000000e+00> : vector<64x128xf32>
    %95 = tpu.matmul %93, %77, %cst_26 {dimension_numbers = #tpu.dot_dimension_numbers<[1], [0], [0], [1], [0, 0, 1, 1], [], []>} : vector<64x128xf32>, vector<128x128xf32>, vector<64x128xf32> -> vector<64x128xf32>
    %96 = arith.maximumf %94, %95 : vector<64x128xf32>
    %c0_27 = arith.constant 0 : index
    %c0_28 = arith.constant 0 : index
    %c0_29 = arith.constant 0 : index
    %97 = vector.load %arg3[%c0_27, %c0_28, %c0_29] : memref<5x1x128xf32, #tpu.memory_space<vmem>>, vector<1x1x128xf32>
    %98 = vector.shape_cast %97 : vector<1x1x128xf32> to vector<1x128xf32>
    %99 = vector.broadcast %98 : vector<1x128xf32> to vector<64x128xf32>
    %100 = arith.addf %96, %99 : vector<64x128xf32>
    %cst_30 = arith.constant 0.000000e+00 : f32
    %101 = vector.broadcast %cst_30 : f32 to vector<64x128xf32>
    %102 = arith.maximumf %100, %101 : vector<64x128xf32>
    %103 = tpu.iota {dimensions = array<i32: 0>} : vector<64x64xi32>
    %104 = tpu.iota {dimensions = array<i32: 1>} : vector<64x64xi32>
    %c0_i32_31 = arith.constant 0 : i32
    %105 = vector.broadcast %c0_i32_31 : i32 to vector<64x64xi32>
    %106 = arith.cmpi eq, %103, %105 : vector<64x64xi32>
    %c8_i32 = arith.constant 8 : i32
    %107 = vector.broadcast %c8_i32 : i32 to vector<64x64xi32>
    %108 = arith.cmpi eq, %103, %107 : vector<64x64xi32>
    %109 = arith.ori %106, %108 : vector<64x64xi1>
    %c16_i32_32 = arith.constant 16 : i32
    %110 = vector.broadcast %c16_i32_32 : i32 to vector<64x64xi32>
    %111 = arith.cmpi eq, %103, %110 : vector<64x64xi32>
    %112 = arith.ori %109, %111 : vector<64x64xi1>
    %c24_i32 = arith.constant 24 : i32
    %113 = vector.broadcast %c24_i32 : i32 to vector<64x64xi32>
    %114 = arith.cmpi eq, %103, %113 : vector<64x64xi32>
    %115 = arith.ori %112, %114 : vector<64x64xi1>
    %c32_i32_33 = arith.constant 32 : i32
    %116 = vector.broadcast %c32_i32_33 : i32 to vector<64x64xi32>
    %117 = arith.cmpi eq, %103, %116 : vector<64x64xi32>
    %118 = arith.ori %115, %117 : vector<64x64xi1>
    %c40_i32 = arith.constant 40 : i32
    %119 = vector.broadcast %c40_i32 : i32 to vector<64x64xi32>
    %120 = arith.cmpi eq, %103, %119 : vector<64x64xi32>
    %121 = arith.ori %118, %120 : vector<64x64xi1>
    %c48_i32_34 = arith.constant 48 : i32
    %122 = vector.broadcast %c48_i32_34 : i32 to vector<64x64xi32>
    %123 = arith.cmpi eq, %103, %122 : vector<64x64xi32>
    %124 = arith.ori %121, %123 : vector<64x64xi1>
    %c56_i32 = arith.constant 56 : i32
    %125 = vector.broadcast %c56_i32 : i32 to vector<64x64xi32>
    %126 = arith.cmpi eq, %103, %125 : vector<64x64xi32>
    %127 = arith.ori %124, %126 : vector<64x64xi1>
    %cst_35 = arith.constant dense<true> : vector<64x64xi1>
    %128 = arith.xori %127, %cst_35 : vector<64x64xi1>
    %c7_i32 = arith.constant 7 : i32
    %129 = vector.broadcast %c7_i32 : i32 to vector<64x64xi32>
    %130 = arith.cmpi eq, %103, %129 : vector<64x64xi32>
    %c15_i32_36 = arith.constant 15 : i32
    %131 = vector.broadcast %c15_i32_36 : i32 to vector<64x64xi32>
    %132 = arith.cmpi eq, %103, %131 : vector<64x64xi32>
    %133 = arith.ori %130, %132 : vector<64x64xi1>
    %c23_i32 = arith.constant 23 : i32
    %134 = vector.broadcast %c23_i32 : i32 to vector<64x64xi32>
    %135 = arith.cmpi eq, %103, %134 : vector<64x64xi32>
    %136 = arith.ori %133, %135 : vector<64x64xi1>
    %c31_i32_37 = arith.constant 31 : i32
    %137 = vector.broadcast %c31_i32_37 : i32 to vector<64x64xi32>
    %138 = arith.cmpi eq, %103, %137 : vector<64x64xi32>
    %139 = arith.ori %136, %138 : vector<64x64xi1>
    %c39_i32 = arith.constant 39 : i32
    %140 = vector.broadcast %c39_i32 : i32 to vector<64x64xi32>
    %141 = arith.cmpi eq, %103, %140 : vector<64x64xi32>
    %142 = arith.ori %139, %141 : vector<64x64xi1>
    %c47_i32_38 = arith.constant 47 : i32
    %143 = vector.broadcast %c47_i32_38 : i32 to vector<64x64xi32>
    %144 = arith.cmpi eq, %103, %143 : vector<64x64xi32>
    %145 = arith.ori %142, %144 : vector<64x64xi1>
    %c55_i32 = arith.constant 55 : i32
    %146 = vector.broadcast %c55_i32 : i32 to vector<64x64xi32>
    %147 = arith.cmpi eq, %103, %146 : vector<64x64xi32>
    %148 = arith.ori %145, %147 : vector<64x64xi1>
    %c63_i32_39 = arith.constant 63 : i32
    %149 = vector.broadcast %c63_i32_39 : i32 to vector<64x64xi32>
    %150 = arith.cmpi eq, %103, %149 : vector<64x64xi32>
    %151 = arith.ori %148, %150 : vector<64x64xi1>
    %cst_40 = arith.constant dense<true> : vector<64x64xi1>
    %152 = arith.xori %151, %cst_40 : vector<64x64xi1>
    %c1_i32_41 = arith.constant 1 : i32
    %153 = vector.broadcast %c1_i32_41 : i32 to vector<64x64xi32>
    %154 = arith.subi %103, %153 : vector<64x64xi32>
    %155 = arith.cmpi eq, %104, %154 : vector<64x64xi32>
    %156 = arith.andi %155, %128 : vector<64x64xi1>
    %cst_42 = arith.constant 1.000000e+00 : f32
    %cst_43 = arith.constant 0.000000e+00 : f32
    %157 = vector.broadcast %cst_42 : f32 to vector<64x64xf32>
    %158 = vector.broadcast %cst_43 : f32 to vector<64x64xf32>
    %159 = arith.select %156, %157, %158 : vector<64x64xi1>, vector<64x64xf32>
    %c1_i32_44 = arith.constant 1 : i32
    %160 = vector.broadcast %c1_i32_44 : i32 to vector<64x64xi32>
    %161 = arith.addi %103, %160 : vector<64x64xi32>
    %162 = arith.cmpi eq, %104, %161 : vector<64x64xi32>
    %163 = arith.andi %162, %152 : vector<64x64xi1>
    %cst_45 = arith.constant 1.000000e+00 : f32
    %cst_46 = arith.constant 0.000000e+00 : f32
    %164 = vector.broadcast %cst_45 : f32 to vector<64x64xf32>
    %165 = vector.broadcast %cst_46 : f32 to vector<64x64xf32>
    %166 = arith.select %163, %164, %165 : vector<64x64xi1>, vector<64x64xf32>
    %cst_47 = arith.constant dense<0.000000e+00> : vector<64x128xf32>
    %167 = tpu.matmul %159, %102, %cst_47 {dimension_numbers = #tpu.dot_dimension_numbers<[1], [0], [0], [1], [0, 0, 1, 1], [], []>} : vector<64x64xf32>, vector<64x128xf32>, vector<64x128xf32> -> vector<64x128xf32>
    %cst_48 = arith.constant dense<0.000000e+00> : vector<64x128xf32>
    %168 = tpu.matmul %166, %102, %cst_48 {dimension_numbers = #tpu.dot_dimension_numbers<[1], [0], [0], [1], [0, 0, 1, 1], [], []>} : vector<64x64xf32>, vector<64x128xf32>, vector<64x128xf32> -> vector<64x128xf32>
    %c3 = arith.constant 3 : index
    %c0_49 = arith.constant 0 : index
    %c0_50 = arith.constant 0 : index
    %169 = vector.load %arg2[%c3, %c0_49, %c0_50] : memref<15x128x128xf32, #tpu.memory_space<vmem>>, vector<1x128x128xf32>
    %170 = vector.shape_cast %169 : vector<1x128x128xf32> to vector<128x128xf32>
    %cst_51 = arith.constant dense<0.000000e+00> : vector<64x128xf32>
    %171 = tpu.matmul %167, %170, %cst_51 {dimension_numbers = #tpu.dot_dimension_numbers<[1], [0], [0], [1], [0, 0, 1, 1], [], []>} : vector<64x128xf32>, vector<128x128xf32>, vector<64x128xf32> -> vector<64x128xf32>
    %c4 = arith.constant 4 : index
    %c0_52 = arith.constant 0 : index
    %c0_53 = arith.constant 0 : index
    %172 = vector.load %arg2[%c4, %c0_52, %c0_53] : memref<15x128x128xf32, #tpu.memory_space<vmem>>, vector<1x128x128xf32>
    %173 = vector.shape_cast %172 : vector<1x128x128xf32> to vector<128x128xf32>
    %cst_54 = arith.constant dense<0.000000e+00> : vector<64x128xf32>
    %174 = tpu.matmul %102, %173, %cst_54 {dimension_numbers = #tpu.dot_dimension_numbers<[1], [0], [0], [1], [0, 0, 1, 1], [], []>} : vector<64x128xf32>, vector<128x128xf32>, vector<64x128xf32> -> vector<64x128xf32>
    %175 = arith.addf %171, %174 : vector<64x128xf32>
    %c5 = arith.constant 5 : index
    %c0_55 = arith.constant 0 : index
    %c0_56 = arith.constant 0 : index
    %176 = vector.load %arg2[%c5, %c0_55, %c0_56] : memref<15x128x128xf32, #tpu.memory_space<vmem>>, vector<1x128x128xf32>
    %177 = vector.shape_cast %176 : vector<1x128x128xf32> to vector<128x128xf32>
    %cst_57 = arith.constant dense<0.000000e+00> : vector<64x128xf32>
    %178 = tpu.matmul %168, %177, %cst_57 {dimension_numbers = #tpu.dot_dimension_numbers<[1], [0], [0], [1], [0, 0, 1, 1], [], []>} : vector<64x128xf32>, vector<128x128xf32>, vector<64x128xf32> -> vector<64x128xf32>
    %179 = arith.addf %175, %178 : vector<64x128xf32>
    %180 = tpu.iota {dimensions = array<i32: 0>} : vector<32x64xi32>
    %181 = tpu.iota {dimensions = array<i32: 1>} : vector<32x64xi32>
    %c2_i32_58 = arith.constant 2 : i32
    %182 = vector.broadcast %c2_i32_58 : i32 to vector<32x64xi32>
    %183 = arith.muli %182, %180 : vector<32x64xi32>
    %184 = arith.cmpi eq, %181, %183 : vector<32x64xi32>
    %cst_59 = arith.constant 1.000000e+00 : f32
    %cst_60 = arith.constant 0.000000e+00 : f32
    %185 = vector.broadcast %cst_59 : f32 to vector<32x64xf32>
    %186 = vector.broadcast %cst_60 : f32 to vector<32x64xf32>
    %187 = arith.select %184, %185, %186 : vector<32x64xi1>, vector<32x64xf32>
    %c2_i32_61 = arith.constant 2 : i32
    %188 = vector.broadcast %c2_i32_61 : i32 to vector<32x64xi32>
    %189 = arith.muli %188, %180 : vector<32x64xi32>
    %c1_i32_62 = arith.constant 1 : i32
    %190 = vector.broadcast %c1_i32_62 : i32 to vector<32x64xi32>
    %191 = arith.addi %189, %190 : vector<32x64xi32>
    %192 = arith.cmpi eq, %181, %191 : vector<32x64xi32>
    %cst_63 = arith.constant 1.000000e+00 : f32
    %cst_64 = arith.constant 0.000000e+00 : f32
    %193 = vector.broadcast %cst_63 : f32 to vector<32x64xf32>
    %194 = vector.broadcast %cst_64 : f32 to vector<32x64xf32>
    %195 = arith.select %192, %193, %194 : vector<32x64xi1>, vector<32x64xf32>
    %cst_65 = arith.constant dense<0.000000e+00> : vector<32x128xf32>
    %196 = tpu.matmul %187, %179, %cst_65 {dimension_numbers = #tpu.dot_dimension_numbers<[1], [0], [0], [1], [0, 0, 1, 1], [], []>} : vector<32x64xf32>, vector<64x128xf32>, vector<32x128xf32> -> vector<32x128xf32>
    %cst_66 = arith.constant dense<0.000000e+00> : vector<32x128xf32>
    %197 = tpu.matmul %195, %179, %cst_66 {dimension_numbers = #tpu.dot_dimension_numbers<[1], [0], [0], [1], [0, 0, 1, 1], [], []>} : vector<32x64xf32>, vector<64x128xf32>, vector<32x128xf32> -> vector<32x128xf32>
    %198 = arith.maximumf %196, %197 : vector<32x128xf32>
    %c1_67 = arith.constant 1 : index
    %c0_68 = arith.constant 0 : index
    %c0_69 = arith.constant 0 : index
    %199 = vector.load %arg3[%c1_67, %c0_68, %c0_69] : memref<5x1x128xf32, #tpu.memory_space<vmem>>, vector<1x1x128xf32>
    %200 = vector.shape_cast %199 : vector<1x1x128xf32> to vector<1x128xf32>
    %201 = vector.broadcast %200 : vector<1x128xf32> to vector<32x128xf32>
    %202 = arith.addf %198, %201 : vector<32x128xf32>
    %cst_70 = arith.constant 0.000000e+00 : f32
    %203 = vector.broadcast %cst_70 : f32 to vector<32x128xf32>
    %204 = arith.maximumf %202, %203 : vector<32x128xf32>
    %205 = tpu.iota {dimensions = array<i32: 0>} : vector<32x32xi32>
    %206 = tpu.iota {dimensions = array<i32: 1>} : vector<32x32xi32>
    %c0_i32_71 = arith.constant 0 : i32
    %207 = vector.broadcast %c0_i32_71 : i32 to vector<32x32xi32>
    %208 = arith.cmpi eq, %205, %207 : vector<32x32xi32>
    %c4_i32 = arith.constant 4 : i32
    %209 = vector.broadcast %c4_i32 : i32 to vector<32x32xi32>
    %210 = arith.cmpi eq, %205, %209 : vector<32x32xi32>
    %211 = arith.ori %208, %210 : vector<32x32xi1>
    %c8_i32_72 = arith.constant 8 : i32
    %212 = vector.broadcast %c8_i32_72 : i32 to vector<32x32xi32>
    %213 = arith.cmpi eq, %205, %212 : vector<32x32xi32>
    %214 = arith.ori %211, %213 : vector<32x32xi1>
    %c12_i32 = arith.constant 12 : i32
    %215 = vector.broadcast %c12_i32 : i32 to vector<32x32xi32>
    %216 = arith.cmpi eq, %205, %215 : vector<32x32xi32>
    %217 = arith.ori %214, %216 : vector<32x32xi1>
    %c16_i32_73 = arith.constant 16 : i32
    %218 = vector.broadcast %c16_i32_73 : i32 to vector<32x32xi32>
    %219 = arith.cmpi eq, %205, %218 : vector<32x32xi32>
    %220 = arith.ori %217, %219 : vector<32x32xi1>
    %c20_i32 = arith.constant 20 : i32
    %221 = vector.broadcast %c20_i32 : i32 to vector<32x32xi32>
    %222 = arith.cmpi eq, %205, %221 : vector<32x32xi32>
    %223 = arith.ori %220, %222 : vector<32x32xi1>
    %c24_i32_74 = arith.constant 24 : i32
    %224 = vector.broadcast %c24_i32_74 : i32 to vector<32x32xi32>
    %225 = arith.cmpi eq, %205, %224 : vector<32x32xi32>
    %226 = arith.ori %223, %225 : vector<32x32xi1>
    %c28_i32 = arith.constant 28 : i32
    %227 = vector.broadcast %c28_i32 : i32 to vector<32x32xi32>
    %228 = arith.cmpi eq, %205, %227 : vector<32x32xi32>
    %229 = arith.ori %226, %228 : vector<32x32xi1>
    %cst_75 = arith.constant dense<true> : vector<32x32xi1>
    %230 = arith.xori %229, %cst_75 : vector<32x32xi1>
    %c3_i32 = arith.constant 3 : i32
    %231 = vector.broadcast %c3_i32 : i32 to vector<32x32xi32>
    %232 = arith.cmpi eq, %205, %231 : vector<32x32xi32>
    %c7_i32_76 = arith.constant 7 : i32
    %233 = vector.broadcast %c7_i32_76 : i32 to vector<32x32xi32>
    %234 = arith.cmpi eq, %205, %233 : vector<32x32xi32>
    %235 = arith.ori %232, %234 : vector<32x32xi1>
    %c11_i32 = arith.constant 11 : i32
    %236 = vector.broadcast %c11_i32 : i32 to vector<32x32xi32>
    %237 = arith.cmpi eq, %205, %236 : vector<32x32xi32>
    %238 = arith.ori %235, %237 : vector<32x32xi1>
    %c15_i32_77 = arith.constant 15 : i32
    %239 = vector.broadcast %c15_i32_77 : i32 to vector<32x32xi32>
    %240 = arith.cmpi eq, %205, %239 : vector<32x32xi32>
    %241 = arith.ori %238, %240 : vector<32x32xi1>
    %c19_i32 = arith.constant 19 : i32
    %242 = vector.broadcast %c19_i32 : i32 to vector<32x32xi32>
    %243 = arith.cmpi eq, %205, %242 : vector<32x32xi32>
    %244 = arith.ori %241, %243 : vector<32x32xi1>
    %c23_i32_78 = arith.constant 23 : i32
    %245 = vector.broadcast %c23_i32_78 : i32 to vector<32x32xi32>
    %246 = arith.cmpi eq, %205, %245 : vector<32x32xi32>
    %247 = arith.ori %244, %246 : vector<32x32xi1>
    %c27_i32 = arith.constant 27 : i32
    %248 = vector.broadcast %c27_i32 : i32 to vector<32x32xi32>
    %249 = arith.cmpi eq, %205, %248 : vector<32x32xi32>
    %250 = arith.ori %247, %249 : vector<32x32xi1>
    %c31_i32_79 = arith.constant 31 : i32
    %251 = vector.broadcast %c31_i32_79 : i32 to vector<32x32xi32>
    %252 = arith.cmpi eq, %205, %251 : vector<32x32xi32>
    %253 = arith.ori %250, %252 : vector<32x32xi1>
    %cst_80 = arith.constant dense<true> : vector<32x32xi1>
    %254 = arith.xori %253, %cst_80 : vector<32x32xi1>
    %c1_i32_81 = arith.constant 1 : i32
    %255 = vector.broadcast %c1_i32_81 : i32 to vector<32x32xi32>
    %256 = arith.subi %205, %255 : vector<32x32xi32>
    %257 = arith.cmpi eq, %206, %256 : vector<32x32xi32>
    %258 = arith.andi %257, %230 : vector<32x32xi1>
    %cst_82 = arith.constant 1.000000e+00 : f32
    %cst_83 = arith.constant 0.000000e+00 : f32
    %259 = vector.broadcast %cst_82 : f32 to vector<32x32xf32>
    %260 = vector.broadcast %cst_83 : f32 to vector<32x32xf32>
    %261 = arith.select %258, %259, %260 : vector<32x32xi1>, vector<32x32xf32>
    %c1_i32_84 = arith.constant 1 : i32
    %262 = vector.broadcast %c1_i32_84 : i32 to vector<32x32xi32>
    %263 = arith.addi %205, %262 : vector<32x32xi32>
    %264 = arith.cmpi eq, %206, %263 : vector<32x32xi32>
    %265 = arith.andi %264, %254 : vector<32x32xi1>
    %cst_85 = arith.constant 1.000000e+00 : f32
    %cst_86 = arith.constant 0.000000e+00 : f32
    %266 = vector.broadcast %cst_85 : f32 to vector<32x32xf32>
    %267 = vector.broadcast %cst_86 : f32 to vector<32x32xf32>
    %268 = arith.select %265, %266, %267 : vector<32x32xi1>, vector<32x32xf32>
    %cst_87 = arith.constant dense<0.000000e+00> : vector<32x128xf32>
    %269 = tpu.matmul %261, %204, %cst_87 {dimension_numbers = #tpu.dot_dimension_numbers<[1], [0], [0], [1], [0, 0, 1, 1], [], []>} : vector<32x32xf32>, vector<32x128xf32>, vector<32x128xf32> -> vector<32x128xf32>
    %cst_88 = arith.constant dense<0.000000e+00> : vector<32x128xf32>
    %270 = tpu.matmul %268, %204, %cst_88 {dimension_numbers = #tpu.dot_dimension_numbers<[1], [0], [0], [1], [0, 0, 1, 1], [], []>} : vector<32x32xf32>, vector<32x128xf32>, vector<32x128xf32> -> vector<32x128xf32>
    %c6 = arith.constant 6 : index
    %c0_89 = arith.constant 0 : index
    %c0_90 = arith.constant 0 : index
    %271 = vector.load %arg2[%c6, %c0_89, %c0_90] : memref<15x128x128xf32, #tpu.memory_space<vmem>>, vector<1x128x128xf32>
    %272 = vector.shape_cast %271 : vector<1x128x128xf32> to vector<128x128xf32>
    %cst_91 = arith.constant dense<0.000000e+00> : vector<32x128xf32>
    %273 = tpu.matmul %269, %272, %cst_91 {dimension_numbers = #tpu.dot_dimension_numbers<[1], [0], [0], [1], [0, 0, 1, 1], [], []>} : vector<32x128xf32>, vector<128x128xf32>, vector<32x128xf32> -> vector<32x128xf32>
    %c7 = arith.constant 7 : index
    %c0_92 = arith.constant 0 : index
    %c0_93 = arith.constant 0 : index
    %274 = vector.load %arg2[%c7, %c0_92, %c0_93] : memref<15x128x128xf32, #tpu.memory_space<vmem>>, vector<1x128x128xf32>
    %275 = vector.shape_cast %274 : vector<1x128x128xf32> to vector<128x128xf32>
    %cst_94 = arith.constant dense<0.000000e+00> : vector<32x128xf32>
    %276 = tpu.matmul %204, %275, %cst_94 {dimension_numbers = #tpu.dot_dimension_numbers<[1], [0], [0], [1], [0, 0, 1, 1], [], []>} : vector<32x128xf32>, vector<128x128xf32>, vector<32x128xf32> -> vector<32x128xf32>
    %277 = arith.addf %273, %276 : vector<32x128xf32>
    %c8 = arith.constant 8 : index
    %c0_95 = arith.constant 0 : index
    %c0_96 = arith.constant 0 : index
    %278 = vector.load %arg2[%c8, %c0_95, %c0_96] : memref<15x128x128xf32, #tpu.memory_space<vmem>>, vector<1x128x128xf32>
    %279 = vector.shape_cast %278 : vector<1x128x128xf32> to vector<128x128xf32>
    %cst_97 = arith.constant dense<0.000000e+00> : vector<32x128xf32>
    %280 = tpu.matmul %270, %279, %cst_97 {dimension_numbers = #tpu.dot_dimension_numbers<[1], [0], [0], [1], [0, 0, 1, 1], [], []>} : vector<32x128xf32>, vector<128x128xf32>, vector<32x128xf32> -> vector<32x128xf32>
    %281 = arith.addf %277, %280 : vector<32x128xf32>
    %c2_98 = arith.constant 2 : index
    %c0_99 = arith.constant 0 : index
    %c0_100 = arith.constant 0 : index
    %282 = vector.load %arg3[%c2_98, %c0_99, %c0_100] : memref<5x1x128xf32, #tpu.memory_space<vmem>>, vector<1x1x128xf32>
    %283 = vector.shape_cast %282 : vector<1x1x128xf32> to vector<1x128xf32>
    %284 = vector.broadcast %283 : vector<1x128xf32> to vector<32x128xf32>
    %285 = arith.addf %281, %284 : vector<32x128xf32>
    %cst_101 = arith.constant 0.000000e+00 : f32
    %286 = vector.broadcast %cst_101 : f32 to vector<32x128xf32>
    %287 = arith.maximumf %285, %286 : vector<32x128xf32>
    %288 = tpu.iota {dimensions = array<i32: 0>} : vector<32x32xi32>
    %289 = tpu.iota {dimensions = array<i32: 1>} : vector<32x32xi32>
    %c0_i32_102 = arith.constant 0 : i32
    %290 = vector.broadcast %c0_i32_102 : i32 to vector<32x32xi32>
    %291 = arith.cmpi eq, %288, %290 : vector<32x32xi32>
    %c4_i32_103 = arith.constant 4 : i32
    %292 = vector.broadcast %c4_i32_103 : i32 to vector<32x32xi32>
    %293 = arith.cmpi eq, %288, %292 : vector<32x32xi32>
    %294 = arith.ori %291, %293 : vector<32x32xi1>
    %c8_i32_104 = arith.constant 8 : i32
    %295 = vector.broadcast %c8_i32_104 : i32 to vector<32x32xi32>
    %296 = arith.cmpi eq, %288, %295 : vector<32x32xi32>
    %297 = arith.ori %294, %296 : vector<32x32xi1>
    %c12_i32_105 = arith.constant 12 : i32
    %298 = vector.broadcast %c12_i32_105 : i32 to vector<32x32xi32>
    %299 = arith.cmpi eq, %288, %298 : vector<32x32xi32>
    %300 = arith.ori %297, %299 : vector<32x32xi1>
    %c16_i32_106 = arith.constant 16 : i32
    %301 = vector.broadcast %c16_i32_106 : i32 to vector<32x32xi32>
    %302 = arith.cmpi eq, %288, %301 : vector<32x32xi32>
    %303 = arith.ori %300, %302 : vector<32x32xi1>
    %c20_i32_107 = arith.constant 20 : i32
    %304 = vector.broadcast %c20_i32_107 : i32 to vector<32x32xi32>
    %305 = arith.cmpi eq, %288, %304 : vector<32x32xi32>
    %306 = arith.ori %303, %305 : vector<32x32xi1>
    %c24_i32_108 = arith.constant 24 : i32
    %307 = vector.broadcast %c24_i32_108 : i32 to vector<32x32xi32>
    %308 = arith.cmpi eq, %288, %307 : vector<32x32xi32>
    %309 = arith.ori %306, %308 : vector<32x32xi1>
    %c28_i32_109 = arith.constant 28 : i32
    %310 = vector.broadcast %c28_i32_109 : i32 to vector<32x32xi32>
    %311 = arith.cmpi eq, %288, %310 : vector<32x32xi32>
    %312 = arith.ori %309, %311 : vector<32x32xi1>
    %cst_110 = arith.constant dense<true> : vector<32x32xi1>
    %313 = arith.xori %312, %cst_110 : vector<32x32xi1>
    %c3_i32_111 = arith.constant 3 : i32
    %314 = vector.broadcast %c3_i32_111 : i32 to vector<32x32xi32>
    %315 = arith.cmpi eq, %288, %314 : vector<32x32xi32>
    %c7_i32_112 = arith.constant 7 : i32
    %316 = vector.broadcast %c7_i32_112 : i32 to vector<32x32xi32>
    %317 = arith.cmpi eq, %288, %316 : vector<32x32xi32>
    %318 = arith.ori %315, %317 : vector<32x32xi1>
    %c11_i32_113 = arith.constant 11 : i32
    %319 = vector.broadcast %c11_i32_113 : i32 to vector<32x32xi32>
    %320 = arith.cmpi eq, %288, %319 : vector<32x32xi32>
    %321 = arith.ori %318, %320 : vector<32x32xi1>
    %c15_i32_114 = arith.constant 15 : i32
    %322 = vector.broadcast %c15_i32_114 : i32 to vector<32x32xi32>
    %323 = arith.cmpi eq, %288, %322 : vector<32x32xi32>
    %324 = arith.ori %321, %323 : vector<32x32xi1>
    %c19_i32_115 = arith.constant 19 : i32
    %325 = vector.broadcast %c19_i32_115 : i32 to vector<32x32xi32>
    %326 = arith.cmpi eq, %288, %325 : vector<32x32xi32>
    %327 = arith.ori %324, %326 : vector<32x32xi1>
    %c23_i32_116 = arith.constant 23 : i32
    %328 = vector.broadcast %c23_i32_116 : i32 to vector<32x32xi32>
    %329 = arith.cmpi eq, %288, %328 : vector<32x32xi32>
    %330 = arith.ori %327, %329 : vector<32x32xi1>
    %c27_i32_117 = arith.constant 27 : i32
    %331 = vector.broadcast %c27_i32_117 : i32 to vector<32x32xi32>
    %332 = arith.cmpi eq, %288, %331 : vector<32x32xi32>
    %333 = arith.ori %330, %332 : vector<32x32xi1>
    %c31_i32_118 = arith.constant 31 : i32
    %334 = vector.broadcast %c31_i32_118 : i32 to vector<32x32xi32>
    %335 = arith.cmpi eq, %288, %334 : vector<32x32xi32>
    %336 = arith.ori %333, %335 : vector<32x32xi1>
    %cst_119 = arith.constant dense<true> : vector<32x32xi1>
    %337 = arith.xori %336, %cst_119 : vector<32x32xi1>
    %c1_i32_120 = arith.constant 1 : i32
    %338 = vector.broadcast %c1_i32_120 : i32 to vector<32x32xi32>
    %339 = arith.subi %288, %338 : vector<32x32xi32>
    %340 = arith.cmpi eq, %289, %339 : vector<32x32xi32>
    %341 = arith.andi %340, %313 : vector<32x32xi1>
    %cst_121 = arith.constant 1.000000e+00 : f32
    %cst_122 = arith.constant 0.000000e+00 : f32
    %342 = vector.broadcast %cst_121 : f32 to vector<32x32xf32>
    %343 = vector.broadcast %cst_122 : f32 to vector<32x32xf32>
    %344 = arith.select %341, %342, %343 : vector<32x32xi1>, vector<32x32xf32>
    %c1_i32_123 = arith.constant 1 : i32
    %345 = vector.broadcast %c1_i32_123 : i32 to vector<32x32xi32>
    %346 = arith.addi %288, %345 : vector<32x32xi32>
    %347 = arith.cmpi eq, %289, %346 : vector<32x32xi32>
    %348 = arith.andi %347, %337 : vector<32x32xi1>
    %cst_124 = arith.constant 1.000000e+00 : f32
    %cst_125 = arith.constant 0.000000e+00 : f32
    %349 = vector.broadcast %cst_124 : f32 to vector<32x32xf32>
    %350 = vector.broadcast %cst_125 : f32 to vector<32x32xf32>
    %351 = arith.select %348, %349, %350 : vector<32x32xi1>, vector<32x32xf32>
    %cst_126 = arith.constant dense<0.000000e+00> : vector<32x128xf32>
    %352 = tpu.matmul %344, %287, %cst_126 {dimension_numbers = #tpu.dot_dimension_numbers<[1], [0], [0], [1], [0, 0, 1, 1], [], []>} : vector<32x32xf32>, vector<32x128xf32>, vector<32x128xf32> -> vector<32x128xf32>
    %cst_127 = arith.constant dense<0.000000e+00> : vector<32x128xf32>
    %353 = tpu.matmul %351, %287, %cst_127 {dimension_numbers = #tpu.dot_dimension_numbers<[1], [0], [0], [1], [0, 0, 1, 1], [], []>} : vector<32x32xf32>, vector<32x128xf32>, vector<32x128xf32> -> vector<32x128xf32>
    %c9 = arith.constant 9 : index
    %c0_128 = arith.constant 0 : index
    %c0_129 = arith.constant 0 : index
    %354 = vector.load %arg2[%c9, %c0_128, %c0_129] : memref<15x128x128xf32, #tpu.memory_space<vmem>>, vector<1x128x128xf32>
    %355 = vector.shape_cast %354 : vector<1x128x128xf32> to vector<128x128xf32>
    %cst_130 = arith.constant dense<0.000000e+00> : vector<32x128xf32>
    %356 = tpu.matmul %352, %355, %cst_130 {dimension_numbers = #tpu.dot_dimension_numbers<[1], [0], [0], [1], [0, 0, 1, 1], [], []>} : vector<32x128xf32>, vector<128x128xf32>, vector<32x128xf32> -> vector<32x128xf32>
    %c10 = arith.constant 10 : index
    %c0_131 = arith.constant 0 : index
    %c0_132 = arith.constant 0 : index
    %357 = vector.load %arg2[%c10, %c0_131, %c0_132] : memref<15x128x128xf32, #tpu.memory_space<vmem>>, vector<1x128x128xf32>
    %358 = vector.shape_cast %357 : vector<1x128x128xf32> to vector<128x128xf32>
    %cst_133 = arith.constant dense<0.000000e+00> : vector<32x128xf32>
    %359 = tpu.matmul %287, %358, %cst_133 {dimension_numbers = #tpu.dot_dimension_numbers<[1], [0], [0], [1], [0, 0, 1, 1], [], []>} : vector<32x128xf32>, vector<128x128xf32>, vector<32x128xf32> -> vector<32x128xf32>
    %360 = arith.addf %356, %359 : vector<32x128xf32>
    %c11 = arith.constant 11 : index
    %c0_134 = arith.constant 0 : index
    %c0_135 = arith.constant 0 : index
    %361 = vector.load %arg2[%c11, %c0_134, %c0_135] : memref<15x128x128xf32, #tpu.memory_space<vmem>>, vector<1x128x128xf32>
    %362 = vector.shape_cast %361 : vector<1x128x128xf32> to vector<128x128xf32>
    %cst_136 = arith.constant dense<0.000000e+00> : vector<32x128xf32>
    %363 = tpu.matmul %353, %362, %cst_136 {dimension_numbers = #tpu.dot_dimension_numbers<[1], [0], [0], [1], [0, 0, 1, 1], [], []>} : vector<32x128xf32>, vector<128x128xf32>, vector<32x128xf32> -> vector<32x128xf32>
    %364 = arith.addf %360, %363 : vector<32x128xf32>
    %c3_137 = arith.constant 3 : index
    %c0_138 = arith.constant 0 : index
    %c0_139 = arith.constant 0 : index
    %365 = vector.load %arg3[%c3_137, %c0_138, %c0_139] : memref<5x1x128xf32, #tpu.memory_space<vmem>>, vector<1x1x128xf32>
    %366 = vector.shape_cast %365 : vector<1x1x128xf32> to vector<1x128xf32>
    %367 = vector.broadcast %366 : vector<1x128xf32> to vector<32x128xf32>
    %368 = arith.addf %364, %367 : vector<32x128xf32>
    %cst_140 = arith.constant 0.000000e+00 : f32
    %369 = vector.broadcast %cst_140 : f32 to vector<32x128xf32>
    %370 = arith.maximumf %368, %369 : vector<32x128xf32>
    %371 = tpu.iota {dimensions = array<i32: 0>} : vector<32x32xi32>
    %372 = tpu.iota {dimensions = array<i32: 1>} : vector<32x32xi32>
    %c0_i32_141 = arith.constant 0 : i32
    %373 = vector.broadcast %c0_i32_141 : i32 to vector<32x32xi32>
    %374 = arith.cmpi eq, %371, %373 : vector<32x32xi32>
    %c4_i32_142 = arith.constant 4 : i32
    %375 = vector.broadcast %c4_i32_142 : i32 to vector<32x32xi32>
    %376 = arith.cmpi eq, %371, %375 : vector<32x32xi32>
    %377 = arith.ori %374, %376 : vector<32x32xi1>
    %c8_i32_143 = arith.constant 8 : i32
    %378 = vector.broadcast %c8_i32_143 : i32 to vector<32x32xi32>
    %379 = arith.cmpi eq, %371, %378 : vector<32x32xi32>
    %380 = arith.ori %377, %379 : vector<32x32xi1>
    %c12_i32_144 = arith.constant 12 : i32
    %381 = vector.broadcast %c12_i32_144 : i32 to vector<32x32xi32>
    %382 = arith.cmpi eq, %371, %381 : vector<32x32xi32>
    %383 = arith.ori %380, %382 : vector<32x32xi1>
    %c16_i32_145 = arith.constant 16 : i32
    %384 = vector.broadcast %c16_i32_145 : i32 to vector<32x32xi32>
    %385 = arith.cmpi eq, %371, %384 : vector<32x32xi32>
    %386 = arith.ori %383, %385 : vector<32x32xi1>
    %c20_i32_146 = arith.constant 20 : i32
    %387 = vector.broadcast %c20_i32_146 : i32 to vector<32x32xi32>
    %388 = arith.cmpi eq, %371, %387 : vector<32x32xi32>
    %389 = arith.ori %386, %388 : vector<32x32xi1>
    %c24_i32_147 = arith.constant 24 : i32
    %390 = vector.broadcast %c24_i32_147 : i32 to vector<32x32xi32>
    %391 = arith.cmpi eq, %371, %390 : vector<32x32xi32>
    %392 = arith.ori %389, %391 : vector<32x32xi1>
    %c28_i32_148 = arith.constant 28 : i32
    %393 = vector.broadcast %c28_i32_148 : i32 to vector<32x32xi32>
    %394 = arith.cmpi eq, %371, %393 : vector<32x32xi32>
    %395 = arith.ori %392, %394 : vector<32x32xi1>
    %cst_149 = arith.constant dense<true> : vector<32x32xi1>
    %396 = arith.xori %395, %cst_149 : vector<32x32xi1>
    %c3_i32_150 = arith.constant 3 : i32
    %397 = vector.broadcast %c3_i32_150 : i32 to vector<32x32xi32>
    %398 = arith.cmpi eq, %371, %397 : vector<32x32xi32>
    %c7_i32_151 = arith.constant 7 : i32
    %399 = vector.broadcast %c7_i32_151 : i32 to vector<32x32xi32>
    %400 = arith.cmpi eq, %371, %399 : vector<32x32xi32>
    %401 = arith.ori %398, %400 : vector<32x32xi1>
    %c11_i32_152 = arith.constant 11 : i32
    %402 = vector.broadcast %c11_i32_152 : i32 to vector<32x32xi32>
    %403 = arith.cmpi eq, %371, %402 : vector<32x32xi32>
    %404 = arith.ori %401, %403 : vector<32x32xi1>
    %c15_i32_153 = arith.constant 15 : i32
    %405 = vector.broadcast %c15_i32_153 : i32 to vector<32x32xi32>
    %406 = arith.cmpi eq, %371, %405 : vector<32x32xi32>
    %407 = arith.ori %404, %406 : vector<32x32xi1>
    %c19_i32_154 = arith.constant 19 : i32
    %408 = vector.broadcast %c19_i32_154 : i32 to vector<32x32xi32>
    %409 = arith.cmpi eq, %371, %408 : vector<32x32xi32>
    %410 = arith.ori %407, %409 : vector<32x32xi1>
    %c23_i32_155 = arith.constant 23 : i32
    %411 = vector.broadcast %c23_i32_155 : i32 to vector<32x32xi32>
    %412 = arith.cmpi eq, %371, %411 : vector<32x32xi32>
    %413 = arith.ori %410, %412 : vector<32x32xi1>
    %c27_i32_156 = arith.constant 27 : i32
    %414 = vector.broadcast %c27_i32_156 : i32 to vector<32x32xi32>
    %415 = arith.cmpi eq, %371, %414 : vector<32x32xi32>
    %416 = arith.ori %413, %415 : vector<32x32xi1>
    %c31_i32_157 = arith.constant 31 : i32
    %417 = vector.broadcast %c31_i32_157 : i32 to vector<32x32xi32>
    %418 = arith.cmpi eq, %371, %417 : vector<32x32xi32>
    %419 = arith.ori %416, %418 : vector<32x32xi1>
    %cst_158 = arith.constant dense<true> : vector<32x32xi1>
    %420 = arith.xori %419, %cst_158 : vector<32x32xi1>
    %c1_i32_159 = arith.constant 1 : i32
    %421 = vector.broadcast %c1_i32_159 : i32 to vector<32x32xi32>
    %422 = arith.subi %371, %421 : vector<32x32xi32>
    %423 = arith.cmpi eq, %372, %422 : vector<32x32xi32>
    %424 = arith.andi %423, %396 : vector<32x32xi1>
    %cst_160 = arith.constant 1.000000e+00 : f32
    %cst_161 = arith.constant 0.000000e+00 : f32
    %425 = vector.broadcast %cst_160 : f32 to vector<32x32xf32>
    %426 = vector.broadcast %cst_161 : f32 to vector<32x32xf32>
    %427 = arith.select %424, %425, %426 : vector<32x32xi1>, vector<32x32xf32>
    %c1_i32_162 = arith.constant 1 : i32
    %428 = vector.broadcast %c1_i32_162 : i32 to vector<32x32xi32>
    %429 = arith.addi %371, %428 : vector<32x32xi32>
    %430 = arith.cmpi eq, %372, %429 : vector<32x32xi32>
    %431 = arith.andi %430, %420 : vector<32x32xi1>
    %cst_163 = arith.constant 1.000000e+00 : f32
    %cst_164 = arith.constant 0.000000e+00 : f32
    %432 = vector.broadcast %cst_163 : f32 to vector<32x32xf32>
    %433 = vector.broadcast %cst_164 : f32 to vector<32x32xf32>
    %434 = arith.select %431, %432, %433 : vector<32x32xi1>, vector<32x32xf32>
    %cst_165 = arith.constant dense<0.000000e+00> : vector<32x128xf32>
    %435 = tpu.matmul %427, %370, %cst_165 {dimension_numbers = #tpu.dot_dimension_numbers<[1], [0], [0], [1], [0, 0, 1, 1], [], []>} : vector<32x32xf32>, vector<32x128xf32>, vector<32x128xf32> -> vector<32x128xf32>
    %cst_166 = arith.constant dense<0.000000e+00> : vector<32x128xf32>
    %436 = tpu.matmul %434, %370, %cst_166 {dimension_numbers = #tpu.dot_dimension_numbers<[1], [0], [0], [1], [0, 0, 1, 1], [], []>} : vector<32x32xf32>, vector<32x128xf32>, vector<32x128xf32> -> vector<32x128xf32>
    %c12 = arith.constant 12 : index
    %c0_167 = arith.constant 0 : index
    %c0_168 = arith.constant 0 : index
    %437 = vector.load %arg2[%c12, %c0_167, %c0_168] : memref<15x128x128xf32, #tpu.memory_space<vmem>>, vector<1x128x128xf32>
    %438 = vector.shape_cast %437 : vector<1x128x128xf32> to vector<128x128xf32>
    %cst_169 = arith.constant dense<0.000000e+00> : vector<32x128xf32>
    %439 = tpu.matmul %435, %438, %cst_169 {dimension_numbers = #tpu.dot_dimension_numbers<[1], [0], [0], [1], [0, 0, 1, 1], [], []>} : vector<32x128xf32>, vector<128x128xf32>, vector<32x128xf32> -> vector<32x128xf32>
    %c13 = arith.constant 13 : index
    %c0_170 = arith.constant 0 : index
    %c0_171 = arith.constant 0 : index
    %440 = vector.load %arg2[%c13, %c0_170, %c0_171] : memref<15x128x128xf32, #tpu.memory_space<vmem>>, vector<1x128x128xf32>
    %441 = vector.shape_cast %440 : vector<1x128x128xf32> to vector<128x128xf32>
    %cst_172 = arith.constant dense<0.000000e+00> : vector<32x128xf32>
    %442 = tpu.matmul %370, %441, %cst_172 {dimension_numbers = #tpu.dot_dimension_numbers<[1], [0], [0], [1], [0, 0, 1, 1], [], []>} : vector<32x128xf32>, vector<128x128xf32>, vector<32x128xf32> -> vector<32x128xf32>
    %443 = arith.addf %439, %442 : vector<32x128xf32>
    %c14 = arith.constant 14 : index
    %c0_173 = arith.constant 0 : index
    %c0_174 = arith.constant 0 : index
    %444 = vector.load %arg2[%c14, %c0_173, %c0_174] : memref<15x128x128xf32, #tpu.memory_space<vmem>>, vector<1x128x128xf32>
    %445 = vector.shape_cast %444 : vector<1x128x128xf32> to vector<128x128xf32>
    %cst_175 = arith.constant dense<0.000000e+00> : vector<32x128xf32>
    %446 = tpu.matmul %436, %445, %cst_175 {dimension_numbers = #tpu.dot_dimension_numbers<[1], [0], [0], [1], [0, 0, 1, 1], [], []>} : vector<32x128xf32>, vector<128x128xf32>, vector<32x128xf32> -> vector<32x128xf32>
    %447 = arith.addf %443, %446 : vector<32x128xf32>
    %c4_176 = arith.constant 4 : index
    %c0_177 = arith.constant 0 : index
    %c0_178 = arith.constant 0 : index
    %448 = vector.load %arg3[%c4_176, %c0_177, %c0_178] : memref<5x1x128xf32, #tpu.memory_space<vmem>>, vector<1x1x128xf32>
    %449 = vector.shape_cast %448 : vector<1x1x128xf32> to vector<1x128xf32>
    %450 = vector.broadcast %449 : vector<1x128xf32> to vector<32x128xf32>
    %451 = arith.addf %447, %450 : vector<32x128xf32>
    %cst_179 = arith.constant 0.000000e+00 : f32
    %452 = vector.broadcast %cst_179 : f32 to vector<32x128xf32>
    %453 = arith.maximumf %451, %452 : vector<32x128xf32>
    %454 = tpu.iota {dimensions = array<i32: 0>} : vector<8x32xi32>
    %455 = tpu.iota {dimensions = array<i32: 1>} : vector<8x32xi32>
    %cst_180 = arith.constant 0.000000e+00 : f32
    %456 = vector.broadcast %cst_180 : f32 to vector<8x128xf32>
    %c4_i32_181 = arith.constant 4 : i32
    %457 = vector.broadcast %c4_i32_181 : i32 to vector<8x32xi32>
    %458 = arith.muli %454, %457 : vector<8x32xi32>
    %c0_i32_182 = arith.constant 0 : i32
    %459 = vector.broadcast %c0_i32_182 : i32 to vector<8x32xi32>
    %460 = arith.addi %458, %459 : vector<8x32xi32>
    %461 = arith.cmpi eq, %455, %460 : vector<8x32xi32>
    %cst_183 = arith.constant 1.000000e+00 : f32
    %cst_184 = arith.constant 0.000000e+00 : f32
    %462 = vector.broadcast %cst_183 : f32 to vector<8x32xf32>
    %463 = vector.broadcast %cst_184 : f32 to vector<8x32xf32>
    %464 = arith.select %461, %462, %463 : vector<8x32xi1>, vector<8x32xf32>
    %cst_185 = arith.constant dense<0.000000e+00> : vector<8x128xf32>
    %465 = tpu.matmul %464, %453, %cst_185 {dimension_numbers = #tpu.dot_dimension_numbers<[1], [0], [0], [1], [0, 0, 1, 1], [], []>} : vector<8x32xf32>, vector<32x128xf32>, vector<8x128xf32> -> vector<8x128xf32>
    %c0_186 = arith.constant 0 : index
    %c0_187 = arith.constant 0 : index
    %c0_188 = arith.constant 0 : index
    %466 = vector.load %arg4[%c0_186, %c0_187, %c0_188] : memref<4x128x128xf32, #tpu.memory_space<vmem>>, vector<1x128x128xf32>
    %467 = vector.shape_cast %466 : vector<1x128x128xf32> to vector<128x128xf32>
    %cst_189 = arith.constant dense<0.000000e+00> : vector<8x128xf32>
    %468 = tpu.matmul %465, %467, %cst_189 {dimension_numbers = #tpu.dot_dimension_numbers<[1], [0], [0], [1], [0, 0, 1, 1], [], []>} : vector<8x128xf32>, vector<128x128xf32>, vector<8x128xf32> -> vector<8x128xf32>
    %469 = arith.addf %456, %468 : vector<8x128xf32>
    %c4_i32_190 = arith.constant 4 : i32
    %470 = vector.broadcast %c4_i32_190 : i32 to vector<8x32xi32>
    %471 = arith.muli %454, %470 : vector<8x32xi32>
    %c1_i32_191 = arith.constant 1 : i32
    %472 = vector.broadcast %c1_i32_191 : i32 to vector<8x32xi32>
    %473 = arith.addi %471, %472 : vector<8x32xi32>
    %474 = arith.cmpi eq, %455, %473 : vector<8x32xi32>
    %cst_192 = arith.constant 1.000000e+00 : f32
    %cst_193 = arith.constant 0.000000e+00 : f32
    %475 = vector.broadcast %cst_192 : f32 to vector<8x32xf32>
    %476 = vector.broadcast %cst_193 : f32 to vector<8x32xf32>
    %477 = arith.select %474, %475, %476 : vector<8x32xi1>, vector<8x32xf32>
    %cst_194 = arith.constant dense<0.000000e+00> : vector<8x128xf32>
    %478 = tpu.matmul %477, %453, %cst_194 {dimension_numbers = #tpu.dot_dimension_numbers<[1], [0], [0], [1], [0, 0, 1, 1], [], []>} : vector<8x32xf32>, vector<32x128xf32>, vector<8x128xf32> -> vector<8x128xf32>
    %c1_195 = arith.constant 1 : index
    %c0_196 = arith.constant 0 : index
    %c0_197 = arith.constant 0 : index
    %479 = vector.load %arg4[%c1_195, %c0_196, %c0_197] : memref<4x128x128xf32, #tpu.memory_space<vmem>>, vector<1x128x128xf32>
    %480 = vector.shape_cast %479 : vector<1x128x128xf32> to vector<128x128xf32>
    %cst_198 = arith.constant dense<0.000000e+00> : vector<8x128xf32>
    %481 = tpu.matmul %478, %480, %cst_198 {dimension_numbers = #tpu.dot_dimension_numbers<[1], [0], [0], [1], [0, 0, 1, 1], [], []>} : vector<8x128xf32>, vector<128x128xf32>, vector<8x128xf32> -> vector<8x128xf32>
    %482 = arith.addf %469, %481 : vector<8x128xf32>
    %c4_i32_199 = arith.constant 4 : i32
    %483 = vector.broadcast %c4_i32_199 : i32 to vector<8x32xi32>
    %484 = arith.muli %454, %483 : vector<8x32xi32>
    %c2_i32_200 = arith.constant 2 : i32
    %485 = vector.broadcast %c2_i32_200 : i32 to vector<8x32xi32>
    %486 = arith.addi %484, %485 : vector<8x32xi32>
    %487 = arith.cmpi eq, %455, %486 : vector<8x32xi32>
    %cst_201 = arith.constant 1.000000e+00 : f32
    %cst_202 = arith.constant 0.000000e+00 : f32
    %488 = vector.broadcast %cst_201 : f32 to vector<8x32xf32>
    %489 = vector.broadcast %cst_202 : f32 to vector<8x32xf32>
    %490 = arith.select %487, %488, %489 : vector<8x32xi1>, vector<8x32xf32>
    %cst_203 = arith.constant dense<0.000000e+00> : vector<8x128xf32>
    %491 = tpu.matmul %490, %453, %cst_203 {dimension_numbers = #tpu.dot_dimension_numbers<[1], [0], [0], [1], [0, 0, 1, 1], [], []>} : vector<8x32xf32>, vector<32x128xf32>, vector<8x128xf32> -> vector<8x128xf32>
    %c2_204 = arith.constant 2 : index
    %c0_205 = arith.constant 0 : index
    %c0_206 = arith.constant 0 : index
    %492 = vector.load %arg4[%c2_204, %c0_205, %c0_206] : memref<4x128x128xf32, #tpu.memory_space<vmem>>, vector<1x128x128xf32>
    %493 = vector.shape_cast %492 : vector<1x128x128xf32> to vector<128x128xf32>
    %cst_207 = arith.constant dense<0.000000e+00> : vector<8x128xf32>
    %494 = tpu.matmul %491, %493, %cst_207 {dimension_numbers = #tpu.dot_dimension_numbers<[1], [0], [0], [1], [0, 0, 1, 1], [], []>} : vector<8x128xf32>, vector<128x128xf32>, vector<8x128xf32> -> vector<8x128xf32>
    %495 = arith.addf %482, %494 : vector<8x128xf32>
    %c4_i32_208 = arith.constant 4 : i32
    %496 = vector.broadcast %c4_i32_208 : i32 to vector<8x32xi32>
    %497 = arith.muli %454, %496 : vector<8x32xi32>
    %c3_i32_209 = arith.constant 3 : i32
    %498 = vector.broadcast %c3_i32_209 : i32 to vector<8x32xi32>
    %499 = arith.addi %497, %498 : vector<8x32xi32>
    %500 = arith.cmpi eq, %455, %499 : vector<8x32xi32>
    %cst_210 = arith.constant 1.000000e+00 : f32
    %cst_211 = arith.constant 0.000000e+00 : f32
    %501 = vector.broadcast %cst_210 : f32 to vector<8x32xf32>
    %502 = vector.broadcast %cst_211 : f32 to vector<8x32xf32>
    %503 = arith.select %500, %501, %502 : vector<8x32xi1>, vector<8x32xf32>
    %cst_212 = arith.constant dense<0.000000e+00> : vector<8x128xf32>
    %504 = tpu.matmul %503, %453, %cst_212 {dimension_numbers = #tpu.dot_dimension_numbers<[1], [0], [0], [1], [0, 0, 1, 1], [], []>} : vector<8x32xf32>, vector<32x128xf32>, vector<8x128xf32> -> vector<8x128xf32>
    %c3_213 = arith.constant 3 : index
    %c0_214 = arith.constant 0 : index
    %c0_215 = arith.constant 0 : index
    %505 = vector.load %arg4[%c3_213, %c0_214, %c0_215] : memref<4x128x128xf32, #tpu.memory_space<vmem>>, vector<1x128x128xf32>
    %506 = vector.shape_cast %505 : vector<1x128x128xf32> to vector<128x128xf32>
    %cst_216 = arith.constant dense<0.000000e+00> : vector<8x128xf32>
    %507 = tpu.matmul %504, %506, %cst_216 {dimension_numbers = #tpu.dot_dimension_numbers<[1], [0], [0], [1], [0, 0, 1, 1], [], []>} : vector<8x128xf32>, vector<128x128xf32>, vector<8x128xf32> -> vector<8x128xf32>
    %508 = arith.addf %495, %507 : vector<8x128xf32>
    %c0_217 = arith.constant 0 : index
    %c0_218 = arith.constant 0 : index
    %c0_219 = arith.constant 0 : index
    %509 = vector.load %arg6[%c0_217, %c0_218, %c0_219] : memref<3x1x128xf32, #tpu.memory_space<vmem>>, vector<1x1x128xf32>
    %510 = vector.shape_cast %509 : vector<1x1x128xf32> to vector<1x128xf32>
    %511 = vector.broadcast %510 : vector<1x128xf32> to vector<8x128xf32>
    %512 = arith.addf %508, %511 : vector<8x128xf32>
    %cst_220 = arith.constant 0.000000e+00 : f32
    %513 = vector.broadcast %cst_220 : f32 to vector<8x128xf32>
    %514 = arith.maximumf %512, %513 : vector<8x128xf32>
    %c0_221 = arith.constant 0 : index
    %c0_222 = arith.constant 0 : index
    %c0_223 = arith.constant 0 : index
    %515 = vector.load %arg5[%c0_221, %c0_222, %c0_223] : memref<2x128x128xf32, #tpu.memory_space<vmem>>, vector<1x128x128xf32>
    %516 = vector.shape_cast %515 : vector<1x128x128xf32> to vector<128x128xf32>
    %cst_224 = arith.constant dense<0.000000e+00> : vector<8x128xf32>
    %517 = tpu.matmul %514, %516, %cst_224 {dimension_numbers = #tpu.dot_dimension_numbers<[1], [0], [0], [1], [0, 0, 1, 1], [], []>} : vector<8x128xf32>, vector<128x128xf32>, vector<8x128xf32> -> vector<8x128xf32>
    %c1_225 = arith.constant 1 : index
    %c0_226 = arith.constant 0 : index
    %c0_227 = arith.constant 0 : index
    %518 = vector.load %arg6[%c1_225, %c0_226, %c0_227] : memref<3x1x128xf32, #tpu.memory_space<vmem>>, vector<1x1x128xf32>
    %519 = vector.shape_cast %518 : vector<1x1x128xf32> to vector<1x128xf32>
    %520 = vector.broadcast %519 : vector<1x128xf32> to vector<8x128xf32>
    %521 = arith.addf %517, %520 : vector<8x128xf32>
    %cst_228 = arith.constant 0.000000e+00 : f32
    %522 = vector.broadcast %cst_228 : f32 to vector<8x128xf32>
    %523 = arith.maximumf %521, %522 : vector<8x128xf32>
    %c1_229 = arith.constant 1 : index
    %c0_230 = arith.constant 0 : index
    %c0_231 = arith.constant 0 : index
    %524 = vector.load %arg5[%c1_229, %c0_230, %c0_231] : memref<2x128x128xf32, #tpu.memory_space<vmem>>, vector<1x128x128xf32>
    %525 = vector.shape_cast %524 : vector<1x128x128xf32> to vector<128x128xf32>
    %cst_232 = arith.constant dense<0.000000e+00> : vector<8x128xf32>
    %526 = tpu.matmul %523, %525, %cst_232 {dimension_numbers = #tpu.dot_dimension_numbers<[1], [0], [0], [1], [0, 0, 1, 1], [], []>} : vector<8x128xf32>, vector<128x128xf32>, vector<8x128xf32> -> vector<8x128xf32>
    %c2_233 = arith.constant 2 : index
    %c0_234 = arith.constant 0 : index
    %c0_235 = arith.constant 0 : index
    %527 = vector.load %arg6[%c2_233, %c0_234, %c0_235] : memref<3x1x128xf32, #tpu.memory_space<vmem>>, vector<1x1x128xf32>
    %528 = vector.shape_cast %527 : vector<1x1x128xf32> to vector<1x128xf32>
    %529 = vector.broadcast %528 : vector<1x128xf32> to vector<8x128xf32>
    %530 = arith.addf %526, %529 : vector<8x128xf32>
    %c0_236 = arith.constant 0 : index
    %c0_237 = arith.constant 0 : index
    %531 = vector.load %arg7[%c0_236, %c0_237] : memref<8x128xf32, #tpu.memory_space<vmem>>, vector<8x128xf32>
    tpu.vector_store %arg7[%c0_236, %c0_237], %530 {strides = array<i32>} : memref<8x128xf32, #tpu.memory_space<vmem>>, vector<8x128xf32>,
    return
  }
  func.func @transform_0(%arg0: i32) -> (i32, i32) {
    %c0_i32 = arith.constant 0 : i32
    %c0_i32_0 = arith.constant 0 : i32
    return %arg0, %c0_i32 : i32, i32
  }
  func.func @transform_1(%arg0: i32) -> (i32, i32, i32) {
    %c0_i32 = arith.constant 0 : i32
    %c0_i32_0 = arith.constant 0 : i32
    %c0_i32_1 = arith.constant 0 : i32
    %c0_i32_2 = arith.constant 0 : i32
    return %c0_i32, %c0_i32_0, %c0_i32_1 : i32, i32, i32
  }
  func.func @transform_2(%arg0: i32) -> (i32, i32, i32) {
    %c0_i32 = arith.constant 0 : i32
    %c0_i32_0 = arith.constant 0 : i32
    %c0_i32_1 = arith.constant 0 : i32
    %c0_i32_2 = arith.constant 0 : i32
    return %c0_i32, %c0_i32_0, %c0_i32_1 : i32, i32, i32
  }
  func.func @transform_3(%arg0: i32) -> (i32, i32, i32) {
    %c0_i32 = arith.constant 0 : i32
    %c0_i32_0 = arith.constant 0 : i32
    %c0_i32_1 = arith.constant 0 : i32
    %c0_i32_2 = arith.constant 0 : i32
    return %c0_i32, %c0_i32_0, %c0_i32_1 : i32, i32, i32
  }
  func.func @transform_4(%arg0: i32) -> (i32, i32, i32) {
    %c0_i32 = arith.constant 0 : i32
    %c0_i32_0 = arith.constant 0 : i32
    %c0_i32_1 = arith.constant 0 : i32
    %c0_i32_2 = arith.constant 0 : i32
    return %c0_i32, %c0_i32_0, %c0_i32_1 : i32, i32, i32
  }
  func.func @transform_5(%arg0: i32) -> (i32, i32, i32) {
    %c0_i32 = arith.constant 0 : i32
    %c0_i32_0 = arith.constant 0 : i32
    %c0_i32_1 = arith.constant 0 : i32
    %c0_i32_2 = arith.constant 0 : i32
    return %c0_i32, %c0_i32_0, %c0_i32_1 : i32, i32, i32
  }
  func.func @transform_6(%arg0: i32) -> (i32, i32) {
    %c0_i32 = arith.constant 0 : i32
    %c0_i32_0 = arith.constant 0 : i32
    return %arg0, %c0_i32 : i32, i32
  }
}

</mosaic_0001>

<bundles_post_ra>
// kernel: net_forward.1
= control target key start
LH: loop header
LB: loop body
LE: loop exit
PB: predicated region body
PF: predicated region fallthrough
CT: control target
= control target key end

     0   :  { %11 = vsyncpa [#allocation3], 0  ;;  %s4186_s0 = inlined_call_operand.vmem [shape: f32[128,128], index: 0, kind: input, shape index: {}]   ;;  %s4187_s1 = inlined_call_operand.hbm [shape: f32[15,128,128], index: 1, kind: input, shape index: {}]   ;;  %s4188_s2 = inlined_call_operand.vmem [shape: f32[5,1,128], index: 2, kind: input, shape index: {}]   ;;  %s4189_s3 = inlined_call_operand.hbm [shape: f32[4,128,128], index: 3, kind: input, shape index: {}]   ;;  %s4190_s4 = inlined_call_operand.hbm [shape: f32[2,128,128], index: 4, kind: input, shape index: {}]   ;;  %s4191_s5 = inlined_call_operand.vmem [shape: f32[3,1,128], index: 5, kind: input, shape index: {}]   ;;  %s4192_s6 = inlined_call_operand.vmem [shape: f32[8,128], index: 6, kind: output, shape index: {}]  }
   0x1   :  { %12 = vsyncpa [#allocation5], 0  ;;  %s34_s23 = sshll.u32 %s4189_s3, 4  ;;  %s3270_s24 = smov [#allocation4]   ;;  %s35_s23 = int_to_ptr.hbm [resolvable:$true] %s34_s23 }
   0x2   :  { %s36_s25 = sshll.u32 %s3270_s24, 4  ;;  %s19_s28 = sshll.u32 %s4187_s1, 4  ;;  %s37_s25 = int_to_ptr.vmem [resolvable:$true] %s36_s25  ;;  %s20_s28 = int_to_ptr.hbm [resolvable:$true] %s19_s28 }
   0x3   :  { %s3271_s29 = smov 128   ;;  %s3272_s30 = smov 8  }
   0x4   :  { %42 = dma.hbm_to_vmem [thread:$0]  %s35_s23, 8192, %s37_s25, [#allocation5], %s3271_s29, %s3271_s29, %s3272_s30  }
   0x5   :  { %s3273_s7 = smov [#allocation2]   ;;  %s47_s11 = sshll.u32 %s4190_s4, 4  ;;  %s48_s11 = int_to_ptr.hbm [resolvable:$true] %s47_s11 }
   0x6   :  { %s21_s8 = sshll.u32 %s3273_s7, 4  ;;  %s3274_s3 = smov [#allocation6]   ;;  %s22_s8 = int_to_ptr.vmem [resolvable:$true] %s21_s8 }
   0x7   :  { %27 = dma.hbm_to_vmem [thread:$0]  %s20_s28, 30720, %s22_s8, [#allocation3], %s3271_s29, %s3271_s29, %s3272_s30  }
   0x8   :  { %s49_s12 = sshll.u32 %s3274_s3, 4  ;;  %s50_s12 = int_to_ptr.vmem [resolvable:$true] %s49_s12 }
   0x9   :  { %55 = dma.hbm_to_vmem [thread:$0]  %s48_s11, 4096, %s50_s12, [#allocation5], %s3271_s29, %s3271_s29, %s3272_s30  }
   0xa   :  { %3266 = dma.done.wait [#allocation3], 30720  }
   0xb   :  { %3267 = vsyncadd [#allocation3], 4294936576 }
   0xc   :  { %3268 = dma.done.wait [#allocation5], 12288  }
   0xd   :  { %3269 = vsyncadd [#allocation5], 4294955008  ;;  %v86_v0 = vlaneseq  ;;  %v3327_v2 = vld [vmem:[%s4186_s0 + $0x78] sm:$0xff]  ;;  %v3332_v3 = vld [vmem:[%s4186_s0 + $0x70] sm:$0xff]  ;;  %vm3275_vm4 = vmmov 1   ;;  %v4250_v10 = vmov 0 }
   0xe   :  { %745 = vmatpush.msra.mxu0 %v3327_v2  ;;  %810 = vmatpush.msra.mxu1 %v3327_v2  ;;  %v3339_v4 = vld [vmem:[%s4186_s0 + $0x68] sm:$0xff]  ;;  %v3352_v7 = vld [vmem:[%s4186_s0 + $0x60] sm:$0xff]  ;;  %v3358_v8 = vld [vmem:[%s4186_s0 + $0x58] sm:$0xff]  ;;  %v4254_v17 = vmov 0  ;;  %v4257_v22 = vmov 0  ;;  %v4260_v27 = vmov 0 }
   0xf   :  { %v3322_v1 = vshrl.u32 %v86_v0, 7  ;;  %v3343_v5 = vand.u32 127, %v86_v0  ;;  %v3372_v9 = vld [vmem:[%s4186_s0 + $0x50] sm:$0xff]  ;;  %v3386_v11 = vld [vmem:[%s4186_s0 + $0x48] sm:$0xff]  ;;  %v3397_v13 = vld [vmem:[%s4186_s0 + $0x40] sm:$0xff]  ;;  %v4263_v29 = vmov 0 }
  0x10   :  { %746 = vmatpush.msra.mxu0 %v3332_v3  ;;  %811 = vmatpush.msra.mxu1 %v3332_v3  ;;  %v3408_v15 = vld [vmem:[%s4186_s0 + $0x38] sm:$0xff]  ;;  %v3420_v16 = vld [vmem:[%s4186_s0 + $0x30] sm:$0xff]  ;;  %v3438_v19 = vld [vmem:[%s4186_s0 + $0x28] sm:$0xff]  ;;  %v4207_v31 = vmov 1.0   ;;  %v4269_v34 = vmov 0  ;;  %v4272_v36 = vmov 0 }
  0x11   :  { %v3346_v6 = vadd.s32 4294967295, %v3322_v1  ;;  %vm1930_vm0 = vcmp.eq.s32.totalorder %v3322_v1, 4  ;;  %vm105_vm1 = vcmp.eq.s32.totalorder %v3322_v1, 0  ;;  %v3391_v12 = vadd.s32 1, %v3322_v1  ;;  %v3451_v21 = vld [vmem:[%s4186_s0 + $0x20] sm:$0xff]  ;;  %v3470_v24 = vld [vmem:[%s4186_s0 + $0x18] sm:$0xff] }
  0x12   :  { %747 = vmatpush.msra.mxu0 %v3339_v4  ;;  %812 = vmatpush.msra.mxu1 %v3339_v4  ;;  %vm1934_vm2 = vmor %vm105_vm1, %vm1930_vm0  ;;  %vm1978_vm7 = vcmp.eq.s32.totalorder %v3322_v1, 3  ;;  %v3400_v14 = vadd.s32 16, %v3322_v1  ;;  %vm4193_vm8 = vcmp.eq.s32.totalorder %v3322_v1, 7  ;;  %v3444_v20 = vadd.s32 8, %v3322_v1  ;;  %v3481_v25 = vld [vmem:[%s4186_s0 + $0x10] sm:$0xff]  ;;  %v3492_v26 = vld [vmem:[%s4186_s0 + $0x8] sm:$0xff] }
  0x13   :  { %vm633_vm3 = vcmp.eq.s32.totalorder %v3343_v5, %v3346_v6  ;;  %vm1974_vm5 = vmxor %vm1934_vm2, %vm3275_vm4  ;;  %4253 = vst [vmem:[#allocation10_spill] sm:$0xff] %v3391_v12  ;;  %vm4196_vm10 = vcmp.eq.s32.totalorder %v3343_v5, %v3391_v12  ;;  %v3505_v28 = vld [vmem:[%s4186_s0] sm:$0xff]  ;;  %v3542_v33 = vadd.s32 24, %v3322_v1  ;;  %v4275_v37 = vmov 0  ;;  %v907_v59 = vld [vmem:[#allocation2 + $0xf8] sm:$0xff] }
  0x14   :  { %748 = vmatpush.msra.mxu0 %v3352_v7  ;;  %813 = vmatpush.msra.mxu1 %v3352_v7  ;;  %vm3377_vm6 = vmand %vm633_vm3, %vm1974_vm5  ;;  %v3430_v18 = vadd.s32 4294967295, %v3400_v14  ;;  %vm1956_vm13 = vcmp.eq.s32.totalorder %v3400_v14, 20  ;;  %vm4197_vm14 = vcmp.eq.s32.totalorder %v3400_v14, 16  ;;  %v682_v23 = vadd.s32 1, %v3444_v20  ;;  %v890_v60 = vld [vmem:[#allocation2 + $0x78] sm:$0xff]  ;;  %v906_v0 = vld [vmem:[#allocation2 + $0xf0] sm:$0xff] }
  0x15   :  { %v4251_v10 = vsel %vm3377_vm6, 4294967295, %v4250_v10  ;;  %vm1982_vm9 = vmor %vm1978_vm7, %vm4193_vm8  ;;  %vm1987_vm7 = vcmp.eq.s32.totalorder %v3444_v20, 11  ;;  %v3517_v30 = vadd.s32 1, %v3400_v14  ;;  %v3536_v32 = vadd.s32 4294967295, %v3444_v20  ;;  %4268 = vst [vmem:[#allocation17_spill] sm:$0xff] %v3542_v33  ;;  %908 = vmatpush.msra.mxu2 %v907_v59  ;;  %973 = vmatpush.msra.mxu3 %v890_v60  ;;  %v889_v6 = vld [vmem:[#allocation2 + $0x70] sm:$0xff] }
  0x16   :  { %4252 = vst [vmem:[#allocation9_spill] sm:$0xff] %v4251_v10  ;;  %749 = vmatpush.msra.mxu0 %v3358_v8  ;;  %814 = vmatpush.msra.mxu1 %v3358_v8  ;;  %vm2022_vm11 = vmxor %vm1982_vm9, %vm3275_vm4  ;;  %vm4194_vm0 = vcmp.eq.s32.totalorder %v3343_v5, %v3430_v18  ;;  %v684_v35 = vadd.s32 1, %v3542_v33  ;;  %v4280_v38 = vmov 0  ;;  %v3593_v39 = vadd.s32 4294967295, %v3542_v33  ;;  %v886_v59 = vld [vmem:[#allocation2 + $0x58] sm:$0xff] }
  0x17   :  { %vm3425_vm12 = vmand %vm4196_vm10, %vm2022_vm11  ;;  %vm362_vm11 = vcmp.eq.s32.totalorder %v3444_v20, 15  ;;  %4266 = vst [vmem:[#allocation15_spill] sm:$0xff] %v3517_v30  ;;  %v3596_v40 = vadd.s32 32, %v3322_v1  ;;  %v4286_v41 = vmov 0  ;;  %v3620_v44 = vadd.s32 40, %v3322_v1  ;;  %909 = vmatpush.msra.mxu2 %v906_v0  ;;  %974 = vmatpush.msra.mxu3 %v889_v6  ;;  %v901_v6 = vld [vmem:[#allocation2 + $0xc8] sm:$0xff] }
  0x18   :  { %750 = vmatpush.msra.mxu0 %v3372_v9  ;;  %815 = vmatpush.msra.mxu1 %v3372_v9  ;;  %v4255_v17 = vsel %vm3425_vm12, 4294967295, %v4254_v17  ;;  %vm1960_vm15 = vmor %vm4197_vm14, %vm1956_vm13  ;;  %4267 = vst [vmem:[#allocation16_spill] sm:$0xff] %v3536_v32  ;;  %v4291_v45 = vmov 0  ;;  %v3641_v48 = vadd.s32 48, %v3322_v1  ;;  %v4296_v49 = vmov 0 }
  0x19   :  { %4256 = vst [vmem:[#allocation11_spill] sm:$0xff] %v4255_v17  ;;  %vm1976_vm2 = vmxor %vm1960_vm15, %vm3275_vm4  ;;  %vm698_vm15 = vcmp.eq.s32.totalorder %v3343_v5, %v682_v23  ;;  %v3060_v42 = vadd.s32 4294967295, %v3596_v40  ;;  %v3615_v43 = vadd.s32 1, %v3596_v40  ;;  %v686_v46 = vadd.s32 1, %v3620_v44 }
  0x1a   :  { %751 = vmatpush.msra.mxu0 %v3386_v11  ;;  %816 = vmatpush.msra.mxu1 %v3386_v11  ;;  %vm3461_vm5 = vmand %vm4194_vm0, %vm1976_vm2  ;;  %4284 = vst [vmem:[#allocation22_spill] sm:$0xff] %v3593_v39  ;;  %v3638_v47 = vadd.s32 4294967295, %v3620_v44  ;;  %v3062_v50 = vadd.s32 4294967295, %v3641_v48  ;;  %v3661_v51 = vadd.s32 1, %v3641_v48  ;;  %v3666_v52 = vadd.s32 56, %v3322_v1 }
  0x1b   :  { %v4258_v22 = vsel %vm3461_vm5, 4294967295, %v4257_v22  ;;  %vm345_vm9 = vmxor %vm105_vm1, %vm3275_vm4  ;;  %4285 = vst [vmem:[#allocation23_spill] sm:$0xff] %v3596_v40  ;;  %v4301_v53 = vmov 0  ;;  %v95_v56 = vadd.s32 64, %v3322_v1  ;;  %v4305_v57 = vmov 0 }
  0x1c   :  { %752 = vmatpush.msra.mxu0 %v3397_v13  ;;  %817 = vmatpush.msra.mxu1 %v3397_v13  ;;  %4259 = vst [vmem:[#allocation12_spill] sm:$0xff] %v4258_v22  ;;  %vm1995_vm13 = vmor %vm1987_vm7, %vm362_vm11  ;;  %v688_v54 = vadd.s32 1, %v3666_v52  ;;  %vm448_vm5 = vcmp.eq.s32.totalorder %v3666_v52, 63  ;;  %v3684_v55 = vadd.s32 4294967295, %v3666_v52  ;;  %v96_v62 = vadd.s32 72, %v3322_v1 }
  0x1d   :  { %vm2023_vm2 = vmxor %vm1995_vm13, %vm3275_vm4  ;;  %vm2000_vm13 = vcmp.eq.s32.totalorder %v3400_v14, 19  ;;  %4289 = vst [vmem:[#allocation25_spill] sm:$0xff] %v3615_v43  ;;  %v3064_v58 = vadd.s32 4294967295, %v95_v56  ;;  %vm225_vm12 = vcmp.eq.s32.totalorder %v95_v56, 64  ;;  %v689_v61 = vadd.s32 1, %v95_v56  ;;  %v1054_v56 = vld [vmem:[#allocation2 + $0x178] sm:$0xff] }
  0x1e   :  { %753 = vmatpush.msra.mxu0 %v3408_v15  ;;  %818 = vmatpush.msra.mxu1 %v3408_v15  ;;  %vm3496_vm1 = vmand %vm698_vm15, %vm2023_vm2  ;;  %4290 = vst [vmem:[#allocation26_spill] sm:$0xff] %v3620_v44  ;;  %vm482_vm6 = vcmp.eq.s32.totalorder %v96_v62, 79  ;;  %v690_v63 = vadd.s32 1, %v96_v62  ;;  %v3065_v23 = vadd.s32 4294967295, %v96_v62  ;;  %v885_v62 = vld [vmem:[#allocation2 + $0x50] sm:$0xff] }
  0x1f   :  { %v4261_v27 = vsel %vm3496_vm1, 4294967295, %v4260_v27  ;;  %vm3511_vm7 = vmand %vm633_vm3, %vm345_vm9  ;;  %vm4195_vm3 = vcmp.eq.s32.totalorder %v3400_v14, 23  ;;  %4294 = vst [vmem:[#allocation28_spill] sm:$0xff] %v3638_v47 }
  0x20   :  { %754 = vmatpush.msra.mxu0 %v3420_v16  ;;  %819 = vmatpush.msra.mxu1 %v3420_v16  ;;  %4262 = vst [vmem:[#allocation13_spill] sm:$0xff] %v4261_v27  ;;  %v4264_v29 = vsel %vm3511_vm7, 4294967295, %v4263_v29  ;;  %vm602_vm2 = vmxor %vm362_vm11, %vm3275_vm4  ;;  %vm4198_vm11 = vcmp.eq.s32.totalorder %v3343_v5, %v3517_v30 }
  0x21   :  { %4265 = vst [vmem:[#allocation14_spill] sm:$0xff] %v4264_v29  ;;  %vm2008_vm9 = vmor %vm2000_vm13, %vm4195_vm3  ;;  %vm2013_vm13 = vcmp.eq.s32.totalorder %v3542_v33, 27  ;;  %vm4199_vm3 = vcmp.eq.s32.totalorder %v3343_v5, %v3536_v32 }
  0x22   :  { %755 = vmatpush.msra.mxu0 %v3438_v19  ;;  %820 = vmatpush.msra.mxu1 %v3438_v19  ;;  %vm2024_vm8 = vmxor %vm2008_vm9, %vm3275_vm4  ;;  %4295 = vst [vmem:[#allocation29_spill] sm:$0xff] %v3641_v48 }
  0x23   :  { %vm3547_vm0 = vmand %vm4198_vm11, %vm2024_vm8  ;;  %vm700_vm8 = vcmp.eq.s32.totalorder %v3343_v5, %v684_v35  ;;  %4299 = vst [vmem:[#allocation31_spill] sm:$0xff] %v3661_v51  ;;  %v900_v35 = vld [vmem:[#allocation2 + $0xc0] sm:$0xff] }
  0x24   :  { %756 = vmatpush.msra.mxu0 %v3451_v21  ;;  %821 = vmatpush.msra.mxu1 %v3451_v21  ;;  %v4270_v34 = vsel %vm3547_vm0, 4294967295, %v4269_v34  ;;  %vm3557_vm9 = vmand %vm698_vm15, %vm602_vm2  ;;  %vm4278_vm2 = vcmp.eq.s32.totalorder %v3400_v14, 16  ;;  %vm4279_vm0 = vcmp.eq.s32.totalorder %v3343_v5, %v3430_v18  ;;  %4300 = vst [vmem:[#allocation32_spill] sm:$0xff] %v3666_v52  ;;  %v905_v18 = vld [vmem:[#allocation2 + $0xe8] sm:$0xff] }
  0x25   :  { %4271 = vst [vmem:[#allocation18_spill] sm:$0xff] %v4270_v34  ;;  %v4273_v36 = vsel %vm3557_vm9, 4294967295, %v4272_v36  ;;  %910 = vmatpush.msra.mxu2 %v905_v18  ;;  %v884_v18 = vld [vmem:[#allocation2 + $0x48] sm:$0xff] }
  0x26   :  { %757 = vmatpush.msra.mxu0 %v3470_v24  ;;  %822 = vmatpush.msra.mxu1 %v3470_v24  ;;  %4274 = vst [vmem:[#allocation19_spill] sm:$0xff] %v4273_v36 }
  0x27   :  { %4304 = vst [vmem:[#allocation34_spill] sm:$0xff] %v3684_v55 }
  0x28   :  { %758 = vmatpush.msra.mxu0 %v3481_v25  ;;  %823 = vmatpush.msra.mxu1 %v3481_v25 }
  0x2a   :  { %759 = vmatpush.msra.mxu0 %v3492_v26  ;;  %824 = vmatpush.msra.mxu1 %v3492_v26 }
  0x2c   :  { %760 = vmatpush.msra.mxu0 %v3505_v28  ;;  %825 = vmatpush.msra.mxu1 %v3505_v28 }
  0x2d   :  { %3072 = vmatmul.msk.f32.vlgmr.msra.gmra.mxu0 %vm3511_vm7, %v4207_v31  ;;  %3088 = vmatmul.msk.f32.vlgmr.msra.gmra.mxu1 %vm4196_vm10, %v4207_v31  ;;  %vm380_vm10 = vcmp.eq.s32.totalorder %v3542_v33, 31 }
  0x2e   :  { %vm2021_vm14 = vmor %vm2013_vm13, %vm380_vm10  ;;  %1055 = vmatpush.msrb.mxu0 %v1054_v56  ;;  %v899_v56 = vld [vmem:[#allocation2 + $0xb8] sm:$0xff] }
  0x2f   :  { %vm2025_vm11 = vmxor %vm2021_vm14, %vm3275_vm4  ;;  %vm4283_vm14 = vcmp.eq.s32.totalorder %v3343_v5, %v3517_v30 }
  0x30   :  { %vm3571_vm15 = vmand %vm700_vm8, %vm2025_vm11  ;;  %vm4200_vm11 = vcmp.eq.s32.totalorder %v3343_v5, %v3593_v39 }
  0x31   :  { %v4276_v37 = vsel %vm3571_vm15, 4294967295, %v4275_v37  ;;  %vm347_vm13 = vmxor %vm4278_vm2, %vm3275_vm4 }
  0x32   :  { %4277 = vst [vmem:[#allocation20_spill] sm:$0xff] %v4276_v37 }
  0x35   :  { %3073 = vmatmul.msk.f32.gmra.mxu0 %vm4199_vm3, %v4207_v31  ;;  %3089 = vmatmul.msk.f32.gmra.mxu1 %vm3557_vm9, %v4207_v31  ;;  %vm3581_vm3 = vmand %vm4279_vm0, %vm347_vm13  ;;  %vm157_vm13 = vcmp.eq.s32.totalorder %v3596_v40, 32 }
  0x36   :  { %v4281_v38 = vsel %vm3581_vm3, 4294967295, %v4280_v38  ;;  %vm604_vm0 = vmxor %vm380_vm10, %vm3275_vm4 }
  0x37   :  { %4282 = vst [vmem:[#allocation21_spill] sm:$0xff] %v4281_v38  ;;  %vm3601_vm2 = vmand %vm700_vm8, %vm604_vm0  ;;  %vm637_vm8 = vcmp.eq.s32.totalorder %v3343_v5, %v3060_v42  ;;  %vm4201_vm0 = vcmp.eq.s32.totalorder %v3343_v5, %v3615_v43  ;;  %v888_v42 = vld [vmem:[#allocation2 + $0x68] sm:$0xff] }
  0x38   :  { %v4287_v41 = vsel %vm3601_vm2, 4294967295, %v4286_v41  ;;  %vm349_vm10 = vmxor %vm157_vm13, %vm3275_vm4  ;;  %975 = vmatpush.msra.mxu3 %v888_v42  ;;  %v883_v42 = vld [vmem:[#allocation2 + $0x40] sm:$0xff] }
  0x39   :  { %4288 = vst [vmem:[#allocation24_spill] sm:$0xff] %v4287_v41 }
  0x3d   :  { %3074 = vmatmul.msk.f32.gmra.mxu0 %vm3581_vm3, %v4207_v31  ;;  %3090 = vmatmul.msk.f32.gmra.mxu1 %vm4283_vm14, %v4207_v31  ;;  %vm3622_vm14 = vmand %vm637_vm8, %vm349_vm10  ;;  %vm702_vm10 = vcmp.eq.s32.totalorder %v3343_v5, %v686_v46  ;;  %vm4202_vm8 = vcmp.eq.s32.totalorder %v3343_v5, %v3638_v47  ;;  %v97_v46 = vadd.s32 80, %v3322_v1 }
  0x3e   :  { %v4292_v45 = vsel %vm3622_vm14, 4294967295, %v4291_v45 }
  0x3f   :  { %4293 = vst [vmem:[#allocation27_spill] sm:$0xff] %v4292_v45  ;;  %v3066_v60 = vadd.s32 4294967295, %v97_v46  ;;  %v691_v0 = vadd.s32 1, %v97_v46 }
  0x45   :  { %3075 = vmatmul.msk.f32.gmra.mxu0 %vm4200_vm11, %v4207_v31  ;;  %3091 = vmatmul.msk.f32.gmra.mxu1 %vm3601_vm2, %v4207_v31  ;;  %vm414_vm11 = vcmp.eq.s32.totalorder %v3620_v44, 47 }
  0x46   :  { %vm606_vm13 = vmxor %vm414_vm11, %vm3275_vm4 }
  0x47   :  { %vm3647_vm15 = vmand %vm702_vm10, %vm606_vm13  ;;  %vm639_vm13 = vcmp.eq.s32.totalorder %v3343_v5, %v3062_v50  ;;  %v904_v50 = vld [vmem:[#allocation2 + $0xe0] sm:$0xff] }
  0x48   :  { %v4297_v49 = vsel %vm3647_vm15, 4294967295, %v4296_v49  ;;  %911 = vmatpush.msra.mxu2 %v904_v50  ;;  %v1051_v50 = vld [vmem:[#allocation2 + $0x160] sm:$0xff] }
  0x49   :  { %4298 = vst [vmem:[#allocation30_spill] sm:$0xff] %v4297_v49 }
  0x4d   :  { %3076 = vmatmul.msk.f32.gmra.mxu0 %vm3622_vm14, %v4207_v31  ;;  %3092 = vmatmul.msk.f32.gmra.mxu1 %vm4201_vm0, %v4207_v31  ;;  %vm191_vm0 = vcmp.eq.s32.totalorder %v3641_v48, 48 }
  0x4e   :  { %vm351_vm11 = vmxor %vm191_vm0, %vm3275_vm4 }
  0x4f   :  { %vm3668_vm10 = vmand %vm639_vm13, %vm351_vm11  ;;  %vm704_vm11 = vcmp.eq.s32.totalorder %v3343_v5, %v688_v54  ;;  %vm4204_vm13 = vcmp.eq.s32.totalorder %v3343_v5, %v3684_v55  ;;  %v887_v54 = vld [vmem:[#allocation2 + $0x60] sm:$0xff] }
  0x50   :  { %v4302_v53 = vsel %vm3668_vm10, 4294967295, %v4301_v53  ;;  %vm608_vm0 = vmxor %vm448_vm5, %vm3275_vm4  ;;  %976 = vmatpush.msra.mxu3 %v887_v54  ;;  %v98_v54 = vadd.s32 88, %v3322_v1 }
  0x51   :  { %4303 = vst [vmem:[#allocation33_spill] sm:$0xff] %v4302_v53  ;;  %vm3691_vm1 = vmand %vm704_vm11, %vm608_vm0  ;;  %vm641_vm0 = vcmp.eq.s32.totalorder %v3343_v5, %v3064_v58  ;;  %v903_v58 = vld [vmem:[#allocation2 + $0xd8] sm:$0xff] }
  0x52   :  { %v4306_v57 = vsel %vm3691_vm1, 4294967295, %v4305_v57  ;;  %vm353_vm5 = vmxor %vm225_vm12, %vm3275_vm4  ;;  %vm706_vm12 = vcmp.eq.s32.totalorder %v3343_v5, %v690_v63  ;;  %912 = vmatpush.msra.mxu2 %v903_v58  ;;  %977 = vmatpush.msra.mxu3 %v886_v59  ;;  %v1053_v63 = vld [vmem:[#allocation2 + $0x170] sm:$0xff]  ;;  %v692_v58 = vadd.s32 1, %v98_v54  ;;  %v1050_v59 = vld [vmem:[#allocation2 + $0x158] sm:$0xff] }
  0x53   :  { %4307 = vst [vmem:[#allocation35_spill] sm:$0xff] %v4306_v57  ;;  %vm657_vm11 = vmand %vm641_vm0, %vm353_vm5  ;;  %vm259_vm5 = vcmp.eq.s32.totalorder %v97_v46, 80  ;;  %vm643_vm0 = vcmp.eq.s32.totalorder %v3343_v5, %v3066_v60  ;;  %1056 = vmatpush.msrb.mxu0 %v1053_v63  ;;  %v882_v46 = vld [vmem:[#allocation2 + $0x38] sm:$0xff]  ;;  %v898_v60 = vld [vmem:[#allocation2 + $0xb0] sm:$0xff]  ;;  %v3067_v63 = vadd.s32 4294967295, %v98_v54 }
  0x54   :  { %978 = vmatpush.msra.mxu3 %v885_v62  ;;  %v1049_v62 = vld [vmem:[#allocation2 + $0x150] sm:$0xff] }
  0x55   :  { %3077 = vmatmul.msk.f32.gmra.mxu0 %vm4202_vm8, %v4207_v31  ;;  %3093 = vmatmul.msk.f32.gmra.mxu1 %vm3647_vm15, %v4207_v31  ;;  %vm4203_vm8 = vcmp.eq.s32.totalorder %v3343_v5, %v3661_v51 }
  0x56   :  { %979 = vmatpush.msra.mxu3 %v884_v18  ;;  %v99_v18 = vadd.s32 96, %v3322_v1 }
  0x58   :  { %980 = vmatpush.msra.mxu3 %v883_v42  ;;  %v879_v42 = vld [vmem:[#allocation2 + $0x20] sm:$0xff] }
  0x5a   :  { %981 = vmatpush.msra.mxu3 %v882_v46  ;;  %v878_v46 = vld [vmem:[#allocation2 + $0x18] sm:$0xff] }
  0x5d   :  { %3078 = vmatmul.msk.f32.gmra.mxu0 %vm3668_vm10, %v4207_v31  ;;  %3094 = vmatmul.msk.f32.gmra.mxu1 %vm4203_vm8, %v4207_v31  ;;  %vm705_vm8 = vcmp.eq.s32.totalorder %v3343_v5, %v689_v61  ;;  %v902_v61 = vld [vmem:[#allocation2 + $0xd0] sm:$0xff] }
  0x5e   :  { %913 = vmatpush.msra.mxu2 %v902_v61  ;;  %v881_v61 = vld [vmem:[#allocation2 + $0x30] sm:$0xff] }
  0x5f   :  { %982 = vmatpush.msra.mxu3 %v881_v61  ;;  %v1045_v61 = vld [vmem:[#allocation2 + $0x130] sm:$0xff] }
  0x60   :  { %914 = vmatpush.msra.mxu2 %v901_v6  ;;  %v897_v6 = vld [vmem:[#allocation2 + $0xa8] sm:$0xff] }
  0x62   :  { %915 = vmatpush.msra.mxu2 %v900_v35  ;;  %v896_v35 = vld [vmem:[#allocation2 + $0xa0] sm:$0xff] }
  0x64   :  { %916 = vmatpush.msra.mxu2 %v899_v56  ;;  %v895_v56 = vld [vmem:[#allocation2 + $0x98] sm:$0xff] }
  0x65   :  { %3079 = vmatmul.msk.f32.gmra.mxu0 %vm4204_vm13, %v4207_v31  ;;  %3095 = vmatmul.msk.f32.gmra.mxu1 %vm3691_vm1, %v4207_v31  ;;  %vm3709_vm13 = vmxor %vm482_vm6, %vm3275_vm4  ;;  %vm642_vm6 = vcmp.eq.s32.totalorder %v3343_v5, %v3065_v23  ;;  %v1052_v23 = vld [vmem:[#allocation2 + $0x168] sm:$0xff] }
  0x66   :  { %1057 = vmatpush.msrb.mxu0 %v1052_v23  ;;  %917 = vmatpush.msra.mxu2 %v898_v60  ;;  %v1048_v23 = vld [vmem:[#allocation2 + $0x148] sm:$0xff]  ;;  %v877_v60 = vld [vmem:[#allocation2 + $0x10] sm:$0xff] }
  0x68   :  { %1058 = vmatpush.msrb.mxu0 %v1051_v50  ;;  %918 = vmatpush.msra.mxu2 %v897_v6  ;;  %v1047_v50 = vld [vmem:[#allocation2 + $0x140] sm:$0xff]  ;;  %v876_v6 = vld [vmem:[#allocation2 + $0x8] sm:$0xff] }
  0x6a   :  { %1059 = vmatpush.msrb.mxu0 %v1050_v59  ;;  %919 = vmatpush.msra.mxu2 %v896_v35  ;;  %v1046_v59 = vld [vmem:[#allocation2 + $0x138] sm:$0xff]  ;;  %v892_v35 = vld [vmem:[#allocation2 + $0x80] sm:$0xff] }
  0x6c   :  { %1060 = vmatpush.msrb.mxu0 %v1049_v62  ;;  %920 = vmatpush.msra.mxu2 %v895_v56  ;;  %v693_v62 = vadd.s32 1, %v99_v18  ;;  %v1042_v56 = vld [vmem:[#allocation2 + $0x118] sm:$0xff] }
  0x6d   :  { %3080 = vmatmul.msk.f32.gmra.mxu0 %vm657_vm11, %v4207_v31  ;;  %3096 = vmatmul.msk.f32.gmra.mxu1 %vm705_vm8, %v4207_v31  ;;  %vm722_vm8 = vmand %vm706_vm12, %vm3709_vm13  ;;  %vm707_vm12 = vcmp.eq.s32.totalorder %v3343_v5, %v691_v0  ;;  %v880_v0 = vld [vmem:[#allocation2 + $0x28] sm:$0xff] }
  0x6e   :  { %vm355_vm13 = vmxor %vm259_vm5, %vm3275_vm4  ;;  %vm708_vm5 = vcmp.eq.s32.totalorder %v3343_v5, %v692_v58  ;;  %983 = vmatpush.msra.mxu3 %v880_v0  ;;  %1061 = vmatpush.msrb.mxu0 %v1048_v23  ;;  %v894_v58 = vld [vmem:[#allocation2 + $0x90] sm:$0xff]  ;;  %v1044_v0 = vld [vmem:[#allocation2 + $0x128] sm:$0xff]  ;;  %v100_v23 = vadd.s32 104, %v3322_v1 }
  0x6f   :  { %vm659_vm11 = vmand %vm643_vm0, %vm355_vm13  ;;  %vm644_vm13 = vcmp.eq.s32.totalorder %v3343_v5, %v3067_v63  ;;  %v893_v63 = vld [vmem:[#allocation2 + $0x88] sm:$0xff]  ;;  %921 = vmatpush.msra.mxu2 %v894_v58 }
  0x70   :  { %984 = vmatpush.msra.mxu3 %v879_v42  ;;  %1062 = vmatpush.msrb.mxu0 %v1047_v50  ;;  %v875_v42 = vld [vmem:[#allocation2] sm:$0xff]  ;;  %v1040_v58 = vld [vmem:[#allocation2 + $0x108] sm:$0xff] }
  0x71   :  { %922 = vmatpush.msra.mxu2 %v893_v63  ;;  %v1043_v50 = vld [vmem:[#allocation2 + $0x120] sm:$0xff] }
  0x72   :  { %985 = vmatpush.msra.mxu3 %v878_v46  ;;  %1063 = vmatpush.msrb.mxu0 %v1046_v59  ;;  %v3069_v46 = vadd.s32 4294967295, %v100_v23  ;;  %v101_v59 = vadd.s32 112, %v3322_v1 }
  0x73   :  { %923 = vmatpush.msra.mxu2 %v892_v35 }
  0x74   :  { %986 = vmatpush.msra.mxu3 %v877_v60  ;;  %1064 = vmatpush.msrb.mxu0 %v1045_v61  ;;  %v1039_v60 = vld [vmem:[#allocation2 + $0x100] sm:$0xff]  ;;  %v3070_v61 = vadd.s32 4294967295, %v101_v59 }
  0x75   :  { %3081 = vmatmul.msk.f32.gmra.mxu0 %vm642_vm6, %v4207_v31  ;;  %3097 = vmatmul.msk.f32.gmra.mxu1 %vm722_vm8, %v4207_v31  ;;  %vm516_vm6 = vcmp.eq.s32.totalorder %v98_v54, 95  ;;  %v3068_v54 = vadd.s32 4294967295, %v99_v18 }
  0x76   :  { %vm612_vm8 = vmxor %vm516_vm6, %vm3275_vm4  ;;  %987 = vmatpush.msra.mxu3 %v876_v6  ;;  %1065 = vmatpush.msrb.mxu0 %v1044_v0 }
  0x77   :  { %vm724_vm0 = vmand %vm708_vm5, %vm612_vm8  ;;  %vm645_vm6 = vcmp.eq.s32.totalorder %v3343_v5, %v3068_v54  ;;  %vm709_vm5 = vcmp.eq.s32.totalorder %v3343_v5, %v693_v62  ;;  %v1041_v54 = vld [vmem:[#allocation2 + $0x110] sm:$0xff]  ;;  %924 = vmatmul.f32.vlgmr.msra.gmra.mxu2 %v3505_v28  ;;  %v695_v28 = vadd.s32 1, %v101_v59  ;;  %v102_v62 = vadd.s32 120, %v3322_v1 }
  0x78   :  { %988 = vmatpush.msra.mxu3 %v875_v42  ;;  %1066 = vmatpush.msrb.mxu0 %v1043_v50 }
  0x79   :  { %v696_v63 = vadd.s32 1, %v102_v62  ;;  %v3071_v6 = vadd.s32 4294967295, %v102_v62 }
  0x7a   :  { %1067 = vmatpush.msrb.mxu0 %v1042_v56 }
  0x7c   :  { %1068 = vmatpush.msrb.mxu0 %v1041_v54 }
  0x7d   :  { %3082 = vmatmul.msk.f32.gmra.mxu0 %vm659_vm11, %v4207_v31  ;;  %3098 = vmatmul.msk.f32.gmra.mxu1 %vm707_vm12, %v4207_v31  ;;  %vm293_vm11 = vcmp.eq.s32.totalorder %v99_v18, 96  ;;  %v694_v18 = vadd.s32 1, %v100_v23 }
  0x7e   :  { %vm357_vm12 = vmxor %vm293_vm11, %vm3275_vm4  ;;  %1069 = vmatpush.msrb.mxu0 %v1040_v58 }
  0x7f   :  { %vm661_vm8 = vmand %vm645_vm6, %vm357_vm12  ;;  %vm710_vm11 = vcmp.eq.s32.totalorder %v3343_v5, %v694_v18  ;;  %vm646_vm12 = vcmp.eq.s32.totalorder %v3343_v5, %v3069_v46  ;;  %927 = vmatmul.f32.gmra.mxu2 %v3492_v26 }
  0x80   :  { %1070 = vmatpush.msrb.mxu0 %v1039_v60 }
  0x85   :  { %3083 = vmatmul.msk.f32.gmra.mxu0 %vm644_vm13, %v4207_v31  ;;  %3099 = vmatmul.msk.f32.gmra.mxu1 %vm724_vm0, %v4207_v31  ;;  %vm550_vm13 = vcmp.eq.s32.totalorder %v100_v23, 111 }
  0x86   :  { %vm614_vm0 = vmxor %vm550_vm13, %vm3275_vm4  ;;  %vm647_vm13 = vcmp.eq.s32.totalorder %v3343_v5, %v3070_v61 }
  0x87   :  { %vm726_vm6 = vmand %vm710_vm11, %vm614_vm0  ;;  %vm711_vm0 = vcmp.eq.s32.totalorder %v3343_v5, %v695_v28  ;;  %vm584_vm11 = vcmp.eq.s32.totalorder %v102_v62, 127  ;;  %930 = vmatmul.f32.gmra.mxu2 %v3481_v25 }
  0x8d   :  { %3084 = vmatmul.msk.f32.gmra.mxu0 %vm661_vm8, %v4207_v31  ;;  %3100 = vmatmul.msk.f32.gmra.mxu1 %vm709_vm5, %v4207_v31  ;;  %vm327_vm8 = vcmp.eq.s32.totalorder %v101_v59, 112 }
  0x8e   :  { %vm359_vm5 = vmxor %vm327_vm8, %vm3275_vm4  ;;  %vm648_vm8 = vcmp.eq.s32.totalorder %v3343_v5, %v3071_v6 }
  0x8f   :  { %vm663_vm1 = vmand %vm647_vm13, %vm359_vm5  ;;  %933 = vmatmul.f32.gmra.mxu2 %v3470_v24 }
  0x95   :  { %3085 = vmatmul.msk.f32.gmra.mxu0 %vm646_vm12, %v4207_v31  ;;  %3101 = vmatmul.msk.f32.gmra.mxu1 %vm726_vm6, %v4207_v31  ;;  %vm616_vm12 = vmxor %vm584_vm11, %vm3275_vm4  ;;  %vm712_vm6 = vcmp.eq.s32.totalorder %v3343_v5, %v696_v63 }
  0x96   :  { %vm728_vm10 = vmand %vm712_vm6, %vm616_vm12 }
  0x97   :  { %936 = vmatmul.f32.gmra.mxu2 %v3451_v21 }
  0x9d   :  { %3086 = vmatmul.msk.f32.gmra.mxu0 %vm663_vm1, %v4207_v31  ;;  %3102 = vmatmul.msk.f32.gmra.mxu1 %vm711_vm0, %v4207_v31 }
  0x9f   :  { %939 = vmatmul.f32.gmra.mxu2 %v3438_v19 }
  0xa5   :  { %3087 = vmatmul.msk.f32.gmra.mxu0 %vm648_vm8, %v4207_v31  ;;  %3103 = vmatmul.msk.f32.gmra.mxu1 %vm728_vm10, %v4207_v31 }
  0xa7   :  { %942 = vmatmul.f32.gmra.mxu2 %v3420_v16 }
  0xaa   :  { %v762_v26 = vpop.f32.mrf.mxu0  ;;  %v827_v0 = vpop.f32.mrf.mxu1 }
  0xab   :  { %989 = vmatmul.f32.vlgmr.msra.gmra.mxu3 %v762_v26 }
  0xad   :  { %1071 = vmatmul.f32.vlgmr.msrb.gmra.mxu0 %v827_v0 }
  0xaf   :  { %945 = vmatmul.f32.gmra.mxu2 %v3408_v15 }
  0xb2   :  { %v765_v25 = vpop.f32.mrf.mxu0  ;;  %v830_v23 = vpop.f32.mrf.mxu1 }
  0xb3   :  { %992 = vmatmul.f32.gmra.mxu3 %v765_v25 }
  0xb5   :  { %1074 = vmatmul.f32.gmra.mxu0 %v830_v23 }
  0xb7   :  { %948 = vmatmul.f32.gmra.mxu2 %v3397_v13 }
  0xba   :  { %v768_v35 = vpop.f32.mrf.mxu0  ;;  %v833_v42 = vpop.f32.mrf.mxu1 }
  0xbb   :  { %995 = vmatmul.f32.gmra.mxu3 %v768_v35 }
  0xbd   :  { %1077 = vmatmul.f32.gmra.mxu0 %v833_v42 }
  0xbf   :  { %951 = vmatmul.f32.gmra.mxu2 %v3386_v11 }
  0xc2   :  { %v771_v50 = vpop.f32.mrf.mxu0  ;;  %v836_v24 = vpop.f32.mrf.mxu1 }
  0xc3   :  { %998 = vmatmul.f32.gmra.mxu3 %v771_v50 }
  0xc5   :  { %1080 = vmatmul.f32.gmra.mxu0 %v836_v24 }
  0xc7   :  { %954 = vmatmul.f32.gmra.mxu2 %v3372_v9 }
  0xca   :  { %v774_v18 = vpop.f32.mrf.mxu0  ;;  %v839_v21 = vpop.f32.mrf.mxu1 }
  0xcb   :  { %1001 = vmatmul.f32.gmra.mxu3 %v774_v18 }
  0xcd   :  { %1083 = vmatmul.f32.gmra.mxu0 %v839_v21 }
  0xcf   :  { %957 = vmatmul.f32.gmra.mxu2 %v3358_v8 }
  0xd2   :  { %v777_v56 = vpop.f32.mrf.mxu0  ;;  %v842_v19 = vpop.f32.mrf.mxu1 }
  0xd3   :  { %1004 = vmatmul.f32.gmra.mxu3 %v777_v56 }
  0xd5   :  { %1086 = vmatmul.f32.gmra.mxu0 %v842_v19 }
  0xd7   :  { %960 = vmatmul.f32.gmra.mxu2 %v3352_v7 }
  0xda   :  { %v780_v54 = vpop.f32.mrf.mxu0  ;;  %v845_v16 = vpop.f32.mrf.mxu1 }
  0xdb   :  { %1007 = vmatmul.f32.gmra.mxu3 %v780_v54 }
  0xdd   :  { %1089 = vmatmul.f32.gmra.mxu0 %v845_v16 }
  0xdf   :  { %963 = vmatmul.f32.gmra.mxu2 %v3339_v4 }
  0xe2   :  { %v783_v46 = vpop.f32.mrf.mxu0  ;;  %v848_v15 = vpop.f32.mrf.mxu1 }
  0xe3   :  { %1010 = vmatmul.f32.gmra.mxu3 %v783_v46 }
  0xe5   :  { %1092 = vmatmul.f32.gmra.mxu0 %v848_v15 }
  0xe7   :  { %966 = vmatmul.f32.gmra.mxu2 %v3332_v3 }
  0xea   :  { %v786_v59 = vpop.f32.mrf.mxu0  ;;  %v851_v13 = vpop.f32.mrf.mxu1 }
  0xeb   :  { %1013 = vmatmul.f32.gmra.mxu3 %v786_v59 }
  0xed   :  { %1095 = vmatmul.f32.gmra.mxu0 %v851_v13 }
  0xef   :  { %969 = vmatmul.f32.gmra.mxu2 %v3327_v2 }
  0xf2   :  { %v789_v58 = vpop.f32.mrf.mxu0  ;;  %v854_v11 = vpop.f32.mrf.mxu1 }
  0xf3   :  { %1016 = vmatmul.f32.gmra.mxu3 %v789_v58 }
  0xf5   :  { %1098 = vmatmul.f32.gmra.mxu0 %v854_v11 }
  0xfa   :  { %v792_v60 = vpop.f32.mrf.mxu0  ;;  %v857_v9 = vpop.f32.mrf.mxu1 }
  0xfb   :  { %1019 = vmatmul.f32.gmra.mxu3 %v792_v60  ;;  %v3771_v62 = vpop.f32.mrf.mxu2 }
  0xfd   :  { %1101 = vmatmul.f32.gmra.mxu0 %v857_v9 }
 0x102   :  { %v795_v61 = vpop.f32.mrf.mxu0  ;;  %v860_v8 = vpop.f32.mrf.mxu1 }
 0x103   :  { %1022 = vmatmul.f32.gmra.mxu3 %v795_v61  ;;  %v3773_v6 = vpop.f32.mrf.mxu2 }
 0x105   :  { %1104 = vmatmul.f32.gmra.mxu0 %v860_v8 }
 0x10a   :  { %v798_v28 = vpop.f32.mrf.mxu0  ;;  %v863_v7 = vpop.f32.mrf.mxu1 }
 0x10b   :  { %1025 = vmatmul.f32.gmra.mxu3 %v798_v28  ;;  %v3775_v0 = vpop.f32.mrf.mxu2 }
 0x10d   :  { %1107 = vmatmul.f32.gmra.mxu0 %v863_v7 }
 0x112   :  { %v801_v63 = vpop.f32.mrf.mxu0  ;;  %v866_v4 = vpop.f32.mrf.mxu1 }
 0x113   :  { %1028 = vmatmul.f32.gmra.mxu3 %v801_v63  ;;  %v3779_v35 = vpop.f32.mrf.mxu2 }
 0x115   :  { %1110 = vmatmul.f32.gmra.mxu0 %v866_v4 }
 0x11a   :  { %v804_v26 = vpop.f32.mrf.mxu0  ;;  %v869_v3 = vpop.f32.mrf.mxu1 }
 0x11b   :  { %1031 = vmatmul.f32.gmra.mxu3 %v804_v26  ;;  %v3787_v18 = vpop.f32.mrf.mxu2 }
 0x11d   :  { %1113 = vmatmul.f32.gmra.mxu0 %v869_v3 }
 0x122   :  { %v807_v25 = vpop.f32.mrf.mxu0  ;;  %v872_v2 = vpop.f32.mrf.mxu1 }
 0x123   :  { %1034 = vmatmul.f32.gmra.mxu3 %v807_v25  ;;  %v3793_v19 = vpop.f32.mrf.mxu2 }
 0x125   :  { %1116 = vmatmul.f32.gmra.mxu0 %v872_v2 }
 0x12a   :  { %v3777_v23 = vpop.f32.mrf.mxu0 }
 0x12b   :  { %v943_v15 = vpop.f32.mrf.mxu2 }
 0x12e   :  { %v3781_v42 = vpop.f32.mrf.mxu3 }
 0x132   :  { %v3783_v50 = vpop.f32.mrf.mxu0 }
 0x133   :  { %v946_v58 = vpop.f32.mrf.mxu2 }
 0x136   :  { %v3785_v24 = vpop.f32.mrf.mxu3 }
 0x13a   :  { %v3789_v21 = vpop.f32.mrf.mxu0 }
 0x13b   :  { %v949_v61 = vpop.f32.mrf.mxu2 }
 0x13e   :  { %v3791_v56 = vpop.f32.mrf.mxu3 }
 0x142   :  { %v3795_v54 = vpop.f32.mrf.mxu0 }
 0x143   :  { %v952_v7 = vpop.f32.mrf.mxu2 }
 0x146   :  { %v3797_v16 = vpop.f32.mrf.mxu3 }
 0x14a   :  { %v3799_v46 = vpop.f32.mrf.mxu0 }
 0x14b   :  { %v955_v3 = vpop.f32.mrf.mxu2 }
 0x14e   :  { %v3801_v59 = vpop.f32.mrf.mxu3 }
 0x152   :  { %v3803_v13 = vpop.f32.mrf.mxu0 }
 0x153   :  { %v958_v31 = vpop.f32.mrf.mxu2 }
 0x156   :  { %v1005_v11 = vpop.f32.mrf.mxu3 }
 0x15a   :  { %v3805_v60 = vpop.f32.mrf.mxu0 }
 0x15b   :  { %v961_v27 = vpop.f32.mrf.mxu2 }
 0x15e   :  { %v1008_v9 = vpop.f32.mrf.mxu3 }
 0x162   :  { %v1093_v8 = vpop.f32.mrf.mxu0 }
 0x163   :  { %v964_v57 = vpop.f32.mrf.mxu2 }
 0x166   :  { %v1011_v28 = vpop.f32.mrf.mxu3 }
 0x16a   :  { %v1096_v63 = vpop.f32.mrf.mxu0 }
 0x16b   :  { %v967_v51 = vpop.f32.mrf.mxu2 }
 0x16e   :  { %v1014_v4 = vpop.f32.mrf.mxu3 }
 0x172   :  { %v1099_v26 = vpop.f32.mrf.mxu0 }
 0x173   :  { %v970_v45 = vpop.f32.mrf.mxu2 }
 0x176   :  { %v1017_v25 = vpop.f32.mrf.mxu3 }
 0x177   :  { %v1018_v40 = vadd.f32 %v1017_v25, %v952_v7  ;;  %v1672_v7 = vld [vmem:[#allocation2 + $0x228] sm:$0xff]  ;;  %v1670_v25 = vld [vmem:[#allocation2 + $0x218] sm:$0xff] }
 0x17a   :  { %v1102_v2 = vpop.f32.mrf.mxu0 }
 0x17e   :  { %v1020_v37 = vpop.f32.mrf.mxu3 }
 0x17f   :  { %v1021_v48 = vadd.f32 %v1020_v37, %v955_v3  ;;  %v1136_v37 = vmul.u32 2, %v3322_v1 }
 0x181   :  { %vm3831_vm10 = vcmp.eq.s32.totalorder %v3343_v5, %v1136_v37 }
 0x182   :  { %v1105_v34 = vpop.f32.mrf.mxu0 }
 0x186   :  { %v1023_v22 = vpop.f32.mrf.mxu3 }
 0x187   :  { %v1024_v12 = vadd.f32 %v1023_v22, %v958_v31  ;;  %v1009_v22 = vadd.f32 %v1008_v9, %v943_v15  ;;  %v1678_v15 = vld [vmem:[#allocation2 + $0x258] sm:$0xff] }
 0x189   :  { %v1131_v33 = vadd.f32 %v1105_v34, %v1024_v12  ;;  %v1003_v12 = vadd.f32 %v3801_v59, %v3787_v18  ;;  %v1126_v31 = vadd.f32 %v3805_v60, %v1009_v22  ;;  %v997_v34 = vadd.f32 %v3791_v56, %v3775_v0  ;;  %v4317_v0 = vld [vmem:[#allocation17_spill] sm:$0xff]  ;;  %v1682_v18 = vld [vmem:[#allocation2 + $0x278] sm:$0xff]  ;;  %v1677_v59 = vld [vmem:[#allocation2 + $0x250] sm:$0xff] }
 0x18a   :  { %v1108_v17 = vpop.f32.mrf.mxu0  ;;  %v4322_v60 = vld [vmem:[#allocation29_spill] sm:$0xff] }
 0x18b   :  { %v1142_v9 = vmul.u32 2, %v4322_v60 }
 0x18e   :  { %v1026_v10 = vpop.f32.mrf.mxu3 }
 0x18f   :  { %v1027_v32 = vadd.f32 %v1026_v10, %v961_v27  ;;  %v1012_v10 = vadd.f32 %v1011_v28, %v946_v58  ;;  %v1129_v27 = vadd.f32 %v1099_v26, %v1018_v40  ;;  %v1676_v58 = vld [vmem:[#allocation2 + $0x248] sm:$0xff]  ;;  %v1166_v28 = vadd.s32 1, %v1142_v9 }
 0x191   :  { %v1132_v44 = vadd.f32 %v1108_v17, %v1027_v32  ;;  %v1127_v17 = vadd.f32 %v1093_v8, %v1012_v10  ;;  %v1000_v32 = vadd.f32 %v3797_v16, %v3779_v35  ;;  %v4321_v16 = vld [vmem:[#allocation26_spill] sm:$0xff]  ;;  %v1673_v8 = vld [vmem:[#allocation2 + $0x230] sm:$0xff] }
 0x192   :  { %v1111_v55 = vpop.f32.mrf.mxu0 }
 0x193   :  { %v1123_v40 = vadd.f32 %v3795_v54, %v1000_v32  ;;  %v1679_v54 = vld [vmem:[#allocation2 + $0x260] sm:$0xff] }
 0x196   :  { %v1029_v53 = vpop.f32.mrf.mxu3 }
 0x197   :  { %v1030_v30 = vadd.f32 %v1029_v53, %v964_v57  ;;  %v1138_v57 = vmul.u32 2, %v3400_v14 }
 0x199   :  { %v1133_v52 = vadd.f32 %v1111_v55, %v1030_v30  ;;  %v1006_v30 = vadd.f32 %v1005_v11, %v3793_v19  ;;  %vm3865_vm11 = vcmp.eq.s32.totalorder %v3343_v5, %v1138_v57  ;;  %v1680_v19 = vld [vmem:[#allocation2 + $0x268] sm:$0xff]  ;;  %v1675_v11 = vld [vmem:[#allocation2 + $0x240] sm:$0xff] }
 0x19a   :  { %v1114_v49 = vpop.f32.mrf.mxu0 }
 0x19e   :  { %v1032_v47 = vpop.f32.mrf.mxu3 }
 0x19f   :  { %v1033_v39 = vadd.f32 %v1032_v47, %v967_v51  ;;  %v1015_v47 = vadd.f32 %v1014_v4, %v949_v61  ;;  %v1137_v51 = vmul.u32 2, %v3444_v20  ;;  %v1674_v61 = vld [vmem:[#allocation2 + $0x238] sm:$0xff] }
 0x1a0   :  { %v4323_v4 = vld [vmem:[#allocation32_spill] sm:$0xff] }
 0x1a1   :  { %v1134_v29 = vadd.f32 %v1114_v49, %v1033_v39  ;;  %v994_v39 = vadd.f32 %v3785_v24, %v3773_v6  ;;  %v3843_v53 = vadd.s32 1, %v1137_v51  ;;  %vm3848_vm13 = vcmp.eq.s32.totalorder %v3343_v5, %v1137_v51 }
 0x1a2   :  { %v1117_v41 = vpop.f32.mrf.mxu0  ;;  %v4315_v6 = vmov 0  ;;  %v1143_v26 = vmul.u32 2, %v4323_v4 }
 0x1a3   :  { %vm4245_vm5 = vcmp.eq.s32.totalorder %v3343_v5, %v3843_v53  ;;  %v4316_v6 = vsel %vm3865_vm11, 4294967295, %v4315_v6 }
 0x1a4   :  { %v1167_v3 = vadd.s32 1, %v1143_v26 }
 0x1a6   :  { %v1035_v43 = vpop.f32.mrf.mxu3 }
 0x1a7   :  { %v1036_v38 = vadd.f32 %v1035_v43, %v970_v45  ;;  %v1122_v43 = vadd.f32 %v3789_v21, %v997_v34  ;;  %v1121_v45 = vadd.f32 %v3783_v50, %v994_v39  ;;  %v4320_v50 = vld [vmem:[#allocation23_spill] sm:$0xff] }
 0x1a8   :  { %v1140_v24 = vmul.u32 2, %v4320_v50  ;;  %v1681_v21 = vld [vmem:[#allocation2 + $0x270] sm:$0xff] }
 0x1a9   :  { %v1135_v36 = vadd.f32 %v1117_v41, %v1036_v38  ;;  %v1130_v38 = vadd.f32 %v1102_v2, %v1021_v48  ;;  %v991_v41 = vadd.f32 %v3781_v42, %v3771_v62  ;;  %v3860_v62 = vadd.s32 1, %v1138_v57  ;;  %v1669_v2 = vld [vmem:[#allocation2 + $0x210] sm:$0xff] }
 0x1aa   :  { %v4318_v42 = vmov 0  ;;  %v1164_v56 = vadd.s32 1, %v1140_v24 }
 0x1ab   :  { %1184 = vmatpush.msrb.mxu1 %v1135_v36  ;;  %1225 = vmatpush.msrb.mxu2 %v1135_v36  ;;  %v1124_v36 = vadd.f32 %v3799_v46, %v1003_v12  ;;  %v1120_v48 = vadd.f32 %v3777_v23, %v991_v41  ;;  %vm4243_vm0 = vcmp.eq.s32.totalorder %v3343_v5, %v3860_v62  ;;  %v1139_v23 = vmul.u32 2, %v4317_v0 }
 0x1ac   :  { %vm1172_vm8 = vcmp.eq.s32.totalorder %v3343_v5, %v1164_v56  ;;  %v1141_v46 = vmul.u32 2, %v4321_v16 }
 0x1ad   :  { %1185 = vmatpush.msrb.mxu1 %v1134_v29  ;;  %1226 = vmatpush.msrb.mxu2 %v1134_v29  ;;  %v1128_v29 = vadd.f32 %v1096_v63, %v1015_v47  ;;  %v3877_v35 = vadd.s32 1, %v1139_v23  ;;  %vm3882_vm6 = vcmp.eq.s32.totalorder %v3343_v5, %v1139_v23  ;;  %v1671_v63 = vld [vmem:[#allocation2 + $0x220] sm:$0xff]  ;;  %v1668_v47 = vld [vmem:[#allocation2 + $0x208] sm:$0xff] }
 0x1ae   :  { %v4319_v42 = vsel %vm3882_vm6, 4294967295, %v4318_v42 }
 0x1af   :  { %1186 = vmatpush.msrb.mxu1 %v1133_v52  ;;  %1227 = vmatpush.msrb.mxu2 %v1133_v52  ;;  %v4312_v52 = vmov 1.0   ;;  %vm4244_vm12 = vcmp.eq.s32.totalorder %v3343_v5, %v3877_v35 }
 0x1b1   :  { %1187 = vmatpush.msrb.mxu1 %v1132_v44  ;;  %1228 = vmatpush.msrb.mxu2 %v1132_v44  ;;  %v3824_v44 = vadd.s32 1, %v1136_v37 }
 0x1b3   :  { %1188 = vmatpush.msrb.mxu1 %v1131_v33  ;;  %1229 = vmatpush.msrb.mxu2 %v1131_v33  ;;  %v1125_v33 = vadd.f32 %v3803_v13, %v1006_v30  ;;  %vm4246_vm1 = vcmp.eq.s32.totalorder %v3343_v5, %v3824_v44  ;;  %v1165_v13 = vadd.s32 1, %v1141_v46 }
 0x1b5   :  { %1189 = vmatpush.msrb.mxu1 %v1130_v38  ;;  %1230 = vmatpush.msrb.mxu2 %v1130_v38  ;;  %v1667_v38 = vld [vmem:[#allocation2 + $0x200] sm:$0xff] }
 0x1b7   :  { %1190 = vmatpush.msrb.mxu1 %v1129_v27  ;;  %1231 = vmatpush.msrb.mxu2 %v1129_v27  ;;  %v3186_v27 = vld [vmem:[%s4188_s2] ss:$0 sm:$0xff] }
 0x1b9   :  { %1191 = vmatpush.msrb.mxu1 %v1128_v29  ;;  %1232 = vmatpush.msrb.mxu2 %v1128_v29 }
 0x1bb   :  { %1192 = vmatpush.msrb.mxu1 %v1127_v17  ;;  %1233 = vmatpush.msrb.mxu2 %v1127_v17 }
 0x1bd   :  { %1193 = vmatpush.msrb.mxu1 %v1126_v31  ;;  %1234 = vmatpush.msrb.mxu2 %v1126_v31 }
 0x1bf   :  { %1194 = vmatpush.msrb.mxu1 %v1125_v33  ;;  %1235 = vmatpush.msrb.mxu2 %v1125_v33 }
 0x1c1   :  { %1195 = vmatpush.msrb.mxu1 %v1124_v36  ;;  %1236 = vmatpush.msrb.mxu2 %v1124_v36 }
 0x1c3   :  { %1196 = vmatpush.msrb.mxu1 %v1123_v40  ;;  %1237 = vmatpush.msrb.mxu2 %v1123_v40 }
 0x1c5   :  { %1197 = vmatpush.msrb.mxu1 %v1122_v43  ;;  %1238 = vmatpush.msrb.mxu2 %v1122_v43 }
 0x1c7   :  { %1198 = vmatpush.msrb.mxu1 %v1121_v45  ;;  %1239 = vmatpush.msrb.mxu2 %v1121_v45 }
 0x1c9   :  { %1199 = vmatpush.msrb.mxu1 %v1120_v48  ;;  %1240 = vmatpush.msrb.mxu2 %v1120_v48 }
 0x1ca   :  { %3112 = vmatmul.msk.f32.vlgmr.msrb.gmra.mxu2 %vm4246_vm1, %v4312_v52  ;;  %3104 = vmatmul.msk.f32.vlgmr.msrb.gmra.mxu1 %vm3831_vm10, %v4312_v52  ;;  %vm4248_vm1 = vcmp.eq.s32.totalorder %v3444_v20, 8 }
 0x1cb   :  { %1683 = vmatpush.msra.mxu2 %v1682_v18 }
 0x1cd   :  { %1684 = vmatpush.msra.mxu2 %v1681_v21 }
 0x1cf   :  { %1685 = vmatpush.msra.mxu2 %v1680_v19 }
 0x1d1   :  { %1686 = vmatpush.msra.mxu2 %v1679_v54 }
 0x1d2   :  { %3113 = vmatmul.msk.f32.gmra.mxu2 %vm4245_vm5, %v4312_v52  ;;  %3105 = vmatmul.msk.f32.gmra.mxu1 %vm3848_vm13, %v4312_v52  ;;  %vm1149_vm5 = vcmp.eq.s32.totalorder %v3343_v5, %v1141_v46 }
 0x1d3   :  { %1687 = vmatpush.msra.mxu2 %v1678_v15 }
 0x1d5   :  { %1688 = vmatpush.msra.mxu2 %v1677_v59 }
 0x1d7   :  { %1689 = vmatpush.msra.mxu2 %v1676_v58 }
 0x1d9   :  { %1690 = vmatpush.msra.mxu2 %v1675_v11 }
 0x1da   :  { %3114 = vmatmul.msk.f32.gmra.mxu2 %vm4243_vm0, %v4312_v52  ;;  %3106 = vmatmul.msk.f32.gmra.mxu1 %vm3865_vm11, %v4312_v52  ;;  %vm1148_vm0 = vcmp.eq.s32.totalorder %v3343_v5, %v1140_v24 }
 0x1db   :  { %1691 = vmatpush.msra.mxu2 %v1674_v61 }
 0x1dd   :  { %1692 = vmatpush.msra.mxu2 %v1673_v8 }
 0x1df   :  { %1693 = vmatpush.msra.mxu2 %v1672_v7 }
 0x1e1   :  { %1694 = vmatpush.msra.mxu2 %v1671_v63 }
 0x1e2   :  { %3115 = vmatmul.msk.f32.gmra.mxu2 %vm4244_vm12, %v4312_v52  ;;  %3107 = vmatmul.msk.f32.gmra.mxu1 %vm3882_vm6, %v4312_v52  ;;  %vm1173_vm12 = vcmp.eq.s32.totalorder %v3343_v5, %v1165_v13 }
 0x1e3   :  { %1695 = vmatpush.msra.mxu2 %v1670_v25  ;;  %v1653_v25 = vld [vmem:[#allocation2 + $0x198] sm:$0xff] }
 0x1e5   :  { %1696 = vmatpush.msra.mxu2 %v1669_v2 }
 0x1e7   :  { %1697 = vmatpush.msra.mxu2 %v1668_v47 }
 0x1e9   :  { %1698 = vmatpush.msra.mxu2 %v1667_v38  ;;  %v4328_v38 = vld [vmem:[#allocation16_spill] sm:$0xff] }
 0x1ea   :  { %3116 = vmatmul.msk.f32.gmra.mxu2 %vm1172_vm8, %v4312_v52  ;;  %3108 = vmatmul.msk.f32.gmra.mxu1 %vm1148_vm0, %v4312_v52  ;;  %vm1174_vm0 = vcmp.eq.s32.totalorder %v3343_v5, %v1166_v28  ;;  %vm1150_vm8 = vcmp.eq.s32.totalorder %v3343_v5, %v1142_v9 }
 0x1f2   :  { %3117 = vmatmul.msk.f32.gmra.mxu2 %vm1173_vm12, %v4312_v52  ;;  %3109 = vmatmul.msk.f32.gmra.mxu1 %vm1149_vm5, %v4312_v52  ;;  %vm1175_vm5 = vcmp.eq.s32.totalorder %v3343_v5, %v1167_v3  ;;  %vm1151_vm12 = vcmp.eq.s32.totalorder %v3343_v5, %v1143_v26  ;;  %v4325_v26 = vld [vmem:[#allocation10_spill] sm:$0xff]  ;;  %v3277_v3 = vmov 0.0  }
 0x1f3   :  { %v1494_v2 = vsel %vm3511_vm7, 1.0, %v3277_v3  ;;  %vm4329_vm7 = vcmp.eq.s32.totalorder %v3343_v5, %v4328_v38 }
 0x1fa   :  { %3118 = vmatmul.msk.f32.gmra.mxu2 %vm1174_vm0, %v4312_v52  ;;  %3110 = vmatmul.msk.f32.gmra.mxu1 %vm1150_vm8, %v4312_v52  ;;  %vm4324_vm0 = vcmp.eq.s32.totalorder %v3322_v1, 7 }
 0x1fb   :  { %vm1478_vm8 = vmxor %vm4324_vm0, %vm3275_vm4  ;;  %vm1518_vm0 = vcmask 523264  }
 0x202   :  { %3119 = vmatmul.msk.f32.gmra.mxu2 %vm1175_vm5, %v4312_v52  ;;  %3111 = vmatmul.msk.f32.gmra.mxu1 %vm1151_vm12, %v4312_v52  ;;  %vm4326_vm5 = vcmp.eq.s32.totalorder %v3343_v5, %v4325_v26  ;;  %v1774_v26 = vld [vmem:[#allocation2 + $0x2c0] sm:$0xff] }
 0x203   :  { %vm1502_vm12 = vmand %vm4326_vm5, %vm1478_vm8 }
 0x204   :  { %v1510_v47 = vsel %vm1502_vm12, 1.0, %v3277_v3  ;;  %vm1383_vm8 = vmxor %vm4248_vm1, %vm3275_vm4  ;;  %vm4331_vm12 = vcmp.eq.s32.totalorder %v3400_v14, 23  ;;  %v4335_v14 = vld [vmem:[#allocation22_spill] sm:$0xff] }
 0x205   :  { %vm1487_vm5 = vmand %vm4329_vm7, %vm1383_vm8  ;;  %vm1321_vm8 = vcmp.eq.s32.totalorder %v4317_v0, 24  ;;  %vm4336_vm7 = vcmp.eq.s32.totalorder %v3343_v5, %v4335_v14 }
 0x206   :  { %vm1480_vm6 = vmxor %vm4331_vm12, %vm3275_vm4  ;;  %vm1347_vm12 = vcmp.eq.s32.totalorder %v4321_v16, 40 }
 0x247   :  { %v1201_v10 = vpop.f32.mrf.mxu1 }
 0x24d   :  { %v1242_v22 = vpop.f32.mrf.mxu2 }
 0x24e   :  { %v1266_v29 = vmax.f32 %v1201_v10, %v1242_v22  ;;  %v1495_v22 = vsel %vm1487_vm5, 1.0, %v3277_v3  ;;  %v1772_v10 = vld [vmem:[#allocation2 + $0x2b0] sm:$0xff] }
 0x24f   :  { %v1204_v30 = vpop.f32.mrf.mxu1 }
 0x250   :  { %v1278_v17 = vadd.f32 %v3186_v27, %v1266_v29  ;;  %v4332_v29 = vld [vmem:[#allocation15_spill] sm:$0xff] }
 0x251   :  { %vm4333_vm1 = vcmp.eq.s32.totalorder %v3343_v5, %v4332_v29  ;;  %v1650_v29 = vld [vmem:[#allocation2 + $0x180] sm:$0xff] }
 0x252   :  { %v3916_v12 = vmax.f32 %v1278_v17, 0.0  ;;  %vm1504_vm11 = vmand %vm4333_vm1, %vm1480_vm6  ;;  %v1496_v17 = vsel %vm3581_vm3, 1.0, %v3277_v3  ;;  %vm1434_vm6 = vcmp.eq.s32.totalorder %v4320_v50, 39 }
 0x253   :  { %vm1482_vm3 = vmxor %vm1434_vm6, %vm3275_vm4 }
 0x254   :  { %1699 = vmatmul.f32.vlgmr.msra.gmra.mxu2 %v3916_v12 }
 0x255   :  { %v1245_v31 = vpop.f32.mrf.mxu2 }
 0x256   :  { %v1267_v32 = vmax.f32 %v1204_v30, %v1245_v31  ;;  %v1770_v30 = vld [vmem:[#allocation2 + $0x2a0] sm:$0xff]  ;;  %v1767_v31 = vld [vmem:[#allocation2 + $0x288] sm:$0xff] }
 0x257   :  { %v1207_v33 = vpop.f32.mrf.mxu1 }
 0x258   :  { %v1279_v34 = vadd.f32 %v3186_v27, %v1267_v32  ;;  %v1513_v32 = vsel %vm3601_vm2, 1.0, %v3277_v3  ;;  %vm1387_vm2 = vmxor %vm1347_vm12, %vm3275_vm4 }
 0x25a   :  { %v1287_v36 = vmax.f32 %v1279_v34, 0.0  ;;  %v4338_v34 = vld [vmem:[#allocation25_spill] sm:$0xff] }
 0x25c   :  { %1702 = vmatmul.f32.gmra.mxu2 %v1287_v36 }
 0x25d   :  { %v1248_v37 = vpop.f32.mrf.mxu2 }
 0x25e   :  { %v1268_v39 = vmax.f32 %v1207_v33, %v1248_v37 }
 0x25f   :  { %v1210_v40 = vpop.f32.mrf.mxu1 }
 0x260   :  { %v1280_v41 = vadd.f32 %v3186_v27, %v1268_v39  ;;  %v4341_v39 = vld [vmem:[#allocation28_spill] sm:$0xff] }
 0x262   :  { %v1288_v43 = vmax.f32 %v1280_v41, 0.0 }
 0x264   :  { %1705 = vmatmul.f32.gmra.mxu2 %v1288_v43 }
 0x265   :  { %v1251_v45 = vpop.f32.mrf.mxu2 }
 0x266   :  { %v1269_v48 = vmax.f32 %v1210_v40, %v1251_v45  ;;  %v1515_v40 = vsel %vm3647_vm15, 1.0, %v3277_v3 }
 0x267   :  { %v1213_v51 = vpop.f32.mrf.mxu1 }
 0x268   :  { %v1281_v52 = vadd.f32 %v3186_v27, %v1269_v48 }
 0x26a   :  { %v1289_v57 = vmax.f32 %v1281_v52, 0.0  ;;  %v4350_v52 = vld [vmem:[#allocation35_spill] sm:$0xff] }
 0x26c   :  { %1708 = vmatmul.f32.gmra.mxu2 %v1289_v57 }
 0x26d   :  { %v1254_v23 = vpop.f32.mrf.mxu2 }
 0x26e   :  { %v1270_v24 = vmax.f32 %v1213_v51, %v1254_v23  ;;  %v4348_v51 = vld [vmem:[#allocation34_spill] sm:$0xff]  ;;  %v1665_v23 = vld [vmem:[#allocation2 + $0x1f8] sm:$0xff] }
 0x26f   :  { %v1216_v18 = vpop.f32.mrf.mxu1  ;;  %vm4349_vm12 = vcmp.eq.s32.totalorder %v3343_v5, %v4348_v51 }
 0x270   :  { %v1282_v21 = vadd.f32 %v3186_v27, %v1270_v24  ;;  %v1664_v24 = vld [vmem:[#allocation2 + $0x1f0] sm:$0xff] }
 0x272   :  { %v1290_v56 = vmax.f32 %v1282_v21, 0.0  ;;  %v1662_v21 = vld [vmem:[#allocation2 + $0x1e0] sm:$0xff] }
 0x274   :  { %1711 = vmatmul.f32.gmra.mxu2 %v1290_v56 }
 0x275   :  { %v1257_v19 = vpop.f32.mrf.mxu2 }
 0x276   :  { %v1271_v54 = vmax.f32 %v1216_v18, %v1257_v19  ;;  %v1663_v18 = vld [vmem:[#allocation2 + $0x1e8] sm:$0xff]  ;;  %v1781_v19 = vld [vmem:[#allocation2 + $0x2f8] sm:$0xff] }
 0x277   :  { %v1219_v15 = vpop.f32.mrf.mxu1  ;;  %1782 = vmatpush.msra.mxu0 %v1781_v19 }
 0x278   :  { %v1283_v46 = vadd.f32 %v3186_v27, %v1271_v54  ;;  %v1660_v54 = vld [vmem:[#allocation2 + $0x1d0] sm:$0xff] }
 0x27a   :  { %v1291_v59 = vmax.f32 %v1283_v46, 0.0  ;;  %v1780_v46 = vld [vmem:[#allocation2 + $0x2f0] sm:$0xff] }
 0x27b   :  { %1783 = vmatpush.msra.mxu0 %v1780_v46 }
 0x27c   :  { %1714 = vmatmul.f32.gmra.mxu2 %v1291_v59 }
 0x27d   :  { %v1260_v13 = vpop.f32.mrf.mxu2 }
 0x27e   :  { %v1272_v58 = vmax.f32 %v1219_v15, %v1260_v13  ;;  %v1659_v15 = vld [vmem:[#allocation2 + $0x1c8] sm:$0xff]  ;;  %v1658_v13 = vld [vmem:[#allocation2 + $0x1c0] sm:$0xff] }
 0x27f   :  { %v1222_v61 = vpop.f32.mrf.mxu1 }
 0x280   :  { %v1284_v11 = vadd.f32 %v3186_v27, %v1272_v58  ;;  %v1778_v58 = vld [vmem:[#allocation2 + $0x2e0] sm:$0xff] }
 0x282   :  { %v1292_v9 = vmax.f32 %v1284_v11, 0.0  ;;  %v1657_v11 = vld [vmem:[#allocation2 + $0x1b8] sm:$0xff] }
 0x284   :  { %1717 = vmatmul.f32.gmra.mxu2 %v1292_v9 }
 0x285   :  { %v1263_v8 = vpop.f32.mrf.mxu2 }
 0x286   :  { %v1273_v28 = vmax.f32 %v1222_v61, %v1263_v8  ;;  %v1656_v61 = vld [vmem:[#allocation2 + $0x1b0] sm:$0xff] }
 0x287   :  { %v1776_v8 = vld [vmem:[#allocation2 + $0x2d0] sm:$0xff] }
 0x288   :  { %v1285_v7 = vadd.f32 %v3186_v27, %v1273_v28  ;;  %v1511_v27 = vsel %vm3557_vm9, 1.0, %v3277_v3  ;;  %vm1385_vm9 = vmxor %vm1321_vm8, %vm3275_vm4  ;;  %v1655_v28 = vld [vmem:[#allocation2 + $0x1a8] sm:$0xff] }
 0x289   :  { %vm1489_vm1 = vmand %vm4336_vm7, %vm1385_vm9  ;;  %vm4342_vm9 = vcmp.eq.s32.totalorder %v3343_v5, %v4341_v39 }
 0x28a   :  { %v1293_v63 = vmax.f32 %v1285_v7, 0.0  ;;  %v1497_v33 = vsel %vm1489_vm1, 1.0, %v3277_v3  ;;  %vm1491_vm7 = vmand %vm4342_vm9, %vm1387_vm2  ;;  %vm1460_vm1 = vcmp.eq.s32.totalorder %v4322_v60, 55  ;;  %v4346_v60 = vld [vmem:[#allocation33_spill] sm:$0xff]  ;;  %vm4351_vm9 = vnez %v4350_v52  ;;  %v1775_v7 = vld [vmem:[#allocation2 + $0x2c8] sm:$0xff] }
 0x28b   :  { %v1499_v41 = vsel %vm1491_vm7, 1.0, %v3277_v3  ;;  %vm4352_vm7 = vcmp.eq.s32.totalorder %v3343_v5, %v3824_v44  ;;  %v1153_v44 = vsel %vm3848_vm13, 1.0, %v3277_v3  ;;  %vm4356_vm13 = vcmp.eq.s32.totalorder %v3343_v5, %v3877_v35  ;;  %v2153_v35 = vld [vmem:[#allocation2 + $0x3d0] sm:$0xff] }
 0x28c   :  { %1551 = vmatpush.msrb.mxu3 %v1293_v63  ;;  %1616 = vmatpush.msra.mxu1 %v1293_v63 }
 0x28d   :  { %1720 = vmatmul.f32.gmra.mxu2 %v1293_v63  ;;  %v1654_v63 = vld [vmem:[#allocation2 + $0x1a0] sm:$0xff] }
 0x28e   :  { %1552 = vmatpush.msrb.mxu3 %v1292_v9  ;;  %1617 = vmatpush.msra.mxu1 %v1292_v9  ;;  %v1777_v9 = vld [vmem:[#allocation2 + $0x2d8] sm:$0xff] }
 0x290   :  { %1553 = vmatpush.msrb.mxu3 %v1291_v59  ;;  %1618 = vmatpush.msra.mxu1 %v1291_v59  ;;  %v1779_v59 = vld [vmem:[#allocation2 + $0x2e8] sm:$0xff] }
 0x291   :  { %1784 = vmatpush.msra.mxu0 %v1779_v59 }
 0x292   :  { %1554 = vmatpush.msrb.mxu3 %v1290_v56  ;;  %1619 = vmatpush.msra.mxu1 %v1290_v56  ;;  %v1661_v56 = vld [vmem:[#allocation2 + $0x1d8] sm:$0xff] }
 0x293   :  { %1785 = vmatpush.msra.mxu0 %v1778_v58 }
 0x294   :  { %1555 = vmatpush.msrb.mxu3 %v1289_v57  ;;  %1620 = vmatpush.msra.mxu1 %v1289_v57 }
 0x295   :  { %1786 = vmatpush.msra.mxu0 %v1777_v9 }
 0x296   :  { %1556 = vmatpush.msrb.mxu3 %v1288_v43  ;;  %1621 = vmatpush.msra.mxu1 %v1288_v43  ;;  %v4344_v43 = vld [vmem:[#allocation31_spill] sm:$0xff] }
 0x297   :  { %vm4345_vm6 = vcmp.eq.s32.totalorder %v3343_v5, %v4344_v43  ;;  %1787 = vmatpush.msra.mxu0 %v1776_v8 }
 0x298   :  { %1557 = vmatpush.msrb.mxu3 %v1287_v36  ;;  %1622 = vmatpush.msra.mxu1 %v1287_v36  ;;  %v1498_v36 = vsel %vm3622_vm14, 1.0, %v3277_v3  ;;  %vm1484_vm14 = vmxor %vm1460_vm1, %vm3275_vm4  ;;  %vm4353_vm1 = vcmp.eq.s32.totalorder %v3343_v5, %v3843_v53  ;;  %v1179_v53 = vsel %vm4356_vm13, 1.0, %v3277_v3 }
 0x299   :  { %1788 = vmatpush.msra.mxu0 %v1775_v7 }
 0x29a   :  { %1558 = vmatpush.msrb.mxu3 %v3916_v12  ;;  %1623 = vmatpush.msra.mxu1 %v3916_v12  ;;  %v1512_v12 = vsel %vm1504_vm11, 1.0, %v3277_v3  ;;  %vm4339_vm11 = vcmp.eq.s32.totalorder %v3343_v5, %v4338_v34 }
 0x29b   :  { %3120 = vmatmul.msk.f32.vlgmr.msrb.gmra.mxu3 %vm1518_vm0, %v1494_v2  ;;  %3128 = vmatmul.msk.f32.vlgmr.msra.gmra.mxu1 %vm1518_vm0, %v1510_v47  ;;  %vm1506_vm5 = vmand %vm4339_vm11, %vm1482_vm3  ;;  %vm1373_vm11 = vcmp.eq.s32.totalorder %v4323_v4, 56  ;;  %v1517_v4 = vsel %vm4351_vm9, 1.0, %v3277_v3  ;;  %v1773_v2 = vld [vmem:[#allocation2 + $0x2b8] sm:$0xff]  ;;  %v1652_v47 = vld [vmem:[#allocation2 + $0x190] sm:$0xff]  ;;  %vm4363_vm9 = vcmp.eq.s32.totalorder %v3343_v5, %v4328_v38 }
 0x29c   :  { %v1514_v37 = vsel %vm1506_vm5, 1.0, %v3277_v3  ;;  %vm1508_vm3 = vmand %vm4345_vm6, %vm1484_vm14  ;;  %vm4347_vm5 = vnez %v4346_v60  ;;  %1724 = vmatpush.msra.mxu3 %v1665_v23  ;;  %1789 = vmatpush.msra.mxu0 %v1774_v26  ;;  %vm4355_vm14 = vnez %v4316_v6  ;;  %vm4357_vm6 = vnez %v4319_v42  ;;  %v2157_v6 = vld [vmem:[#allocation2 + $0x3f0] sm:$0xff]  ;;  %v2151_v42 = vld [vmem:[#allocation2 + $0x3c0] sm:$0xff] }
 0x29d   :  { %v1500_v45 = vsel %vm4347_vm5, 1.0, %v3277_v3  ;;  %v1516_v48 = vsel %vm1508_vm3, 1.0, %v3277_v3  ;;  %vm1389_vm15 = vmxor %vm1373_vm11, %vm3275_vm4  ;;  %v1155_v55 = vsel %vm4357_vm6, 1.0, %v3277_v3  ;;  %vm4358_vm3 = vcmp.eq.s32.totalorder %v3444_v20, 8  ;;  %v2136_v38 = vld [vmem:[#allocation2 + $0x350] sm:$0xff] }
 0x29e   :  { %vm1493_vm2 = vmand %vm4349_vm12, %vm1389_vm15  ;;  %1725 = vmatpush.msra.mxu3 %v1664_v24  ;;  %1790 = vmatpush.msra.mxu0 %v1773_v2  ;;  %vm2042_vm12 = vcmask 261120  }
 0x29f   :  { %v1501_v57 = vsel %vm1493_vm2, 1.0, %v3277_v3 }
 0x2a0   :  { %1726 = vmatpush.msra.mxu3 %v1663_v18  ;;  %1791 = vmatpush.msra.mxu0 %v1772_v10 }
 0x2a2   :  { %1727 = vmatpush.msra.mxu3 %v1662_v21 }
 0x2a3   :  { %3121 = vmatmul.msk.f32.gmra.mxu3 %vm1518_vm0, %v1495_v22  ;;  %3129 = vmatmul.msk.f32.gmra.mxu1 %vm1518_vm0, %v1511_v27  ;;  %v1651_v27 = vld [vmem:[#allocation2 + $0x188] sm:$0xff] }
 0x2a4   :  { %1728 = vmatpush.msra.mxu3 %v1661_v56  ;;  %v1771_v22 = vld [vmem:[#allocation2 + $0x2a8] sm:$0xff] }
 0x2a5   :  { %1792 = vmatpush.msra.mxu0 %v1771_v22 }
 0x2a6   :  { %1729 = vmatpush.msra.mxu3 %v1660_v54 }
 0x2a7   :  { %1793 = vmatpush.msra.mxu0 %v1770_v30 }
 0x2a8   :  { %1730 = vmatpush.msra.mxu3 %v1659_v15 }
 0x2aa   :  { %1731 = vmatpush.msra.mxu3 %v1658_v13 }
 0x2ab   :  { %3122 = vmatmul.msk.f32.gmra.mxu3 %vm1518_vm0, %v1496_v17  ;;  %3130 = vmatmul.msk.f32.gmra.mxu1 %vm1518_vm0, %v1512_v12  ;;  %v1769_v17 = vld [vmem:[#allocation2 + $0x298] sm:$0xff]  ;;  %v1768_v12 = vld [vmem:[#allocation2 + $0x290] sm:$0xff] }
 0x2ac   :  { %1732 = vmatpush.msra.mxu3 %v1657_v11  ;;  %1794 = vmatpush.msra.mxu0 %v1769_v17 }
 0x2ae   :  { %1733 = vmatpush.msra.mxu3 %v1656_v61  ;;  %1795 = vmatpush.msra.mxu0 %v1768_v12 }
 0x2b0   :  { %1734 = vmatpush.msra.mxu3 %v1655_v28  ;;  %1796 = vmatpush.msra.mxu0 %v1767_v31 }
 0x2b2   :  { %1735 = vmatpush.msra.mxu3 %v1654_v63 }
 0x2b3   :  { %3123 = vmatmul.msk.f32.gmra.mxu3 %vm1518_vm0, %v1497_v33  ;;  %3131 = vmatmul.msk.f32.gmra.mxu1 %vm1518_vm0, %v1513_v32  ;;  %v1766_v32 = vld [vmem:[#allocation2 + $0x280] sm:$0xff] }
 0x2b4   :  { %1736 = vmatpush.msra.mxu3 %v1653_v25  ;;  %1797 = vmatpush.msra.mxu0 %v1766_v32 }
 0x2b6   :  { %1737 = vmatpush.msra.mxu3 %v1652_v47 }
 0x2b8   :  { %1738 = vmatpush.msra.mxu3 %v1651_v27 }
 0x2ba   :  { %1739 = vmatpush.msra.mxu3 %v1650_v29 }
 0x2bb   :  { %3124 = vmatmul.msk.f32.gmra.mxu3 %vm1518_vm0, %v1498_v36  ;;  %3132 = vmatmul.msk.f32.gmra.mxu1 %vm1518_vm0, %v1514_v37 }
 0x2c3   :  { %3125 = vmatmul.msk.f32.gmra.mxu3 %vm1518_vm0, %v1499_v41  ;;  %3133 = vmatmul.msk.f32.gmra.mxu1 %vm1518_vm0, %v1515_v40 }
 0x2cb   :  { %3126 = vmatmul.msk.f32.gmra.mxu3 %vm1518_vm0, %v1500_v45  ;;  %3134 = vmatmul.msk.f32.gmra.mxu1 %vm1518_vm0, %v1516_v48 }
 0x2d3   :  { %3127 = vmatmul.msk.f32.gmra.mxu3 %vm1518_vm0, %v1501_v57  ;;  %3135 = vmatmul.msk.f32.gmra.mxu1 %vm1518_vm0, %v1517_v4 }
 0x2d7   :  { %v1700_v57 = vpop.f32.mrf.mxu2 }
 0x2df   :  { %v1703_v24 = vpop.f32.mrf.mxu2 }
 0x2e7   :  { %v1706_v56 = vpop.f32.mrf.mxu2 }
 0x2ef   :  { %v1709_v46 = vpop.f32.mrf.mxu2 }
 0x2f7   :  { %v1712_v58 = vpop.f32.mrf.mxu2 }
 0x2ff   :  { %v1715_v61 = vpop.f32.mrf.mxu2 }
 0x307   :  { %v1718_v7 = vpop.f32.mrf.mxu2 }
 0x310   :  { %v1721_v25 = vpop.f32.mrf.mxu2 }
 0x318   :  { %v1625_v33 = vpop.f32.mrf.mxu1 }
 0x319   :  { %1798 = vmatmul.f32.vlgmr.msra.gmra.mxu0 %v1625_v33 }
 0x31e   :  { %v1560_v34 = vpop.f32.mrf.mxu3 }
 0x31f   :  { %1740 = vmatmul.f32.vlgmr.msra.gmra.mxu3 %v1560_v34 }
 0x320   :  { %v1628_v50 = vpop.f32.mrf.mxu1 }
 0x321   :  { %1801 = vmatmul.f32.gmra.mxu0 %v1628_v50 }
 0x326   :  { %v1563_v36 = vpop.f32.mrf.mxu3 }
 0x327   :  { %1743 = vmatmul.f32.gmra.mxu3 %v1563_v36 }
 0x328   :  { %v1631_v37 = vpop.f32.mrf.mxu1 }
 0x329   :  { %1804 = vmatmul.f32.gmra.mxu0 %v1631_v37 }
 0x32e   :  { %v1566_v39 = vpop.f32.mrf.mxu3 }
 0x32f   :  { %1746 = vmatmul.f32.gmra.mxu3 %v1566_v39 }
 0x330   :  { %v1634_v16 = vpop.f32.mrf.mxu1 }
 0x331   :  { %1807 = vmatmul.f32.gmra.mxu0 %v1634_v16  ;;  %v1176_v16 = vsel %vm4352_vm7, 1.0, %v3277_v3 }
 0x336   :  { %v1569_v40 = vpop.f32.mrf.mxu3 }
 0x337   :  { %1749 = vmatmul.f32.gmra.mxu3 %v1569_v40  ;;  %v1152_v40 = vsel %vm3831_vm10, 1.0, %v3277_v3  ;;  %vm4354_vm10 = vcmp.eq.s32.totalorder %v3343_v5, %v3860_v62  ;;  %v2158_v62 = vld [vmem:[#allocation2 + $0x3f8] sm:$0xff] }
 0x338   :  { %v1637_v41 = vpop.f32.mrf.mxu1  ;;  %v1178_v49 = vsel %vm4354_vm10, 1.0, %v3277_v3  ;;  %vm1969_vm10 = vcmp.eq.s32.totalorder %v4317_v0, 28  ;;  %v2132_v0 = vld [vmem:[#allocation2 + $0x330] sm:$0xff] }
 0x339   :  { %1810 = vmatmul.f32.gmra.mxu0 %v1637_v41 }
 0x33e   :  { %v1572_v43 = vpop.f32.mrf.mxu3 }
 0x33f   :  { %1752 = vmatmul.f32.gmra.mxu3 %v1572_v43  ;;  %v1177_v43 = vsel %vm4353_vm1, 1.0, %v3277_v3 }
 0x340   :  { %v1640_v60 = vpop.f32.mrf.mxu1 }
 0x341   :  { %1813 = vmatmul.f32.gmra.mxu0 %v1640_v60  ;;  %v1154_v60 = vsel %vm4355_vm14, 1.0, %v3277_v3  ;;  %vm1973_vm14 = vmor %vm1321_vm8, %vm1969_vm10  ;;  %vm4370_vm8 = vcmp.eq.s32.totalorder %v3343_v5, %v4335_v14  ;;  %v2128_v14 = vld [vmem:[#allocation2 + $0x310] sm:$0xff] }
 0x346   :  { %v1575_v45 = vpop.f32.mrf.mxu3 }
 0x347   :  { %1755 = vmatmul.f32.gmra.mxu3 %v1575_v45  ;;  %v2156_v45 = vld [vmem:[#allocation2 + $0x3e8] sm:$0xff] }
 0x348   :  { %v1643_v48 = vpop.f32.mrf.mxu1 }
 0x349   :  { %1816 = vmatmul.f32.gmra.mxu0 %v1643_v48  ;;  %v2155_v48 = vld [vmem:[#allocation2 + $0x3e0] sm:$0xff] }
 0x34e   :  { %v1578_v51 = vpop.f32.mrf.mxu3 }
 0x34f   :  { %1758 = vmatmul.f32.gmra.mxu3 %v1578_v51  ;;  %v2154_v51 = vld [vmem:[#allocation2 + $0x3d8] sm:$0xff] }
 0x350   :  { %v1646_v52 = vpop.f32.mrf.mxu1 }
 0x351   :  { %1819 = vmatmul.f32.gmra.mxu0 %v1646_v52  ;;  %v2152_v52 = vld [vmem:[#allocation2 + $0x3c8] sm:$0xff] }
 0x356   :  { %v1581_v4 = vpop.f32.mrf.mxu3 }
 0x357   :  { %1761 = vmatmul.f32.gmra.mxu3 %v1581_v4  ;;  %v2150_v4 = vld [vmem:[#allocation2 + $0x3b8] sm:$0xff] }
 0x396   :  { %v1799_v23 = vpop.f32.mrf.mxu0 }
 0x39e   :  { %v1802_v18 = vpop.f32.mrf.mxu0 }
 0x3a2   :  { %v1741_v21 = vpop.f32.mrf.mxu3 }
 0x3a3   :  { %v1742_v36 = vadd.f32 %v1741_v21, %v1700_v57  ;;  %v2149_v57 = vld [vmem:[#allocation2 + $0x3b0] sm:$0xff] }
 0x3a4   :  { %v2145_v21 = vld [vmem:[#allocation2 + $0x390] sm:$0xff] }
 0x3a5   :  { %v1823_v41 = vadd.f32 %v1799_v23, %v1742_v36  ;;  %v2148_v23 = vld [vmem:[#allocation2 + $0x3a8] sm:$0xff]  ;;  %v2230_v36 = vld [vmem:[#allocation2 + $0x460] sm:$0xff] }
 0x3a6   :  { %v1805_v19 = vpop.f32.mrf.mxu0 }
 0x3aa   :  { %v1744_v54 = vpop.f32.mrf.mxu3 }
 0x3ab   :  { %v1745_v34 = vadd.f32 %v1744_v54, %v1703_v24  ;;  %v2147_v24 = vld [vmem:[#allocation2 + $0x3a0] sm:$0xff] }
 0x3ad   :  { %v1824_v39 = vadd.f32 %v1802_v18, %v1745_v34  ;;  %v2146_v18 = vld [vmem:[#allocation2 + $0x398] sm:$0xff] }
 0x3ae   :  { %v1808_v59 = vpop.f32.mrf.mxu0 }
 0x3b2   :  { %v1747_v15 = vpop.f32.mrf.mxu3 }
 0x3b3   :  { %v1748_v32 = vadd.f32 %v1747_v15, %v1706_v56  ;;  %v2144_v56 = vld [vmem:[#allocation2 + $0x388] sm:$0xff] }
 0x3b5   :  { %v1825_v37 = vadd.f32 %v1805_v19, %v1748_v32  ;;  %v2143_v19 = vld [vmem:[#allocation2 + $0x380] sm:$0xff] }
 0x3b6   :  { %v1811_v11 = vpop.f32.mrf.mxu0 }
 0x3ba   :  { %v1750_v13 = vpop.f32.mrf.mxu3 }
 0x3bb   :  { %v1751_v12 = vadd.f32 %v1750_v13, %v1709_v46  ;;  %v3187_v46 = vld [vmem:[%s4188_s2 + $0x1] ss:$0 sm:$0xff] }
 0x3bd   :  { %v1826_v50 = vadd.f32 %v1808_v59, %v1751_v12  ;;  %v2231_v12 = vld [vmem:[#allocation2 + $0x468] sm:$0xff] }
 0x3be   :  { %v1814_v8 = vpop.f32.mrf.mxu0 }
 0x3c2   :  { %v1753_v9 = vpop.f32.mrf.mxu3 }
 0x3c3   :  { %v1754_v30 = vadd.f32 %v1753_v9, %v1712_v58 }
 0x3c5   :  { %v1827_v33 = vadd.f32 %v1811_v11, %v1754_v30  ;;  %v2233_v30 = vld [vmem:[#allocation2 + $0x478] sm:$0xff] }
 0x3c6   :  { %v1817_v63 = vpop.f32.mrf.mxu0  ;;  %2234 = vmatpush.msrb.mxu0 %v2233_v30  ;;  %v2361_v30 = vld [vmem:[#allocation2 + $0x528] sm:$0xff] }
 0x3ca   :  { %v1756_v28 = vpop.f32.mrf.mxu3 }
 0x3cb   :  { %v1757_v22 = vadd.f32 %v1756_v28, %v1715_v61 }
 0x3cd   :  { %v1828_v31 = vadd.f32 %v1814_v8, %v1757_v22 }
 0x3ce   :  { %v1820_v47 = vpop.f32.mrf.mxu0 }
 0x3d2   :  { %v1759_v26 = vpop.f32.mrf.mxu3 }
 0x3d3   :  { %v1760_v10 = vadd.f32 %v1759_v26, %v1718_v7 }
 0x3d5   :  { %v1829_v17 = vadd.f32 %v1817_v63, %v1760_v10 }
 0x3da   :  { %v1762_v2 = vpop.f32.mrf.mxu3 }
 0x3db   :  { %v1763_v27 = vadd.f32 %v1762_v2, %v1721_v25 }
 0x3dd   :  { %v1830_v29 = vadd.f32 %v1820_v47, %v1763_v27 }
 0x3df   :  { %1851 = vmatpush.msrb.mxu1 %v1830_v29  ;;  %1892 = vmatpush.msrb.mxu2 %v1830_v29 }
 0x3e1   :  { %1852 = vmatpush.msrb.mxu1 %v1829_v17  ;;  %1893 = vmatpush.msrb.mxu2 %v1829_v17  ;;  %v2232_v17 = vld [vmem:[#allocation2 + $0x470] sm:$0xff] }
 0x3e2   :  { %2235 = vmatpush.msrb.mxu0 %v2232_v17 }
 0x3e3   :  { %1853 = vmatpush.msrb.mxu1 %v1828_v31  ;;  %1894 = vmatpush.msrb.mxu2 %v1828_v31  ;;  %v4359_v31 = vld [vmem:[#allocation9_spill] sm:$0xff] }
 0x3e4   :  { %vm4360_vm5 = vnez %v4359_v31  ;;  %2236 = vmatpush.msrb.mxu0 %v2231_v12 }
 0x3e5   :  { %1854 = vmatpush.msrb.mxu1 %v1827_v33  ;;  %1895 = vmatpush.msrb.mxu2 %v1827_v33  ;;  %v4060_v32 = vsel %vm4360_vm5, 1.0, %v3277_v3  ;;  %v4361_v33 = vld [vmem:[#allocation11_spill] sm:$0xff] }
 0x3e6   :  { %vm4362_vm15 = vnez %v4361_v33  ;;  %2237 = vmatpush.msrb.mxu0 %v2230_v36  ;;  %v2360_v33 = vld [vmem:[#allocation2 + $0x520] sm:$0xff]  ;;  %v2358_v36 = vld [vmem:[#allocation2 + $0x510] sm:$0xff] }
 0x3e7   :  { %1855 = vmatpush.msrb.mxu1 %v1826_v50  ;;  %1896 = vmatpush.msrb.mxu2 %v1826_v50  ;;  %v4065_v34 = vsel %vm4362_vm15, 1.0, %v3277_v3  ;;  %v2141_v50 = vld [vmem:[#allocation2 + $0x378] sm:$0xff] }
 0x3e9   :  { %1856 = vmatpush.msrb.mxu1 %v1825_v37  ;;  %1897 = vmatpush.msrb.mxu2 %v1825_v37  ;;  %v2229_v37 = vld [vmem:[#allocation2 + $0x458] sm:$0xff] }
 0x3ea   :  { %2238 = vmatpush.msrb.mxu0 %v2229_v37  ;;  %v2356_v37 = vld [vmem:[#allocation2 + $0x500] sm:$0xff] }
 0x3eb   :  { %1857 = vmatpush.msrb.mxu1 %v1824_v39  ;;  %1898 = vmatpush.msrb.mxu2 %v1824_v39  ;;  %v2139_v39 = vld [vmem:[#allocation2 + $0x368] sm:$0xff] }
 0x3ed   :  { %1858 = vmatpush.msrb.mxu1 %v1823_v41  ;;  %1899 = vmatpush.msrb.mxu2 %v1823_v41  ;;  %v2227_v41 = vld [vmem:[#allocation2 + $0x448] sm:$0xff] }
 0x3ee   :  { %3140 = vmatmul.msk.f32.vlgmr.msrb.gmra.mxu2 %vm1518_vm0, %v1176_v16  ;;  %3136 = vmatmul.msk.f32.vlgmr.msrb.gmra.mxu1 %vm1518_vm0, %v1152_v40  ;;  %v2228_v16 = vld [vmem:[#allocation2 + $0x450] sm:$0xff]  ;;  %v2138_v40 = vld [vmem:[#allocation2 + $0x360] sm:$0xff] }
 0x3ef   :  { %2159 = vmatpush.msra.mxu2 %v2158_v62  ;;  %2239 = vmatpush.msrb.mxu0 %v2228_v16  ;;  %v2135_v62 = vld [vmem:[#allocation2 + $0x348] sm:$0xff] }
 0x3f1   :  { %2160 = vmatpush.msra.mxu2 %v2157_v6  ;;  %2240 = vmatpush.msrb.mxu0 %v2227_v41  ;;  %v2224_v6 = vld [vmem:[#allocation2 + $0x430] sm:$0xff] }
 0x3f3   :  { %2161 = vmatpush.msra.mxu2 %v2156_v45  ;;  %v2134_v45 = vld [vmem:[#allocation2 + $0x340] sm:$0xff] }
 0x3f5   :  { %2162 = vmatpush.msra.mxu2 %v2155_v48  ;;  %v2223_v48 = vld [vmem:[#allocation2 + $0x428] sm:$0xff] }
 0x3f6   :  { %3141 = vmatmul.msk.f32.gmra.mxu2 %vm1518_vm0, %v1177_v43  ;;  %3137 = vmatmul.msk.f32.gmra.mxu1 %vm1518_vm0, %v1153_v44  ;;  %v4364_v44 = vld [vmem:[#allocation13_spill] sm:$0xff] }
 0x3f7   :  { %2163 = vmatpush.msra.mxu2 %v2154_v51  ;;  %vm4365_vm1 = vnez %v4364_v44  ;;  %v4366_v51 = vld [vmem:[#allocation12_spill] sm:$0xff]  ;;  %v3188_v44 = vld [vmem:[%s4188_s2 + $0x2] ss:$0 sm:$0xff] }
 0x3f8   :  { %vm4367_vm13 = vnez %v4366_v51 }
 0x3f9   :  { %2164 = vmatpush.msra.mxu2 %v2153_v35  ;;  %v4093_v35 = vsel %vm4367_vm13, 1.0, %v3277_v3 }
 0x3fb   :  { %2165 = vmatpush.msra.mxu2 %v2152_v52  ;;  %v4368_v52 = vld [vmem:[#allocation18_spill] sm:$0xff] }
 0x3fc   :  { %vm4369_vm6 = vnez %v4368_v52 }
 0x3fd   :  { %2166 = vmatpush.msra.mxu2 %v2151_v42  ;;  %v4098_v42 = vsel %vm4369_vm6, 1.0, %v3277_v3 }
 0x3fe   :  { %3142 = vmatmul.msk.f32.gmra.mxu2 %vm1518_vm0, %v1178_v49  ;;  %3138 = vmatmul.msk.f32.gmra.mxu1 %vm1518_vm0, %v1154_v60  ;;  %v4081_v49 = vsel %vm4365_vm1, 1.0, %v3277_v3  ;;  %v2137_v60 = vld [vmem:[#allocation2 + $0x358] sm:$0xff] }
 0x3ff   :  { %2167 = vmatpush.msra.mxu2 %v2150_v4  ;;  %v2133_v4 = vld [vmem:[#allocation2 + $0x338] sm:$0xff] }
 0x401   :  { %2168 = vmatpush.msra.mxu2 %v2149_v57  ;;  %v2131_v57 = vld [vmem:[#allocation2 + $0x328] sm:$0xff] }
 0x403   :  { %2169 = vmatpush.msra.mxu2 %v2148_v23  ;;  %v2130_v23 = vld [vmem:[#allocation2 + $0x320] sm:$0xff] }
 0x405   :  { %2170 = vmatpush.msra.mxu2 %v2147_v24 }
 0x406   :  { %3143 = vmatmul.msk.f32.gmra.mxu2 %vm1518_vm0, %v1179_v53  ;;  %3139 = vmatmul.msk.f32.gmra.mxu1 %vm1518_vm0, %v1155_v55  ;;  %vm1943_vm0 = vcmp.eq.s32.totalorder %v3444_v20, 12  ;;  %v2140_v20 = vld [vmem:[#allocation2 + $0x370] sm:$0xff]  ;;  %v2226_v53 = vld [vmem:[#allocation2 + $0x440] sm:$0xff]  ;;  %v2225_v55 = vld [vmem:[#allocation2 + $0x438] sm:$0xff] }
 0x407   :  { %2171 = vmatpush.msra.mxu2 %v2146_v18  ;;  %vm1947_vm11 = vmor %vm4358_vm3, %vm1943_vm0  ;;  %2241 = vmatpush.msrb.mxu0 %v2226_v53  ;;  %v4371_v18 = vld [vmem:[#allocation20_spill] sm:$0xff] }
 0x408   :  { %vm1975_vm2 = vmxor %vm1947_vm11, %vm3275_vm4 }
 0x409   :  { %2172 = vmatpush.msra.mxu2 %v2145_v21  ;;  %vm2027_vm7 = vmand %vm4363_vm9, %vm1975_vm2  ;;  %2242 = vmatpush.msrb.mxu0 %v2225_v55 }
 0x40a   :  { %v4076_v43 = vsel %vm2027_vm7, 1.0, %v3277_v3  ;;  %vm1977_vm0 = vmxor %vm1973_vm14, %vm3275_vm4  ;;  %vm4372_vm4 = vnez %v4371_v18 }
 0x40b   :  { %2173 = vmatpush.msra.mxu2 %v2144_v56  ;;  %2243 = vmatpush.msrb.mxu0 %v2224_v6  ;;  %vm2029_vm3 = vmand %vm4370_vm8, %vm1977_vm0  ;;  %v4114_v21 = vsel %vm4372_vm4, 1.0, %v3277_v3  ;;  %v2129_v56 = vld [vmem:[#allocation2 + $0x318] sm:$0xff] }
 0x40c   :  { %v4109_v24 = vsel %vm2029_vm3, 1.0, %v3277_v3 }
 0x40d   :  { %2174 = vmatpush.msra.mxu2 %v2143_v19  ;;  %2244 = vmatpush.msrb.mxu0 %v2223_v48  ;;  %v2127_v19 = vld [vmem:[#allocation2 + $0x308] sm:$0xff] }
 0x46b   :  { %v1860_v54 = vpop.f32.mrf.mxu1 }
 0x471   :  { %v1901_v15 = vpop.f32.mrf.mxu2 }
 0x472   :  { %v1913_v59 = vmax.f32 %v1860_v54, %v1901_v15  ;;  %v2126_v54 = vld [vmem:[#allocation2 + $0x300] sm:$0xff]  ;;  %v2221_v15 = vld [vmem:[#allocation2 + $0x418] sm:$0xff] }
 0x473   :  { %v1863_v13 = vpop.f32.mrf.mxu1 }
 0x474   :  { %v1922_v58 = vadd.f32 %v3187_v46, %v1913_v59  ;;  %v2220_v59 = vld [vmem:[#allocation2 + $0x410] sm:$0xff] }
 0x476   :  { %v1926_v11 = vmax.f32 %v1922_v58, 0.0  ;;  %v2218_v58 = vld [vmem:[#allocation2 + $0x400] sm:$0xff] }
 0x478   :  { %2175 = vmatmul.f32.vlgmr.msra.gmra.mxu2 %v1926_v11 }
 0x479   :  { %v1904_v9 = vpop.f32.mrf.mxu2 }
 0x47a   :  { %v1914_v61 = vmax.f32 %v1863_v13, %v1904_v9  ;;  %v2219_v13 = vld [vmem:[#allocation2 + $0x408] sm:$0xff]  ;;  %v2370_v9 = vld [vmem:[#allocation2 + $0x570] sm:$0xff] }
 0x47b   :  { %v1866_v28 = vpop.f32.mrf.mxu1 }
 0x47c   :  { %v1923_v8 = vadd.f32 %v3187_v46, %v1914_v61 }
 0x47e   :  { %v1927_v7 = vmax.f32 %v1923_v8, 0.0  ;;  %v2369_v8 = vld [vmem:[#allocation2 + $0x568] sm:$0xff] }
 0x480   :  { %2178 = vmatmul.f32.gmra.mxu2 %v1927_v7 }
 0x481   :  { %v1907_v63 = vpop.f32.mrf.mxu2 }
 0x482   :  { %v1915_v26 = vmax.f32 %v1866_v28, %v1907_v63  ;;  %v2368_v28 = vld [vmem:[#allocation2 + $0x560] sm:$0xff] }
 0x483   :  { %v1869_v47 = vpop.f32.mrf.mxu1 }
 0x484   :  { %v1924_v25 = vadd.f32 %v3187_v46, %v1915_v26  ;;  %v2366_v26 = vld [vmem:[#allocation2 + $0x550] sm:$0xff] }
 0x486   :  { %v1928_v2 = vmax.f32 %v1924_v25, 0.0 }
 0x488   :  { %2181 = vmatmul.f32.gmra.mxu2 %v1928_v2 }
 0x489   :  { %v1910_v10 = vpop.f32.mrf.mxu2 }
 0x48a   :  { %v1916_v27 = vmax.f32 %v1869_v47, %v1910_v10  ;;  %v2364_v47 = vld [vmem:[#allocation2 + $0x540] sm:$0xff]  ;;  %v2363_v10 = vld [vmem:[#allocation2 + $0x538] sm:$0xff] }
 0x48c   :  { %v1925_v22 = vadd.f32 %v3187_v46, %v1916_v27  ;;  %v2222_v46 = vld [vmem:[#allocation2 + $0x420] sm:$0xff] }
 0x48d   :  { %2245 = vmatpush.msrb.mxu0 %v2222_v46 }
 0x48e   :  { %v1929_v29 = vmax.f32 %v1925_v22, 0.0  ;;  %v2362_v22 = vld [vmem:[#allocation2 + $0x530] sm:$0xff] }
 0x48f   :  { %2246 = vmatpush.msrb.mxu0 %v2221_v15 }
 0x490   :  { %2067 = vmatpush.msrb.mxu3 %v1929_v29  ;;  %2108 = vmatpush.msra.mxu1 %v1929_v29 }
 0x491   :  { %2184 = vmatmul.f32.gmra.mxu2 %v1929_v29  ;;  %2247 = vmatpush.msrb.mxu0 %v2220_v59 }
 0x492   :  { %2068 = vmatpush.msrb.mxu3 %v1928_v2  ;;  %2109 = vmatpush.msra.mxu1 %v1928_v2  ;;  %v2365_v2 = vld [vmem:[#allocation2 + $0x548] sm:$0xff] }
 0x493   :  { %2248 = vmatpush.msrb.mxu0 %v2219_v13 }
 0x494   :  { %2069 = vmatpush.msrb.mxu3 %v1927_v7  ;;  %2110 = vmatpush.msra.mxu1 %v1927_v7  ;;  %v2367_v7 = vld [vmem:[#allocation2 + $0x558] sm:$0xff] }
 0x495   :  { %2249 = vmatpush.msrb.mxu0 %v2218_v58 }
 0x496   :  { %2070 = vmatpush.msrb.mxu3 %v1926_v11  ;;  %2111 = vmatpush.msra.mxu1 %v1926_v11  ;;  %v2371_v11 = vld [vmem:[#allocation2 + $0x578] sm:$0xff] }
 0x497   :  { %3145 = vmatmul.msk.f32.vlgmr.msrb.gmra.mxu3 %vm2042_vm12, %v4060_v32  ;;  %3149 = vmatmul.msk.f32.vlgmr.msra.gmra.mxu1 %vm2042_vm12, %v4065_v34 }
 0x498   :  { %2188 = vmatpush.msra.mxu3 %v2141_v50  ;;  %v2359_v50 = vld [vmem:[#allocation2 + $0x518] sm:$0xff] }
 0x49a   :  { %2189 = vmatpush.msra.mxu3 %v2140_v20  ;;  %v2357_v20 = vld [vmem:[#allocation2 + $0x508] sm:$0xff] }
 0x49c   :  { %2190 = vmatpush.msra.mxu3 %v2139_v39 }
 0x49e   :  { %2191 = vmatpush.msra.mxu3 %v2138_v40 }
 0x49f   :  { %3146 = vmatmul.msk.f32.gmra.mxu3 %vm2042_vm12, %v4076_v43  ;;  %3150 = vmatmul.msk.f32.gmra.mxu1 %vm2042_vm12, %v4081_v49 }
 0x4a0   :  { %2192 = vmatpush.msra.mxu3 %v2137_v60 }
 0x4a2   :  { %2193 = vmatpush.msra.mxu3 %v2136_v38 }
 0x4a4   :  { %2194 = vmatpush.msra.mxu3 %v2135_v62 }
 0x4a6   :  { %2195 = vmatpush.msra.mxu3 %v2134_v45 }
 0x4a7   :  { %3147 = vmatmul.msk.f32.gmra.mxu3 %vm2042_vm12, %v4093_v35  ;;  %3151 = vmatmul.msk.f32.gmra.mxu1 %vm2042_vm12, %v4098_v42 }
 0x4a8   :  { %2196 = vmatpush.msra.mxu3 %v2133_v4 }
 0x4aa   :  { %2197 = vmatpush.msra.mxu3 %v2132_v0 }
 0x4ac   :  { %2198 = vmatpush.msra.mxu3 %v2131_v57 }
 0x4ae   :  { %2199 = vmatpush.msra.mxu3 %v2130_v23 }
 0x4af   :  { %3148 = vmatmul.msk.f32.gmra.mxu3 %vm2042_vm12, %v4109_v24  ;;  %3152 = vmatmul.msk.f32.gmra.mxu1 %vm2042_vm12, %v4114_v21 }
 0x4b0   :  { %2200 = vmatpush.msra.mxu3 %v2129_v56 }
 0x4b2   :  { %2201 = vmatpush.msra.mxu3 %v2128_v14 }
 0x4b4   :  { %2202 = vmatpush.msra.mxu3 %v2127_v19 }
 0x4b6   :  { %2203 = vmatpush.msra.mxu3 %v2126_v54 }
 0x4b8   :  { %2372 = vmatpush.msrb.mxu3 %v2371_v11  ;;  %v2354_v11 = vld [vmem:[#allocation2 + $0x4f8] sm:$0xff] }
 0x4b9   :  { %2401 = vmatpush.msra.mxu0 %v2354_v11  ;;  %v2571_v11 = vld [vmem:[#allocation2 + $0x690] sm:$0xff] }
 0x4ba   :  { %2373 = vmatpush.msrb.mxu3 %v2370_v9  ;;  %v2353_v9 = vld [vmem:[#allocation2 + $0x4f0] sm:$0xff] }
 0x4bb   :  { %2402 = vmatpush.msra.mxu0 %v2353_v9  ;;  %v2570_v9 = vld [vmem:[#allocation2 + $0x688] sm:$0xff] }
 0x4bc   :  { %2374 = vmatpush.msrb.mxu3 %v2369_v8  ;;  %v2351_v8 = vld [vmem:[#allocation2 + $0x4e0] sm:$0xff] }
 0x4be   :  { %2375 = vmatpush.msrb.mxu3 %v2368_v28  ;;  %v2446_v28 = vld [vmem:[#allocation2 + $0x5f8] sm:$0xff] }
 0x4c0   :  { %2376 = vmatpush.msrb.mxu3 %v2367_v7  ;;  %v2350_v7 = vld [vmem:[#allocation2 + $0x4d8] sm:$0xff] }
 0x4c2   :  { %2377 = vmatpush.msrb.mxu3 %v2366_v26  ;;  %v2349_v26 = vld [vmem:[#allocation2 + $0x4d0] sm:$0xff] }
 0x4c4   :  { %2378 = vmatpush.msrb.mxu3 %v2365_v2  ;;  %v2348_v2 = vld [vmem:[#allocation2 + $0x4c8] sm:$0xff] }
 0x4c6   :  { %2379 = vmatpush.msrb.mxu3 %v2364_v47  ;;  %v2443_v47 = vld [vmem:[#allocation2 + $0x5e0] sm:$0xff] }
 0x4c8   :  { %2380 = vmatpush.msrb.mxu3 %v2363_v10  ;;  %v2347_v10 = vld [vmem:[#allocation2 + $0x4c0] sm:$0xff] }
 0x4ca   :  { %2381 = vmatpush.msrb.mxu3 %v2362_v22  ;;  %v2346_v22 = vld [vmem:[#allocation2 + $0x4b8] sm:$0xff] }
 0x4cc   :  { %2382 = vmatpush.msrb.mxu3 %v2361_v30  ;;  %v2345_v30 = vld [vmem:[#allocation2 + $0x4b0] sm:$0xff] }
 0x4ce   :  { %2383 = vmatpush.msrb.mxu3 %v2360_v33  ;;  %v2343_v33 = vld [vmem:[#allocation2 + $0x4a0] sm:$0xff] }
 0x4d0   :  { %2384 = vmatpush.msrb.mxu3 %v2359_v50  ;;  %v2438_v50 = vld [vmem:[#allocation2 + $0x5b8] sm:$0xff] }
 0x4d2   :  { %2385 = vmatpush.msrb.mxu3 %v2358_v36  ;;  %v2342_v36 = vld [vmem:[#allocation2 + $0x498] sm:$0xff] }
 0x4d4   :  { %2386 = vmatpush.msrb.mxu3 %v2357_v20  ;;  %v2437_v20 = vld [vmem:[#allocation2 + $0x5b0] sm:$0xff] }
 0x4d6   :  { %2387 = vmatpush.msrb.mxu3 %v2356_v37  ;;  %v2341_v37 = vld [vmem:[#allocation2 + $0x490] sm:$0xff] }
 0x4fb   :  { %v2176_v39 = vpop.f32.mrf.mxu2 }
 0x503   :  { %v2179_v60 = vpop.f32.mrf.mxu2 }
 0x50b   :  { %v2182_v51 = vpop.f32.mrf.mxu2 }
 0x514   :  { %v2113_v61 = vpop.f32.mrf.mxu1  ;;  %v2185_v14 = vpop.f32.mrf.mxu2 }
 0x515   :  { %2250 = vmatmul.f32.vlgmr.msrb.gmra.mxu0 %v2113_v61  ;;  %v2352_v61 = vld [vmem:[#allocation2 + $0x4e8] sm:$0xff] }
 0x516   :  { %2403 = vmatpush.msra.mxu0 %v2352_v61  ;;  %v2569_v61 = vld [vmem:[#allocation2 + $0x680] sm:$0xff] }
 0x518   :  { %2404 = vmatpush.msra.mxu0 %v2351_v8 }
 0x51a   :  { %v2072_v63 = vpop.f32.mrf.mxu3  ;;  %2405 = vmatpush.msra.mxu0 %v2350_v7 }
 0x51b   :  { %2204 = vmatmul.f32.vlgmr.msra.gmra.mxu3 %v2072_v63  ;;  %v2445_v63 = vld [vmem:[#allocation2 + $0x5f0] sm:$0xff] }
 0x51c   :  { %v2116_v25 = vpop.f32.mrf.mxu1  ;;  %2406 = vmatpush.msra.mxu0 %v2349_v26 }
 0x51d   :  { %2253 = vmatmul.f32.gmra.mxu0 %v2116_v25  ;;  %v2444_v25 = vld [vmem:[#allocation2 + $0x5e8] sm:$0xff] }
 0x51e   :  { %2407 = vmatpush.msra.mxu0 %v2348_v2 }
 0x520   :  { %2408 = vmatpush.msra.mxu0 %v2347_v10 }
 0x522   :  { %v2075_v27 = vpop.f32.mrf.mxu3  ;;  %2409 = vmatpush.msra.mxu0 %v2346_v22 }
 0x523   :  { %2207 = vmatmul.f32.gmra.mxu3 %v2075_v27  ;;  %v2442_v27 = vld [vmem:[#allocation2 + $0x5d8] sm:$0xff] }
 0x524   :  { %v2119_v29 = vpop.f32.mrf.mxu1  ;;  %2410 = vmatpush.msra.mxu0 %v2345_v30 }
 0x525   :  { %2256 = vmatmul.f32.gmra.mxu0 %v2119_v29  ;;  %v2441_v29 = vld [vmem:[#allocation2 + $0x5d0] sm:$0xff] }
 0x52a   :  { %v2078_v17 = vpop.f32.mrf.mxu3 }
 0x52b   :  { %2210 = vmatmul.f32.gmra.mxu3 %v2078_v17  ;;  %v2440_v17 = vld [vmem:[#allocation2 + $0x5c8] sm:$0xff] }
 0x52c   :  { %v2122_v12 = vpop.f32.mrf.mxu1 }
 0x52d   :  { %2259 = vmatmul.f32.gmra.mxu0 %v2122_v12  ;;  %v2344_v12 = vld [vmem:[#allocation2 + $0x4a8] sm:$0xff] }
 0x52e   :  { %2411 = vmatpush.msra.mxu0 %v2344_v12 }
 0x530   :  { %2412 = vmatpush.msra.mxu0 %v2343_v33 }
 0x532   :  { %v2081_v31 = vpop.f32.mrf.mxu3  ;;  %2413 = vmatpush.msra.mxu0 %v2342_v36 }
 0x533   :  { %2213 = vmatmul.f32.gmra.mxu3 %v2081_v31  ;;  %v2439_v31 = vld [vmem:[#allocation2 + $0x5c0] sm:$0xff] }
 0x534   :  { %2414 = vmatpush.msra.mxu0 %v2341_v37 }
 0x592   :  { %v2251_v16 = vpop.f32.mrf.mxu0 }
 0x59a   :  { %v2254_v38 = vpop.f32.mrf.mxu0 }
 0x59e   :  { %v2205_v40 = vpop.f32.mrf.mxu3 }
 0x59f   :  { %v2206_v41 = vadd.f32 %v2205_v40, %v2176_v39  ;;  %v2436_v39 = vld [vmem:[#allocation2 + $0x5a8] sm:$0xff]  ;;  %v2435_v40 = vld [vmem:[#allocation2 + $0x5a0] sm:$0xff] }
 0x5a1   :  { %v2263_v53 = vadd.f32 %v2251_v16, %v2206_v41  ;;  %v2340_v16 = vld [vmem:[#allocation2 + $0x488] sm:$0xff]  ;;  %v2339_v41 = vld [vmem:[#allocation2 + $0x480] sm:$0xff] }
 0x5a2   :  { %v2257_v4 = vpop.f32.mrf.mxu0  ;;  %2415 = vmatpush.msra.mxu0 %v2340_v16 }
 0x5a3   :  { %v2272_v55 = vadd.f32 %v3188_v44, %v2263_v53  ;;  %v2432_v53 = vld [vmem:[#allocation2 + $0x588] sm:$0xff] }
 0x5a4   :  { %2416 = vmatpush.msra.mxu0 %v2339_v41 }
 0x5a5   :  { %v2276_v62 = vmax.f32 %v2272_v55, 0.0  ;;  %v2584_v55 = vld [vmem:[#allocation2 + $0x6f8] sm:$0xff] }
 0x5a6   :  { %v2208_v6 = vpop.f32.mrf.mxu3  ;;  %2585 = vmatpush.msrb.mxu0 %v2584_v55  ;;  %v2658_v55 = vld [vmem:[#allocation2 + $0x770] sm:$0xff] }
 0x5a7   :  { %v2209_v45 = vadd.f32 %v2208_v6, %v2179_v60  ;;  %2388 = vmatmul.f32.vlgmr.msrb.gmra.mxu3 %v2276_v62  ;;  %v2433_v60 = vld [vmem:[#allocation2 + $0x590] sm:$0xff] }
 0x5a9   :  { %v2264_v48 = vadd.f32 %v2254_v38, %v2209_v45  ;;  %v2431_v38 = vld [vmem:[#allocation2 + $0x580] sm:$0xff]  ;;  %v2582_v45 = vld [vmem:[#allocation2 + $0x6e8] sm:$0xff] }
 0x5aa   :  { %v2260_v46 = vpop.f32.mrf.mxu0 }
 0x5ab   :  { %v2273_v52 = vadd.f32 %v3188_v44, %v2264_v48  ;;  %v2581_v48 = vld [vmem:[#allocation2 + $0x6e0] sm:$0xff] }
 0x5ad   :  { %v2277_v0 = vmax.f32 %v2273_v52, 0.0 }
 0x5ae   :  { %v2211_v57 = vpop.f32.mrf.mxu3 }
 0x5af   :  { %v2212_v23 = vadd.f32 %v2211_v57, %v2182_v51  ;;  %2391 = vmatmul.f32.gmra.mxu3 %v2277_v0  ;;  %v2580_v51 = vld [vmem:[#allocation2 + $0x6d8] sm:$0xff]  ;;  %v2578_v57 = vld [vmem:[#allocation2 + $0x6c8] sm:$0xff] }
 0x5b1   :  { %v2265_v18 = vadd.f32 %v2257_v4, %v2212_v23  ;;  %v2579_v4 = vld [vmem:[#allocation2 + $0x6d0] sm:$0xff]  ;;  %v2577_v23 = vld [vmem:[#allocation2 + $0x6c0] sm:$0xff] }
 0x5b3   :  { %v2274_v56 = vadd.f32 %v3188_v44, %v2265_v18  ;;  %v2576_v18 = vld [vmem:[#allocation2 + $0x6b8] sm:$0xff] }
 0x5b5   :  { %v2278_v19 = vmax.f32 %v2274_v56, 0.0 }
 0x5b6   :  { %v2214_v54 = vpop.f32.mrf.mxu3 }
 0x5b7   :  { %v2215_v15 = vadd.f32 %v2214_v54, %v2185_v14  ;;  %2394 = vmatmul.f32.gmra.mxu3 %v2278_v19 }
 0x5b9   :  { %v2266_v59 = vadd.f32 %v2260_v46, %v2215_v15  ;;  %v2575_v15 = vld [vmem:[#allocation2 + $0x6b0] sm:$0xff] }
 0x5bb   :  { %v2275_v13 = vadd.f32 %v3188_v44, %v2266_v59  ;;  %v2434_v44 = vld [vmem:[#allocation2 + $0x598] sm:$0xff]  ;;  %v2574_v59 = vld [vmem:[#allocation2 + $0x6a8] sm:$0xff] }
 0x5bd   :  { %v2279_v58 = vmax.f32 %v2275_v13, 0.0  ;;  %v2573_v13 = vld [vmem:[#allocation2 + $0x6a0] sm:$0xff] }
 0x5bf   :  { %2292 = vmatpush.msrb.mxu1 %v2279_v58  ;;  %2321 = vmatpush.msrb.mxu2 %v2279_v58 }
 0x5c0   :  { %2397 = vmatmul.f32.gmra.mxu3 %v2279_v58  ;;  %v2572_v58 = vld [vmem:[#allocation2 + $0x698] sm:$0xff] }
 0x5c1   :  { %2293 = vmatpush.msrb.mxu1 %v2278_v19  ;;  %2322 = vmatpush.msrb.mxu2 %v2278_v19 }
 0x5c3   :  { %2294 = vmatpush.msrb.mxu1 %v2277_v0  ;;  %2323 = vmatpush.msrb.mxu2 %v2277_v0 }
 0x5c5   :  { %2295 = vmatpush.msrb.mxu1 %v2276_v62  ;;  %2324 = vmatpush.msrb.mxu2 %v2276_v62  ;;  %v2583_v62 = vld [vmem:[#allocation2 + $0x6f0] sm:$0xff] }
 0x5c6   :  { %3154 = vmatmul.msk.f32.vlgmr.msrb.gmra.mxu1 %vm2042_vm12, %v4060_v32  ;;  %3158 = vmatmul.msk.f32.vlgmr.msrb.gmra.mxu2 %vm2042_vm12, %v4065_v34 }
 0x5c7   :  { %2447 = vmatpush.msra.mxu1 %v2446_v28  ;;  %2586 = vmatpush.msrb.mxu0 %v2583_v62  ;;  %v2565_v62 = vld [vmem:[#allocation2 + $0x668] sm:$0xff] }
 0x5c9   :  { %2448 = vmatpush.msra.mxu1 %v2445_v63  ;;  %2587 = vmatpush.msrb.mxu0 %v2582_v45  ;;  %v3189_v63 = vld [vmem:[%s4188_s2 + $0x3] ss:$0 sm:$0xff]  ;;  %v2655_v45 = vld [vmem:[#allocation2 + $0x758] sm:$0xff] }
 0x5cb   :  { %2449 = vmatpush.msra.mxu1 %v2444_v25  ;;  %2588 = vmatpush.msrb.mxu0 %v2581_v48  ;;  %v2561_v48 = vld [vmem:[#allocation2 + $0x648] sm:$0xff] }
 0x5cd   :  { %2450 = vmatpush.msra.mxu1 %v2443_v47  ;;  %2589 = vmatpush.msrb.mxu0 %v2580_v51  ;;  %v2653_v51 = vld [vmem:[#allocation2 + $0x748] sm:$0xff] }
 0x5ce   :  { %3155 = vmatmul.msk.f32.gmra.mxu1 %vm2042_vm12, %v4076_v43  ;;  %3159 = vmatmul.msk.f32.gmra.mxu2 %vm2042_vm12, %v4081_v49 }
 0x5cf   :  { %2451 = vmatpush.msra.mxu1 %v2442_v27  ;;  %2590 = vmatpush.msrb.mxu0 %v2579_v4  ;;  %v2652_v4 = vld [vmem:[#allocation2 + $0x740] sm:$0xff] }
 0x5d1   :  { %2452 = vmatpush.msra.mxu1 %v2441_v29  ;;  %2591 = vmatpush.msrb.mxu0 %v2578_v57  ;;  %v2651_v57 = vld [vmem:[#allocation2 + $0x738] sm:$0xff] }
 0x5d3   :  { %2453 = vmatpush.msra.mxu1 %v2440_v17  ;;  %2592 = vmatpush.msrb.mxu0 %v2577_v23  ;;  %v2558_v23 = vld [vmem:[#allocation2 + $0x630] sm:$0xff] }
 0x5d5   :  { %2454 = vmatpush.msra.mxu1 %v2439_v31  ;;  %2593 = vmatpush.msrb.mxu0 %v2576_v18  ;;  %v2650_v18 = vld [vmem:[#allocation2 + $0x730] sm:$0xff] }
 0x5d6   :  { %3156 = vmatmul.msk.f32.gmra.mxu1 %vm2042_vm12, %v4093_v35  ;;  %3160 = vmatmul.msk.f32.gmra.mxu2 %vm2042_vm12, %v4098_v42 }
 0x5d7   :  { %2455 = vmatpush.msra.mxu1 %v2438_v50  ;;  %2594 = vmatpush.msrb.mxu0 %v2575_v15  ;;  %v2647_v15 = vld [vmem:[#allocation2 + $0x718] sm:$0xff] }
 0x5d9   :  { %2456 = vmatpush.msra.mxu1 %v2437_v20  ;;  %2595 = vmatpush.msrb.mxu0 %v2574_v59  ;;  %v2554_v59 = vld [vmem:[#allocation2 + $0x610] sm:$0xff] }
 0x5db   :  { %2457 = vmatpush.msra.mxu1 %v2436_v39  ;;  %2596 = vmatpush.msrb.mxu0 %v2573_v13  ;;  %v2646_v13 = vld [vmem:[#allocation2 + $0x710] sm:$0xff] }
 0x5dd   :  { %2458 = vmatpush.msra.mxu1 %v2435_v40  ;;  %2597 = vmatpush.msrb.mxu0 %v2572_v58  ;;  %v2553_v58 = vld [vmem:[#allocation2 + $0x608] sm:$0xff] }
 0x5de   :  { %3157 = vmatmul.msk.f32.gmra.mxu1 %vm2042_vm12, %v4109_v24  ;;  %3161 = vmatmul.msk.f32.gmra.mxu2 %vm2042_vm12, %v4114_v21 }
 0x5df   :  { %2459 = vmatpush.msra.mxu1 %v2434_v44  ;;  %2598 = vmatpush.msrb.mxu0 %v2571_v11  ;;  %v2645_v11 = vld [vmem:[#allocation2 + $0x708] sm:$0xff] }
 0x5e1   :  { %2460 = vmatpush.msra.mxu1 %v2433_v60  ;;  %2599 = vmatpush.msrb.mxu0 %v2570_v9  ;;  %v2552_v9 = vld [vmem:[#allocation2 + $0x600] sm:$0xff] }
 0x5e3   :  { %2461 = vmatpush.msra.mxu1 %v2432_v53  ;;  %2600 = vmatpush.msrb.mxu0 %v2569_v61  ;;  %v2644_v61 = vld [vmem:[#allocation2 + $0x700] sm:$0xff] }
 0x5e5   :  { %2462 = vmatpush.msra.mxu1 %v2431_v38 }
 0x62a   :  { %v2389_v8 = vpop.f32.mrf.mxu3 }
 0x632   :  { %v2392_v2 = vpop.f32.mrf.mxu3 }
 0x63a   :  { %v2395_v31 = vpop.f32.mrf.mxu3 }
 0x643   :  { %v2297_v6 = vpop.f32.mrf.mxu1  ;;  %v2398_v40 = vpop.f32.mrf.mxu3 }
 0x644   :  { %2417 = vmatmul.f32.vlgmr.msra.gmra.mxu0 %v2297_v6  ;;  %v2656_v6 = vld [vmem:[#allocation2 + $0x760] sm:$0xff] }
 0x649   :  { %v2326_v52 = vpop.f32.mrf.mxu2 }
 0x64a   :  { %2463 = vmatmul.f32.vlgmr.msra.gmra.mxu1 %v2326_v52  ;;  %v2560_v52 = vld [vmem:[#allocation2 + $0x640] sm:$0xff] }
 0x64b   :  { %v2300_v0 = vpop.f32.mrf.mxu1 }
 0x64c   :  { %2420 = vmatmul.f32.gmra.mxu0 %v2300_v0  ;;  %v2559_v0 = vld [vmem:[#allocation2 + $0x638] sm:$0xff] }
 0x651   :  { %v2329_v56 = vpop.f32.mrf.mxu2 }
 0x652   :  { %2466 = vmatmul.f32.gmra.mxu1 %v2329_v56  ;;  %v2557_v56 = vld [vmem:[#allocation2 + $0x628] sm:$0xff] }
 0x653   :  { %v2303_v14 = vpop.f32.mrf.mxu1 }
 0x654   :  { %2423 = vmatmul.f32.gmra.mxu0 %v2303_v14  ;;  %v2649_v14 = vld [vmem:[#allocation2 + $0x728] sm:$0xff] }
 0x659   :  { %v2332_v19 = vpop.f32.mrf.mxu2 }
 0x65a   :  { %2469 = vmatmul.f32.gmra.mxu1 %v2332_v19  ;;  %v2556_v19 = vld [vmem:[#allocation2 + $0x620] sm:$0xff] }
 0x65b   :  { %v2306_v54 = vpop.f32.mrf.mxu1 }
 0x65c   :  { %2426 = vmatmul.f32.gmra.mxu0 %v2306_v54  ;;  %v2648_v54 = vld [vmem:[#allocation2 + $0x720] sm:$0xff] }
 0x661   :  { %v2335_v46 = vpop.f32.mrf.mxu2 }
 0x662   :  { %2472 = vmatmul.f32.gmra.mxu1 %v2335_v46  ;;  %v2555_v46 = vld [vmem:[#allocation2 + $0x618] sm:$0xff] }
 0x6c1   :  { %v2418_v28 = vpop.f32.mrf.mxu0 }
 0x6c2   :  { %v2419_v7 = vadd.f32 %v2418_v28, %v2389_v8 }
 0x6c7   :  { %v2464_v26 = vpop.f32.mrf.mxu1 }
 0x6c8   :  { %v2476_v25 = vadd.f32 %v2464_v26, %v2419_v7 }
 0x6c9   :  { %v2421_v47 = vpop.f32.mrf.mxu0 }
 0x6ca   :  { %v2485_v10 = vadd.f32 %v3189_v63, %v2476_v25  ;;  %v2422_v22 = vadd.f32 %v2421_v47, %v2392_v2 }
 0x6cc   :  { %v2489_v27 = vmax.f32 %v2485_v10, 0.0 }
 0x6ce   :  { %2601 = vmatmul.f32.vlgmr.msrb.gmra.mxu0 %v2489_v27 }
 0x6cf   :  { %v2467_v29 = vpop.f32.mrf.mxu1 }
 0x6d0   :  { %v2477_v30 = vadd.f32 %v2467_v29, %v2422_v22 }
 0x6d1   :  { %v2424_v17 = vpop.f32.mrf.mxu0 }
 0x6d2   :  { %v2486_v12 = vadd.f32 %v3189_v63, %v2477_v30  ;;  %v2425_v50 = vadd.f32 %v2424_v17, %v2395_v31 }
 0x6d4   :  { %v2490_v33 = vmax.f32 %v2486_v12, 0.0 }
 0x6d6   :  { %2604 = vmatmul.f32.gmra.mxu0 %v2490_v33 }
 0x6d7   :  { %v2470_v36 = vpop.f32.mrf.mxu1 }
 0x6d8   :  { %v2478_v20 = vadd.f32 %v2470_v36, %v2425_v50 }
 0x6d9   :  { %v2427_v39 = vpop.f32.mrf.mxu0 }
 0x6da   :  { %v2487_v37 = vadd.f32 %v3189_v63, %v2478_v20  ;;  %v2428_v41 = vadd.f32 %v2427_v39, %v2398_v40 }
 0x6dc   :  { %v2491_v16 = vmax.f32 %v2487_v37, 0.0 }
 0x6de   :  { %2607 = vmatmul.f32.gmra.mxu0 %v2491_v16 }
 0x6df   :  { %v2473_v44 = vpop.f32.mrf.mxu1 }
 0x6e0   :  { %v2479_v60 = vadd.f32 %v2473_v44, %v2428_v41  ;;  %v3190_v44 = vld [vmem:[%s4188_s2 + $0x4] ss:$0 sm:$0xff] }
 0x6e2   :  { %v2488_v53 = vadd.f32 %v3189_v63, %v2479_v60 }
 0x6e4   :  { %v2492_v38 = vmax.f32 %v2488_v53, 0.0 }
 0x6e6   :  { %2505 = vmatpush.msra.mxu2 %v2492_v38  ;;  %2534 = vmatpush.msra.mxu3 %v2492_v38 }
 0x6e7   :  { %2610 = vmatmul.f32.gmra.mxu0 %v2492_v38 }
 0x6e8   :  { %2506 = vmatpush.msra.mxu2 %v2491_v16  ;;  %2535 = vmatpush.msra.mxu3 %v2491_v16 }
 0x6ea   :  { %2507 = vmatpush.msra.mxu2 %v2490_v33  ;;  %2536 = vmatpush.msra.mxu3 %v2490_v33 }
 0x6ec   :  { %2508 = vmatpush.msra.mxu2 %v2489_v27  ;;  %2537 = vmatpush.msra.mxu3 %v2489_v27 }
 0x6ed   :  { %3163 = vmatmul.msk.f32.vlgmr.msra.gmra.mxu2 %vm2042_vm12, %v4060_v32  ;;  %3167 = vmatmul.msk.f32.vlgmr.msra.gmra.mxu3 %vm2042_vm12, %v4065_v34  ;;  %v2567_v32 = vld [vmem:[#allocation2 + $0x678] sm:$0xff] }
 0x6ee   :  { %v2659_v34 = vld [vmem:[#allocation2 + $0x778] sm:$0xff]  ;;  %2614 = vmatpush.msrb.mxu1 %v2567_v32 }
 0x6ef   :  { %2660 = vmatpush.msrb.mxu2 %v2659_v34 }
 0x6f1   :  { %2661 = vmatpush.msrb.mxu2 %v2658_v55 }
 0x6f5   :  { %3164 = vmatmul.msk.f32.gmra.mxu2 %vm2042_vm12, %v4076_v43  ;;  %3168 = vmatmul.msk.f32.gmra.mxu3 %vm2042_vm12, %v4081_v49  ;;  %v2566_v43 = vld [vmem:[#allocation2 + $0x670] sm:$0xff]  ;;  %v2657_v49 = vld [vmem:[#allocation2 + $0x768] sm:$0xff] }
 0x6f6   :  { %2615 = vmatpush.msrb.mxu1 %v2566_v43  ;;  %2662 = vmatpush.msrb.mxu2 %v2657_v49 }
 0x6f8   :  { %2616 = vmatpush.msrb.mxu1 %v2565_v62  ;;  %2663 = vmatpush.msrb.mxu2 %v2656_v6  ;;  %v2706_v62 = vmul.u32 4, %v3322_v1  ;;  %v2746_v1 = vld [vmem:[#allocation4 + $0x70] sm:$0xff] }
 0x6fa   :  { %2664 = vmatpush.msrb.mxu2 %v2655_v45  ;;  %vm2707_vm11 = vcmp.eq.s32.totalorder %v3343_v5, %v2706_v62  ;;  %v2872_v45 = vld [vmem:[#allocation4 + $0x170] sm:$0xff] }
 0x6fd   :  { %3165 = vmatmul.msk.f32.gmra.mxu2 %vm2042_vm12, %v4093_v35  ;;  %3169 = vmatmul.msk.f32.gmra.mxu3 %vm2042_vm12, %v4098_v42  ;;  %v2564_v35 = vld [vmem:[#allocation2 + $0x660] sm:$0xff]  ;;  %v2563_v42 = vld [vmem:[#allocation2 + $0x658] sm:$0xff] }
 0x6fe   :  { %2617 = vmatpush.msrb.mxu1 %v2564_v35 }
 0x700   :  { %2618 = vmatpush.msrb.mxu1 %v2563_v42  ;;  %v2873_v42 = vld [vmem:[#allocation4 + $0x178] sm:$0xff] }
 0x705   :  { %3166 = vmatmul.msk.f32.gmra.mxu2 %vm2042_vm12, %v4109_v24  ;;  %3170 = vmatmul.msk.f32.gmra.mxu3 %vm2042_vm12, %v4114_v21  ;;  %v2562_v24 = vld [vmem:[#allocation2 + $0x650] sm:$0xff] }
 0x706   :  { %v2654_v21 = vld [vmem:[#allocation2 + $0x750] sm:$0xff]  ;;  %2619 = vmatpush.msrb.mxu1 %v2562_v24  ;;  %v2790_v24 = vld [vmem:[#allocation4 + $0xf8] sm:$0xff] }
 0x707   :  { %2665 = vmatpush.msrb.mxu2 %v2654_v21  ;;  %v2747_v21 = vld [vmem:[#allocation4 + $0x78] sm:$0xff]  ;;  %2791 = vmatpush.msra.mxu0 %v2790_v24  ;;  %v2926_v24 = vld [vmem:[#allocation4 + $0x1a0] sm:$0xff] }
 0x708   :  { %2620 = vmatpush.msrb.mxu1 %v2561_v48 }
 0x709   :  { %2666 = vmatpush.msrb.mxu2 %v2653_v51  ;;  %v2871_v51 = vld [vmem:[#allocation4 + $0x168] sm:$0xff] }
 0x70a   :  { %2621 = vmatpush.msrb.mxu1 %v2560_v52  ;;  %v2789_v52 = vld [vmem:[#allocation4 + $0xf0] sm:$0xff] }
 0x70b   :  { %2667 = vmatpush.msrb.mxu2 %v2652_v4  ;;  %v2708_v4 = vsel %vm2707_vm11, 1.0, %v3277_v3  ;;  %2792 = vmatpush.msra.mxu0 %v2789_v52  ;;  %v2923_v52 = vld [vmem:[#allocation4 + $0x188] sm:$0xff] }
 0x70c   :  { %2622 = vmatpush.msrb.mxu1 %v2559_v0  ;;  %v2870_v0 = vld [vmem:[#allocation4 + $0x160] sm:$0xff] }
 0x70d   :  { %2668 = vmatpush.msrb.mxu2 %v2651_v57  ;;  %v2748_v57 = vadd.s32 1, %v2706_v62 }
 0x70e   :  { %2623 = vmatpush.msrb.mxu1 %v2558_v23 }
 0x70f   :  { %2669 = vmatpush.msrb.mxu2 %v2650_v18  ;;  %vm2749_vm5 = vcmp.eq.s32.totalorder %v3343_v5, %v2748_v57  ;;  %v2831_v18 = vadd.s32 2, %v2706_v62  ;;  %v2978_v57 = vld [vmem:[#allocation6 + $0x68] sm:$0xff] }
 0x710   :  { %2624 = vmatpush.msrb.mxu1 %v2557_v56  ;;  %v2750_v23 = vsel %vm2749_vm5, 1.0, %v3277_v3 }
 0x711   :  { %2670 = vmatpush.msrb.mxu2 %v2649_v14  ;;  %vm2832_vm15 = vcmp.eq.s32.totalorder %v3343_v5, %v2831_v18  ;;  %v2895_v14 = vadd.s32 3, %v2706_v62  ;;  %v2775_v62 = vld [vmem:[#allocation4 + $0x80] sm:$0xff] }
 0x712   :  { %2625 = vmatpush.msrb.mxu1 %v2556_v19  ;;  %v2833_v56 = vsel %vm2832_vm15, 1.0, %v3277_v3  ;;  %v2937_v19 = vld [vmem:[#allocation4 + $0x1f8] sm:$0xff] }
 0x713   :  { %2671 = vmatpush.msrb.mxu2 %v2648_v54  ;;  %v2936_v54 = vld [vmem:[#allocation4 + $0x1f0] sm:$0xff]  ;;  %vm2896_vm2 = vcmp.eq.s32.totalorder %v3343_v5, %v2895_v14  ;;  %v2787_v5 = vld [vmem:[#allocation4 + $0xe0] sm:$0xff] }
 0x714   :  { %2626 = vmatpush.msrb.mxu1 %v2555_v46  ;;  %v2935_v46 = vld [vmem:[#allocation4 + $0x1e8] sm:$0xff]  ;;  %v2975_v14 = vld [vmem:[#allocation6 + $0x50] sm:$0xff] }
 0x715   :  { %2672 = vmatpush.msrb.mxu2 %v2647_v15  ;;  %v2897_v15 = vsel %vm2896_vm2, 1.0, %v3277_v3  ;;  %v2786_v3 = vld [vmem:[#allocation4 + $0xd8] sm:$0xff] }
 0x716   :  { %2627 = vmatpush.msrb.mxu1 %v2554_v59  ;;  %v2745_v59 = vld [vmem:[#allocation4 + $0x68] sm:$0xff] }
 0x717   :  { %2673 = vmatpush.msrb.mxu2 %v2646_v13  ;;  %v2744_v13 = vld [vmem:[#allocation4 + $0x60] sm:$0xff] }
 0x718   :  { %2628 = vmatpush.msrb.mxu1 %v2553_v58  ;;  %v2743_v58 = vld [vmem:[#allocation4 + $0x58] sm:$0xff] }
 0x719   :  { %2674 = vmatpush.msrb.mxu2 %v2645_v11  ;;  %v2742_v11 = vld [vmem:[#allocation4 + $0x50] sm:$0xff] }
 0x71a   :  { %2629 = vmatpush.msrb.mxu1 %v2552_v9  ;;  %v2788_v9 = vld [vmem:[#allocation4 + $0xe8] sm:$0xff] }
 0x71b   :  { %2675 = vmatpush.msrb.mxu2 %v2644_v61  ;;  %v2741_v61 = vld [vmem:[#allocation4 + $0x48] sm:$0xff]  ;;  %2793 = vmatpush.msra.mxu0 %v2788_v9  ;;  %v2969_v9 = vld [vmem:[#allocation6 + $0x20] sm:$0xff] }
 0x71c   :  { %2811 = vmatpush.msra.mxu1 %v2747_v21  ;;  %v2858_v21 = vld [vmem:[#allocation4 + $0x100] sm:$0xff] }
 0x71d   :  { %2874 = vmatpush.msra.mxu2 %v2873_v42  ;;  %2794 = vmatpush.msra.mxu0 %v2787_v5  ;;  %v2860_v42 = vld [vmem:[#allocation4 + $0x110] sm:$0xff] }
 0x71e   :  { %2812 = vmatpush.msra.mxu1 %v2746_v1  ;;  %v2980_v1 = vld [vmem:[#allocation6 + $0x78] sm:$0xff]  ;;  %v2967_v5 = vld [vmem:[#allocation6 + $0x10] sm:$0xff] }
 0x71f   :  { %2875 = vmatpush.msra.mxu2 %v2872_v45  ;;  %2795 = vmatpush.msra.mxu0 %v2786_v3  ;;  %v2859_v45 = vld [vmem:[#allocation4 + $0x108] sm:$0xff]  ;;  %v2965_v3 = vld [vmem:[#allocation6] sm:$0xff] }
 0x720   :  { %2813 = vmatpush.msra.mxu1 %v2745_v59  ;;  %v2971_v59 = vld [vmem:[#allocation6 + $0x30] sm:$0xff] }
 0x721   :  { %2876 = vmatpush.msra.mxu2 %v2871_v51  ;;  %v2924_v51 = vld [vmem:[#allocation4 + $0x190] sm:$0xff] }
 0x722   :  { %2814 = vmatpush.msra.mxu1 %v2744_v13 }
 0x723   :  { %2877 = vmatpush.msra.mxu2 %v2870_v0  ;;  %v2979_v0 = vld [vmem:[#allocation6 + $0x70] sm:$0xff] }
 0x724   :  { %2815 = vmatpush.msra.mxu1 %v2743_v58 }
 0x726   :  { %2816 = vmatpush.msra.mxu1 %v2742_v11  ;;  %v2970_v11 = vld [vmem:[#allocation6 + $0x28] sm:$0xff] }
 0x728   :  { %2817 = vmatpush.msra.mxu1 %v2741_v61  ;;  %v2968_v61 = vld [vmem:[#allocation6 + $0x18] sm:$0xff] }
 0x74b   :  { %v2602_v10 = vpop.f32.mrf.mxu0 }
 0x753   :  { %v2605_v29 = vpop.f32.mrf.mxu0 }
 0x75b   :  { %v2608_v31 = vpop.f32.mrf.mxu0 }
 0x764   :  { %v2611_v20 = vpop.f32.mrf.mxu0 }
 0x770   :  { %v2510_v8 = vpop.f32.mrf.mxu2  ;;  %v2539_v28 = vpop.f32.mrf.mxu3 }
 0x771   :  { %2630 = vmatmul.f32.vlgmr.msrb.gmra.mxu1 %v2510_v8  ;;  %2676 = vmatmul.f32.vlgmr.msrb.gmra.mxu2 %v2539_v28  ;;  %v2740_v8 = vld [vmem:[#allocation4 + $0x40] sm:$0xff]  ;;  %v2739_v28 = vld [vmem:[#allocation4 + $0x38] sm:$0xff] }
 0x772   :  { %2818 = vmatpush.msra.mxu1 %v2740_v8  ;;  %v2966_v8 = vld [vmem:[#allocation6 + $0x8] sm:$0xff] }
 0x774   :  { %2819 = vmatpush.msra.mxu1 %v2739_v28  ;;  %v3023_v28 = vld [vmem:[#allocation6 + $0xf8] sm:$0xff] }
 0x778   :  { %v2513_v7 = vpop.f32.mrf.mxu2  ;;  %v2542_v63 = vpop.f32.mrf.mxu3 }
 0x779   :  { %2633 = vmatmul.f32.gmra.mxu1 %v2513_v7  ;;  %2679 = vmatmul.f32.gmra.mxu2 %v2542_v63  ;;  %v2785_v7 = vld [vmem:[#allocation4 + $0xd0] sm:$0xff] }
 0x77a   :  { %v2738_v63 = vld [vmem:[#allocation4 + $0x30] sm:$0xff]  ;;  %2796 = vmatpush.msra.mxu0 %v2785_v7 }
 0x77b   :  { %2820 = vmatpush.msra.mxu1 %v2738_v63  ;;  %v3022_v7 = vld [vmem:[#allocation6 + $0xf0] sm:$0xff]  ;;  %v3021_v63 = vld [vmem:[#allocation6 + $0xe8] sm:$0xff] }
 0x780   :  { %v2516_v26 = vpop.f32.mrf.mxu2  ;;  %v2545_v25 = vpop.f32.mrf.mxu3 }
 0x781   :  { %2636 = vmatmul.f32.gmra.mxu1 %v2516_v26  ;;  %2682 = vmatmul.f32.gmra.mxu2 %v2545_v25  ;;  %v2784_v26 = vld [vmem:[#allocation4 + $0xc8] sm:$0xff] }
 0x782   :  { %v2737_v25 = vld [vmem:[#allocation4 + $0x28] sm:$0xff]  ;;  %2797 = vmatpush.msra.mxu0 %v2784_v26  ;;  %v3020_v26 = vld [vmem:[#allocation6 + $0xe0] sm:$0xff] }
 0x783   :  { %2821 = vmatpush.msra.mxu1 %v2737_v25  ;;  %v3019_v25 = vld [vmem:[#allocation6 + $0xd8] sm:$0xff] }
 0x788   :  { %v2519_v2 = vpop.f32.mrf.mxu2  ;;  %v2548_v47 = vpop.f32.mrf.mxu3 }
 0x789   :  { %2639 = vmatmul.f32.gmra.mxu1 %v2519_v2  ;;  %2685 = vmatmul.f32.gmra.mxu2 %v2548_v47  ;;  %v2783_v2 = vld [vmem:[#allocation4 + $0xc0] sm:$0xff] }
 0x78a   :  { %v2736_v47 = vld [vmem:[#allocation4 + $0x20] sm:$0xff]  ;;  %2798 = vmatpush.msra.mxu0 %v2783_v2  ;;  %v3018_v2 = vld [vmem:[#allocation6 + $0xd0] sm:$0xff] }
 0x78b   :  { %2822 = vmatpush.msra.mxu1 %v2736_v47  ;;  %v3017_v47 = vld [vmem:[#allocation6 + $0xc8] sm:$0xff] }
 0x7ee   :  { %v2631_v27 = vpop.f32.mrf.mxu1 }
 0x7ef   :  { %v2632_v41 = vadd.f32 %v2631_v27, %v2602_v10  ;;  %v2869_v10 = vld [vmem:[#allocation4 + $0x158] sm:$0xff] }
 0x7f0   :  { %v2782_v27 = vld [vmem:[#allocation4 + $0xb8] sm:$0xff]  ;;  %2878 = vmatpush.msra.mxu2 %v2869_v10  ;;  %v3016_v10 = vld [vmem:[#allocation6 + $0xc0] sm:$0xff] }
 0x7f1   :  { %2799 = vmatpush.msra.mxu0 %v2782_v27  ;;  %v3015_v27 = vld [vmem:[#allocation6 + $0xb8] sm:$0xff] }
 0x7f4   :  { %v2677_v22 = vpop.f32.mrf.mxu2 }
 0x7f5   :  { %v2689_v38 = vadd.f32 %v2677_v22, %v2632_v41  ;;  %v2735_v22 = vld [vmem:[#allocation4 + $0x18] sm:$0xff] }
 0x7f6   :  { %v2634_v30 = vpop.f32.mrf.mxu1  ;;  %2823 = vmatpush.msra.mxu1 %v2735_v22  ;;  %v2778_v41 = vld [vmem:[#allocation4 + $0x98] sm:$0xff]  ;;  %v3014_v22 = vld [vmem:[#allocation6 + $0xb0] sm:$0xff] }
 0x7f7   :  { %v2635_v37 = vadd.f32 %v2634_v30, %v2605_v29  ;;  %v2698_v49 = vadd.f32 %v3190_v44, %v2689_v38  ;;  %v2868_v29 = vld [vmem:[#allocation4 + $0x150] sm:$0xff]  ;;  %v2863_v38 = vld [vmem:[#allocation4 + $0x128] sm:$0xff] }
 0x7f8   :  { %v2781_v30 = vld [vmem:[#allocation4 + $0xb0] sm:$0xff]  ;;  %2879 = vmatpush.msra.mxu2 %v2868_v29  ;;  %v3013_v29 = vld [vmem:[#allocation6 + $0xa8] sm:$0xff] }
 0x7f9   :  { %v2702_v48 = vmax.f32 %v2698_v49, 0.0  ;;  %2800 = vmatpush.msra.mxu0 %v2781_v30  ;;  %v2928_v49 = vld [vmem:[#allocation4 + $0x1b0] sm:$0xff] }
 0x7fc   :  { %v2680_v17 = vpop.f32.mrf.mxu2 }
 0x7fd   :  { %v2690_v60 = vadd.f32 %v2680_v17, %v2635_v37  ;;  %v2734_v17 = vld [vmem:[#allocation4 + $0x10] sm:$0xff]  ;;  %v2779_v37 = vld [vmem:[#allocation4 + $0xa0] sm:$0xff] }
 0x7fe   :  { %v2637_v12 = vpop.f32.mrf.mxu1  ;;  %2824 = vmatpush.msra.mxu1 %v2734_v17  ;;  %v3012_v17 = vld [vmem:[#allocation6 + $0xa0] sm:$0xff] }
 0x7ff   :  { %v2638_v36 = vadd.f32 %v2637_v12, %v2608_v31  ;;  %v2699_v43 = vadd.f32 %v3190_v44, %v2690_v60  ;;  %v2867_v12 = vld [vmem:[#allocation4 + $0x148] sm:$0xff]  ;;  %v2864_v60 = vld [vmem:[#allocation4 + $0x130] sm:$0xff] }
 0x800   :  { %v2780_v31 = vld [vmem:[#allocation4 + $0xa8] sm:$0xff]  ;;  %2880 = vmatpush.msra.mxu2 %v2867_v12 }
 0x801   :  { %v2703_v6 = vmax.f32 %v2699_v43, 0.0  ;;  %2801 = vmatpush.msra.mxu0 %v2780_v31  ;;  %v2929_v43 = vld [vmem:[#allocation4 + $0x1b8] sm:$0xff] }
 0x803   :  { %2802 = vmatpush.msra.mxu0 %v2779_v37 }
 0x804   :  { %v2683_v33 = vpop.f32.mrf.mxu2 }
 0x805   :  { %v2691_v39 = vadd.f32 %v2683_v33, %v2638_v36  ;;  %v2733_v33 = vld [vmem:[#allocation4 + $0x8] sm:$0xff]  ;;  %v2933_v36 = vld [vmem:[#allocation4 + $0x1d8] sm:$0xff]  ;;  %2803 = vmatpush.msra.mxu0 %v2778_v41  ;;  %v3010_v41 = vld [vmem:[#allocation6 + $0x90] sm:$0xff] }
 0x806   :  { %v2640_v50 = vpop.f32.mrf.mxu1  ;;  %2825 = vmatpush.msra.mxu1 %v2733_v33 }
 0x807   :  { %v2641_v16 = vadd.f32 %v2640_v50, %v2611_v20  ;;  %v2700_v32 = vadd.f32 %v3190_v44, %v2691_v39  ;;  %v2934_v50 = vld [vmem:[#allocation4 + $0x1e0] sm:$0xff]  ;;  %v2932_v39 = vld [vmem:[#allocation4 + $0x1d0] sm:$0xff] }
 0x808   :  { %v2866_v20 = vld [vmem:[#allocation4 + $0x140] sm:$0xff] }
 0x809   :  { %v2704_v35 = vmax.f32 %v2700_v32, 0.0  ;;  %2881 = vmatpush.msra.mxu2 %v2866_v20  ;;  %v2776_v32 = vld [vmem:[#allocation4 + $0x88] sm:$0xff]  ;;  %v3191_v20 = vld [vmem:[%s4191_s5] ss:$0 sm:$0xff] }
 0x80c   :  { %v2686_v40 = vpop.f32.mrf.mxu2 }
 0x80d   :  { %v2692_v53 = vadd.f32 %v2686_v40, %v2641_v16  ;;  %v2732_v16 = vld [vmem:[#allocation4] sm:$0xff]  ;;  %v2865_v40 = vld [vmem:[#allocation4 + $0x138] sm:$0xff] }
 0x80e   :  { %2826 = vmatpush.msra.mxu1 %v2732_v16  ;;  %2882 = vmatpush.msra.mxu2 %v2865_v40 }
 0x80f   :  { %v2701_v34 = vadd.f32 %v3190_v44, %v2692_v53  ;;  %v2931_v44 = vld [vmem:[#allocation4 + $0x1c8] sm:$0xff]  ;;  %v2777_v53 = vld [vmem:[#allocation4 + $0x90] sm:$0xff] }
 0x810   :  { %2883 = vmatpush.msra.mxu2 %v2864_v60  ;;  %2804 = vmatpush.msra.mxu0 %v2777_v53  ;;  %v3008_v60 = vld [vmem:[#allocation6 + $0x80] sm:$0xff] }
 0x811   :  { %v2705_v55 = vmax.f32 %v2701_v34, 0.0  ;;  %v2930_v34 = vld [vmem:[#allocation4 + $0x1c0] sm:$0xff]  ;;  %3029 = vmatpush.msrb.mxu1 %v3023_v28 }
 0x812   :  { %2884 = vmatpush.msra.mxu2 %v2863_v38  ;;  %2805 = vmatpush.msra.mxu0 %v2776_v32  ;;  %v3192_v53 = vld [vmem:[%s4191_s5 + $0x1] ss:$0 sm:$0xff] }
 0x813   :  { %2724 = vmatpush.msrb.mxu3 %v2705_v55  ;;  %3030 = vmatpush.msrb.mxu1 %v3022_v7 }
 0x814   :  { %2806 = vmatpush.msra.mxu0 %v2775_v62 }
 0x815   :  { %2725 = vmatpush.msrb.mxu3 %v2704_v35  ;;  %3031 = vmatpush.msrb.mxu1 %v3021_v63 }
 0x816   :  { %2986 = vmatpush.msrb.mxu0 %v2980_v1 }
 0x817   :  { %2726 = vmatpush.msrb.mxu3 %v2703_v6  ;;  %3032 = vmatpush.msrb.mxu1 %v3020_v26 }
 0x818   :  { %2987 = vmatpush.msrb.mxu0 %v2979_v0 }
 0x819   :  { %2727 = vmatpush.msrb.mxu3 %v2702_v48  ;;  %3033 = vmatpush.msrb.mxu1 %v3019_v25 }
 0x81a   :  { %3172 = vmatmul.msk.f32.vlgmr.msrb.gmra.mxu3 %vm2042_vm12, %v2708_v4  ;;  %v2922_v4 = vld [vmem:[#allocation4 + $0x180] sm:$0xff]  ;;  %2988 = vmatpush.msrb.mxu0 %v2978_v57 }
 0x81b   :  { %2766 = vmatpush.msra.mxu3 %v2705_v55  ;;  %3034 = vmatpush.msrb.mxu1 %v3018_v2 }
 0x81d   :  { %2767 = vmatpush.msra.mxu3 %v2704_v35  ;;  %3035 = vmatpush.msrb.mxu1 %v3017_v47 }
 0x81f   :  { %2768 = vmatpush.msra.mxu3 %v2703_v6  ;;  %3036 = vmatpush.msrb.mxu1 %v3016_v10 }
 0x821   :  { %2769 = vmatpush.msra.mxu3 %v2702_v48  ;;  %3037 = vmatpush.msrb.mxu1 %v3015_v27 }
 0x822   :  { %3173 = vmatmul.msk.f32.vlgmr.msra.gmra.mxu3 %vm2042_vm12, %v2750_v23  ;;  %v2977_v23 = vld [vmem:[#allocation6 + $0x60] sm:$0xff] }
 0x823   :  { %2849 = vmatpush.msrb.mxu3 %v2705_v55  ;;  %2989 = vmatpush.msrb.mxu0 %v2977_v23 }
 0x824   :  { %3038 = vmatpush.msrb.mxu1 %v3014_v22 }
 0x825   :  { %2850 = vmatpush.msrb.mxu3 %v2704_v35 }
 0x826   :  { %3039 = vmatpush.msrb.mxu1 %v3013_v29 }
 0x827   :  { %2851 = vmatpush.msrb.mxu3 %v2703_v6 }
 0x828   :  { %3040 = vmatpush.msrb.mxu1 %v3012_v17 }
 0x829   :  { %2852 = vmatpush.msrb.mxu3 %v2702_v48 }
 0x82a   :  { %3174 = vmatmul.msk.f32.vlgmr.msrb.gmra.mxu3 %vm2042_vm12, %v2833_v56  ;;  %v2976_v56 = vld [vmem:[#allocation6 + $0x58] sm:$0xff] }
 0x82b   :  { %2913 = vmatpush.msra.mxu3 %v2705_v55  ;;  %v2862_v55 = vld [vmem:[#allocation4 + $0x120] sm:$0xff]  ;;  %2990 = vmatpush.msrb.mxu0 %v2976_v56 }
 0x82c   :  { %2885 = vmatpush.msra.mxu2 %v2862_v55 }
 0x82d   :  { %2914 = vmatpush.msra.mxu3 %v2704_v35  ;;  %v2861_v35 = vld [vmem:[#allocation4 + $0x118] sm:$0xff]  ;;  %2991 = vmatpush.msrb.mxu0 %v2975_v14 }
 0x82e   :  { %2886 = vmatpush.msra.mxu2 %v2861_v35 }
 0x82f   :  { %2915 = vmatpush.msra.mxu3 %v2703_v6  ;;  %v2927_v6 = vld [vmem:[#allocation4 + $0x1a8] sm:$0xff] }
 0x830   :  { %2887 = vmatpush.msra.mxu2 %v2860_v42 }
 0x831   :  { %2916 = vmatpush.msra.mxu3 %v2702_v48  ;;  %v2925_v48 = vld [vmem:[#allocation4 + $0x198] sm:$0xff] }
 0x832   :  { %3175 = vmatmul.msk.f32.vlgmr.msra.gmra.mxu3 %vm2042_vm12, %v2897_v15  ;;  %2888 = vmatpush.msra.mxu2 %v2859_v45  ;;  %v2972_v15 = vld [vmem:[#allocation6 + $0x38] sm:$0xff] }
 0x833   :  { %2938 = vmatpush.msrb.mxu3 %v2937_v19  ;;  %v2974_v19 = vld [vmem:[#allocation6 + $0x48] sm:$0xff] }
 0x834   :  { %2889 = vmatpush.msra.mxu2 %v2858_v21  ;;  %2992 = vmatpush.msrb.mxu0 %v2974_v19 }
 0x835   :  { %2939 = vmatpush.msrb.mxu3 %v2936_v54  ;;  %v2973_v54 = vld [vmem:[#allocation6 + $0x40] sm:$0xff] }
 0x836   :  { %2993 = vmatpush.msrb.mxu0 %v2973_v54 }
 0x837   :  { %2940 = vmatpush.msrb.mxu3 %v2935_v46 }
 0x838   :  { %2994 = vmatpush.msrb.mxu0 %v2972_v15 }
 0x839   :  { %2941 = vmatpush.msrb.mxu3 %v2934_v50  ;;  %v3011_v50 = vld [vmem:[#allocation6 + $0x98] sm:$0xff] }
 0x83a   :  { %2995 = vmatpush.msrb.mxu0 %v2971_v59  ;;  %3041 = vmatpush.msrb.mxu1 %v3011_v50 }
 0x83b   :  { %2942 = vmatpush.msrb.mxu3 %v2933_v36 }
 0x83c   :  { %2996 = vmatpush.msrb.mxu0 %v2970_v11  ;;  %3042 = vmatpush.msrb.mxu1 %v3010_v41 }
 0x83d   :  { %2943 = vmatpush.msrb.mxu3 %v2932_v39 }
 0x83e   :  { %2997 = vmatpush.msrb.mxu0 %v2969_v9 }
 0x83f   :  { %2944 = vmatpush.msrb.mxu3 %v2931_v44  ;;  %v3009_v44 = vld [vmem:[#allocation6 + $0x88] sm:$0xff] }
 0x840   :  { %2998 = vmatpush.msrb.mxu0 %v2968_v61  ;;  %3043 = vmatpush.msrb.mxu1 %v3009_v44 }
 0x841   :  { %2945 = vmatpush.msrb.mxu3 %v2930_v34 }
 0x842   :  { %2999 = vmatpush.msrb.mxu0 %v2967_v5  ;;  %3044 = vmatpush.msrb.mxu1 %v3008_v60 }
 0x843   :  { %2946 = vmatpush.msrb.mxu3 %v2929_v43  ;;  %v3193_v43 = vld [vmem:[%s4191_s5 + $0x2] ss:$0 sm:$0xff] }
 0x844   :  { %3000 = vmatpush.msrb.mxu0 %v2966_v8 }
 0x845   :  { %2947 = vmatpush.msrb.mxu3 %v2928_v49 }
 0x846   :  { %3001 = vmatpush.msrb.mxu0 %v2965_v3 }
 0x847   :  { %2948 = vmatpush.msrb.mxu3 %v2927_v6 }
 0x849   :  { %2949 = vmatpush.msrb.mxu3 %v2926_v24 }
 0x84b   :  { %2950 = vmatpush.msrb.mxu3 %v2925_v48 }
 0x84d   :  { %2951 = vmatpush.msrb.mxu3 %v2924_v51 }
 0x84f   :  { %2952 = vmatpush.msrb.mxu3 %v2923_v52 }
 0x851   :  { %2953 = vmatpush.msrb.mxu3 %v2922_v4 }
 0x89d   :  { %v2729_v18 = vpop.f32.mrf.mxu3 }
 0x89e   :  { %2827 = vmatmul.f32.vlgmr.msra.gmra.mxu1 %v2729_v18 }
 0x8a5   :  { %v2771_v46 = vpop.f32.mrf.mxu3 }
 0x8a6   :  { %2807 = vmatmul.f32.vlgmr.msra.gmra.mxu0 %v2771_v46 }
 0x8ad   :  { %v2854_v13 = vpop.f32.mrf.mxu3 }
 0x8ae   :  { %2890 = vmatmul.f32.vlgmr.msra.gmra.mxu2 %v2854_v13 }
 0x8b5   :  { %v2918_v58 = vpop.f32.mrf.mxu3 }
 0x8b6   :  { %2954 = vmatmul.f32.vlgmr.msrb.gmra.mxu3 %v2918_v58 }
 0x91b   :  { %v2828_v12 = vpop.f32.mrf.mxu1 }
 0x923   :  { %v2808_v30 = vpop.f32.mrf.mxu0 }
 0x924   :  { %v2829_v33 = vadd.f32 %v2828_v12, %v2808_v30 }
 0x931   :  { %v2891_v31 = vpop.f32.mrf.mxu2 }
 0x932   :  { %v2894_v36 = vadd.f32 %v2891_v31, %v2829_v33 }
 0x939   :  { %v2955_v37 = vpop.f32.mrf.mxu3 }
 0x93a   :  { %v2958_v39 = vadd.f32 %v2955_v37, %v2894_v36 }
 0x93c   :  { %v2963_v16 = vadd.f32 %v3191_v20, %v2958_v39 }
 0x93e   :  { %v2964_v40 = vmax.f32 %v2963_v16, 0.0 }
 0x940   :  { %3002 = vmatmul.f32.vlgmr.msrb.gmra.mxu0 %v2964_v40 }
 0x9bd   :  { %v3003_v38 = vpop.f32.mrf.mxu0 }
 0x9be   :  { %v3004_v32 = vadd.f32 %v3192_v53, %v3003_v38 }
 0x9c0   :  { %v3006_v34 = vmax.f32 %v3004_v32, 0.0 }
 0x9c2   :  { %3045 = vmatmul.f32.vlgmr.msrb.gmra.mxu1 %v3006_v34 }
 0xa3f   :  { %v3046_v55 = vpop.f32.mrf.mxu1 }
 0xa40   :  { %v3047_v62 = vadd.f32 %v3193_v43, %v3046_v55 }
 0xa42   :  { %3049 = vst [vmem:[%s4192_s6] sm:$0xff] %v3047_v62 }
 0xa43   :  { %3054 = vsyncpa [#allocation3], 1 }
 0xa44   :  { %3055 = vsyncpa [#allocation5], 1 }

</bundles_post_ra>
